<compile_context>
chip_gen: v7x
topology: tpu7x:2x2x1
jax: 0.10.0
libtpu: 0.0.40
codegen_flags: <defaults>
</compile_context>

<pallas_src>
import functools

import jax
import jax.numpy as jnp
from jax.experimental import pallas as pl
from jax.experimental.pallas import tpu as pltpu

LN_EPS = 1e-5


def _erf(x):
    # Abramowitz & Stegun 7.1.26 polynomial (|err| < 1.5e-7) -> matches exact-erf GELU to
    # ~f32 precision.  The divide goes through the EUP approximate reciprocal (free slot).
    a1, a2, a3, a4, a5 = 0.254829592, -0.284496736, 1.421413741, -1.453152027, 1.061405429
    p = 0.3275911
    sgn = jnp.where(x >= 0.0, 1.0, -1.0)
    ax = jnp.abs(x)
    t = pl.reciprocal(1.0 + p * ax, approx=True)
    poly = ((((a5 * t + a4) * t + a3) * t + a2) * t + a1) * t
    return sgn * (1.0 - poly * jnp.exp(-ax * ax))


def _gelu(x):
    # PyTorch nn.GELU() default = exact erf formulation.
    return 0.5 * x * (1.0 + _erf(x * 0.7071067811865476))


def _layernorm(x3, gamma, beta):
    # x3: (Bt, R, L), gamma/beta: (R, L).  PyTorch LayerNorm over all non-batch dims,
    # eps=1e-5, biased variance.  One-pass stats: sum and sum-of-squares together.
    inv_n = 1.0 / float(x3.shape[1] * x3.shape[2])
    s1 = jnp.sum(x3, axis=(1, 2), keepdims=True)
    s2 = jnp.sum(x3 * x3, axis=(1, 2), keepdims=True)
    mu = s1 * inv_n
    var = jnp.maximum(s2 * inv_n - mu * mu, 0.0)
    return (x3 - mu) * jax.lax.rsqrt(var + LN_EPS) * gamma[None] + beta[None]


# --------------------------- fused Pallas kernel ------------------------------

def _mbconv_kernel(x_ref, g0_ref, b0_ref, w1k_ref, g1_ref, b1_ref, wdw_ref,
                   g2_ref, b2_ref, se1_ref, se2_ref, w2k_ref, g3_ref, b3_ref,
                   o_ref, *, D, H, W, Hd, Bt):
    WHd = W * Hd
    DH = D * H
    N = Bt * DH                       # rows of the flat (rows, lanes) working layout
    f32 = jnp.float32

    # ---- PreNorm LN0 + 1x1x1 expand conv (block-diagonal kron matmul on the MXU) ----
    xn = _layernorm(x_ref[...], g0_ref[...], b0_ref[...])              # (Bt, DH, W*C)
    h = jnp.dot(xn.reshape(N, xn.shape[-1]), w1k_ref[...],
                preferred_element_type=f32)                            # (N, W*Hd)

    # ---- LN1 + GELU ----
    h = _gelu(_layernorm(h.reshape(Bt, DH, WHd), g1_ref[...], b1_ref[...]))
    h = h.reshape(N, WHd)

    # ---- depthwise 3x3x3 conv, padding=1, stride=1 ----
    # Each tap is an XLU roll of the un-padded activation; the zero-padding / batch
    # boundary masks are pre-multiplied into the per-tap weight slabs wdw_ref[k], so any
    # wrapped / cross-batch rows and lanes contribute exactly zero.  Single accumulator,
    # weight slabs streamed from VMEM (no per-tap broadcasts).
    acc = jnp.zeros((N, WHd), f32)
    for sx in (-1, 0, 1):                                              # W offset: lane roll
        hs = h if sx == 0 else pltpu.roll(h, (-sx * Hd) % WHd, axis=1)
        for sz in (-1, 0, 1):                                          # D offset
            for sy in (-1, 0, 1):                                      # H offset
                rshift = sz * H + sy                                   # combined row shift
                rolled = hs if rshift == 0 else pltpu.roll(hs, (-rshift) % N, axis=0)
                k = (sz + 1) * 9 + (sy + 1) * 3 + (sx + 1)             # kd*9 + kh*3 + kw
                acc = acc + rolled * wdw_ref[k]

    # ---- LN2 + GELU ----
    g = _gelu(_layernorm(acc.reshape(Bt, DH, WHd), g2_ref[...], b2_ref[...]))

    # ---- SE: global avg pool + Linear(r) + GELU + Linear(Hd) + sigmoid (VPU only) ----
    pooled = jnp.sum(g, axis=1) * (1.0 / float(D * H * W))             # (Bt, W*Hd)
    z = _gelu(jnp.sum(pooled[:, None, :] * se1_ref[...][None], axis=2))          # (Bt, r)
    gate = jax.nn.sigmoid(jnp.sum(z[:, :, None] * se2_ref[...][None], axis=1))   # (Bt, W*Hd)
    g = g * gate[:, None, :]

    # ---- 1x1x1 project conv + LN3 + residual ----
    out = jnp.dot(g.reshape(N, WHd), w2k_ref[...], preferred_element_type=f32)   # (N, W*C)
    out = _layernorm(out.reshape(Bt, DH, out.shape[-1]), g3_ref[...], b3_ref[...])
    o_ref[...] = x_ref[...] + out


# --------------------------- wrapper ------------------------------------------

def _fold_ln_param(p, D, H, W):
    # PyTorch LayerNorm([Ch, D, H, W]) weight/bias (Ch, D, H, W) -> folded (D*H, W*Ch)
    Ch = p.shape[0]
    return jnp.transpose(p, (1, 2, 3, 0)).reshape(D * H, W * Ch)


def _masked_dw_weights(dw_w, D, H, W, Hd, Bt):
    # Depthwise Conv3d weight (Hd, 1, 3, 3, 3) -> (27, Bt*D*H, W*Hd) per-tap slabs with
    # the zero-padding validity masks and the per-channel tap weight baked in, in the same
    # (row = d*H + h, lane = w*Hd + c) fold the kernel uses.
    f32 = jnp.float32
    DH, WHd = D * H, W * Hd
    n = jnp.arange(DH)
    d_i, h_i = n // H, n % H
    l = jnp.arange(WHd)
    w_i, c_i = l // Hd, l % Hd
    wt = dw_w.reshape(Hd, 27).astype(f32)                 # tap index = kd*9 + kh*3 + kw
    slabs = []
    for kd in range(3):
        for kh in range(3):
            for kw in range(3):
                sz, sy, sx = kd - 1, kh - 1, kw - 1
                row_ok = ((d_i + sz >= 0) & (d_i + sz < D) &
                          (h_i + sy >= 0) & (h_i + sy < H)).astype(f32)        # (DH,)
                lane_ok = ((w_i + sx >= 0) & (w_i + sx < W)).astype(f32)       # (WHd,)
                tap = wt[:, kd * 9 + kh * 3 + kw]                              # (Hd,)
                slabs.append(row_ok[:, None] * (tap[c_i] * lane_ok)[None, :])
    wm = jnp.stack(slabs)                                                      # (27, DH, WHd)
    return jnp.tile(wm, (1, Bt, 1))                                            # (27, Bt*DH, WHd)


def _pick_batch_tile(B):
    # Largest divisor of B that still leaves >= 2 grid steps, so both v7x TensorCores get
    # work under dimension_semantics=('parallel',); on v5e/v6e (1 TC) this is just the
    # per-step overhead amortization.
    bt = 1
    for d in range(1, B + 1):
        if B % d == 0 and B // d >= 2:
            bt = d
    return bt


@jax.jit
def mbconv_forward(x_ncdhw, params):
    B, C, D, H, W = x_ncdhw.shape
    conv1_w = params["conv1_w"]                        # torch (Hd, C, 1, 1, 1)
    Hd = conv1_w.shape[0]
    r = params["se_fc1_w"].shape[0]
    oup = params["conv2_w"].shape[0]
    assert oup == C, "residual path requires inp == oup (downsample=False)"

    WC, WHd, DH = W * C, W * Hd, D * H
    Bt = _pick_batch_tile(B)
    f32 = jnp.float32

    # ---- layout glue (tiny, fused under jit): fold W into the lane (minor) dim ----
    # For realistic channel widths (C >= 16 at W = 8) the folded minor dims W*C / W*Hd are
    # already >= 128 lanes, so this layout is lane-dense without any further refold.
    x = jnp.transpose(x_ncdhw, (0, 2, 3, 4, 1)).reshape(B, DH, WC)

    # 1x1x1 convs as block-diagonal kron(I_W, w) matmuls (K = W*C / W*Hd instead of C/Hd).
    eye_w = jnp.eye(W, dtype=f32)
    w1 = conv1_w.reshape(Hd, C).T                      # (C, Hd)
    w1k = jnp.kron(eye_w, w1)                          # (W*C, W*Hd)
    w2 = params["conv2_w"].reshape(C, Hd).T            # (Hd, C)
    w2k = jnp.kron(eye_w, w2)                          # (W*Hd, W*C)

    wdw_m = _masked_dw_weights(params["dw_w"], D, H, W, Hd, Bt)   # (27, Bt*DH, W*Hd)

    se1_l = jnp.tile(params["se_fc1_w"], (1, W))       # (r, W*Hd)
    se2_l = jnp.tile(params["se_fc2_w"].T, (1, W))     # (r, W*Hd)

    g0 = _fold_ln_param(params["ln0_w"], D, H, W); b0 = _fold_ln_param(params["ln0_b"], D, H, W)
    g1 = _fold_ln_param(params["ln1_w"], D, H, W); b1 = _fold_ln_param(params["ln1_b"], D, H, W)
    g2 = _fold_ln_param(params["ln2_w"], D, H, W); b2 = _fold_ln_param(params["ln2_b"], D, H, W)
    g3 = _fold_ln_param(params["ln3_w"], D, H, W); b3 = _fold_ln_param(params["ln3_b"], D, H, W)

    def full(shape):
        nd = len(shape)
        # TODO(synk): pipeline_mode=pl.Buffered(1) here would single-buffer these
        #             constant-index params; only matters for the large-volume D-tiled
        #             variant where the per-element LN params scale with spatial volume.
        return pl.BlockSpec(shape, lambda b, _nd=nd: (0,) * _nd)

    per_batch = pl.BlockSpec((Bt, DH, WC), lambda b: (b, 0, 0))

    kernel = functools.partial(_mbconv_kernel, D=D, H=H, W=W, Hd=Hd, Bt=Bt)

    out = pl.pallas_call(
        kernel,
        out_shape=jax.ShapeDtypeStruct((B, DH, WC), f32),
        grid=(B // Bt,),
        in_specs=[per_batch,                                   # x (aliased to output)
                  full((DH, WC)), full((DH, WC)),              # g0, b0
                  full((WC, WHd)),                             # expand kron weight
                  full((DH, WHd)), full((DH, WHd)),            # g1, b1
                  full((27, Bt * DH, WHd)),                    # pre-masked depthwise taps
                  full((DH, WHd)), full((DH, WHd)),            # g2, b2
                  full((r, WHd)), full((r, WHd)),              # SE fc1, fc2 (lane-tiled)
                  full((WHd, WC)),                             # project kron weight
                  full((DH, WC)), full((DH, WC))],             # g3, b3
        out_specs=per_batch,
        input_output_aliases={0: 0},                           # residual input -> output
        compiler_params=pltpu.CompilerParams(
            dimension_semantics=("parallel",),
            vmem_limit_bytes=32 * 1024 * 1024),
    )(x, g0, b0, w1k, g1, b1, wdw_m, g2, b2, se1_l, se2_l, w2k, g3, b3)

    # glue: back to NCDHW
    return jnp.transpose(out.reshape(B, D, H, W, C), (0, 4, 1, 2, 3))


# --------------------------- plain-JAX reference ------------------------------

def mbconv_reference(x, params):
    # Straightforward JAX port of the PyTorch module (downsample=False), exact erf GELU.
    B, C, D, H, W = x.shape
    Hd = params["conv1_w"].shape[0]
    hi = jax.lax.Precision.HIGHEST

    def ln(v, w, b):
        mu = jnp.mean(v, axis=(1, 2, 3, 4), keepdims=True)
        var = jnp.mean(jnp.square(v - mu), axis=(1, 2, 3, 4), keepdims=True)
        return (v - mu) / jnp.sqrt(var + LN_EPS) * w[None] + b[None]

    def gelu(v):
        return 0.5 * v * (1.0 + jax.lax.erf(v * 0.7071067811865476))

    h = ln(x, params["ln0_w"], params["ln0_b"])
    h = jnp.einsum("bcdhw,oc->bodhw", h, params["conv1_w"].reshape(Hd, C), precision=hi)
    h = gelu(ln(h, params["ln1_w"], params["ln1_b"]))

    hp = jnp.pad(h, ((0, 0), (0, 0), (1, 1), (1, 1), (1, 1)))
    wdw = params["dw_w"]
    conv = jnp.zeros_like(h)
    for kd in range(3):
        for kh in range(3):
            for kw in range(3):
                conv = conv + (hp[:, :, kd:kd + D, kh:kh + H, kw:kw + W]
                               * wdw[:, 0, kd, kh, kw][None, :, None, None, None])

    g = gelu(ln(conv, params["ln2_w"], params["ln2_b"]))
    pooled = jnp.mean(g, axis=(2, 3, 4))                                       # (B, Hd)
    z = gelu(jnp.einsum("bh,rh->br", pooled, params["se_fc1_w"], precision=hi))
    gate = jax.nn.sigmoid(jnp.einsum("br,hr->bh", z, params["se_fc2_w"], precision=hi))
    g = g * gate[:, :, None, None, None]

    out = jnp.einsum("bcdhw,oc->bodhw", g, params["conv2_w"].reshape(C, Hd), precision=hi)
    out = ln(out, params["ln3_w"], params["ln3_b"])
    return x + out


# --------------------------- demo ---------------------------------------------

if __name__ == "__main__":
    B, C, D, H, W = 2, 4, 8, 8, 8            # inp = oup = 4, image_size = (8, 8, 8)
    expansion = 4
    Hd = C * expansion                       # hidden_dim = 16  (W*Hd = 128 lanes)
    r = max(1, int(C * 0.25))                # SE bottleneck = 1

    key = jax.random.PRNGKey(0)
    ks = jax.random.split(key, 16)
    f32 = jnp.float32

    def ln_pair(kw, kb, ch):
        return (1.0 + 0.1 * jax.random.normal(kw, (ch, D, H, W), f32),
                0.05 * jax.random.normal(kb, (ch, D, H, W), f32))

    ln0_w, ln0_b = ln_pair(ks[6], ks[7], C)
    ln1_w, ln1_b = ln_pair(ks[8], ks[9], Hd)
    ln2_w, ln2_b = ln_pair(ks[10], ks[11], Hd)
    ln3_w, ln3_b = ln_pair(ks[12], ks[13], C)

    # Parameters in native PyTorch shapes (documents the import / folding path).
    params = dict(
        ln0_w=ln0_w, ln0_b=ln0_b,
        conv1_w=0.1 * jax.random.normal(ks[0], (Hd, C, 1, 1, 1), f32),
        ln1_w=ln1_w, ln1_b=ln1_b,
        dw_w=0.1 * jax.random.normal(ks[1], (Hd, 1, 3, 3, 3), f32),
        ln2_w=ln2_w, ln2_b=ln2_b,
        se_fc1_w=0.1 * jax.random.normal(ks[2], (r, Hd), f32),
        se_fc2_w=0.1 * jax.random.normal(ks[3], (Hd, r), f32),
        conv2_w=0.1 * jax.random.normal(ks[4], (C, Hd, 1, 1, 1), f32),
        ln3_w=ln3_w, ln3_b=ln3_b,
    )

    x = jax.random.normal(ks[5], (B, C, D, H, W), f32)   # NCDHW like PyTorch

    y = mbconv_forward(x, params)
    jax.block_until_ready(y)

    assert y.shape == (B, C, D, H, W) and y.dtype == jnp.float32
    assert bool(jnp.all(jnp.isfinite(y)))

    # Correctness vs. the plain-JAX port of the PyTorch module.  Tolerance covers the erf
    # polynomial (<=1.5e-7), the EUP approximate reciprocal and matmul accumulation-order
    # differences; genuine layout / roll / mask bugs would be O(1).
    y_ref = mbconv_reference(x, params)
    max_err = float(jnp.max(jnp.abs(y - y_ref)))
    assert max_err < 5e-2, f"kernel mismatch vs reference: max |err| = {max_err}"

    print("KERNEL_OK")
</pallas_src>

<mosaic_0001>
module attributes {stable_mosaic.version = 11 : i64} {
  func.func @_mbconv_kernel(%arg0: i32, %arg1: memref<1x64x32xf32, #tpu.memory_space<vmem>>, %arg2: memref<64x32xf32, #tpu.memory_space<vmem>>, %arg3: memref<64x32xf32, #tpu.memory_space<vmem>>, %arg4: memref<32x128xf32, #tpu.memory_space<vmem>>, %arg5: memref<64x128xf32, #tpu.memory_space<vmem>>, %arg6: memref<64x128xf32, #tpu.memory_space<vmem>>, %arg7: memref<27x64x128xf32, #tpu.memory_space<vmem>>, %arg8: memref<64x128xf32, #tpu.memory_space<vmem>>, %arg9: memref<64x128xf32, #tpu.memory_space<vmem>>, %arg10: memref<1x128xf32, #tpu.memory_space<vmem>>, %arg11: memref<1x128xf32, #tpu.memory_space<vmem>>, %arg12: memref<128x32xf32, #tpu.memory_space<vmem>>, %arg13: memref<64x32xf32, #tpu.memory_space<vmem>>, %arg14: memref<64x32xf32, #tpu.memory_space<vmem>>, %arg15: memref<1x64x32xf32, #tpu.memory_space<vmem>>) attributes {dimension_semantics = [#tpu.dimension_semantics<parallel>], iteration_bounds = array<i64: 2>, scalar_prefetch = 0 : i64, scratch_operands = 0 : i64, tpu.core_type = #tpu.core_type<tc>, window_params = [{transform_indices = @transform_0, window_bounds = array<i64: 1, 64, 32>}, {pipeline_mode = #tpu.pipeline_mode<synchronous>, transform_indices = @transform_1, window_bounds = array<i64: 64, 32>}, {pipeline_mode = #tpu.pipeline_mode<synchronous>, transform_indices = @transform_2, window_bounds = array<i64: 64, 32>}, {pipeline_mode = #tpu.pipeline_mode<synchronous>, transform_indices = @transform_3, window_bounds = array<i64: 32, 128>}, {pipeline_mode = #tpu.pipeline_mode<synchronous>, transform_indices = @transform_4, window_bounds = array<i64: 64, 128>}, {pipeline_mode = #tpu.pipeline_mode<synchronous>, transform_indices = @transform_5, window_bounds = array<i64: 64, 128>}, {pipeline_mode = #tpu.pipeline_mode<synchronous>, transform_indices = @transform_6, window_bounds = array<i64: 27, 64, 128>}, {pipeline_mode = #tpu.pipeline_mode<synchronous>, transform_indices = @transform_7, window_bounds = array<i64: 64, 128>}, {pipeline_mode = #tpu.pipeline_mode<synchronous>, transform_indices = @transform_8, window_bounds = array<i64: 64, 128>}, {pipeline_mode = #tpu.pipeline_mode<synchronous>, transform_indices = @transform_9, window_bounds = array<i64: 1, 128>}, {pipeline_mode = #tpu.pipeline_mode<synchronous>, transform_indices = @transform_10, window_bounds = array<i64: 1, 128>}, {pipeline_mode = #tpu.pipeline_mode<synchronous>, transform_indices = @transform_11, window_bounds = array<i64: 128, 32>}, {pipeline_mode = #tpu.pipeline_mode<synchronous>, transform_indices = @transform_12, window_bounds = array<i64: 64, 32>}, {pipeline_mode = #tpu.pipeline_mode<synchronous>, transform_indices = @transform_13, window_bounds = array<i64: 64, 32>}, {transform_indices = @transform_14, window_bounds = array<i64: 1, 64, 32>}]} {
    %c0 = arith.constant 0 : index
    %c0_0 = arith.constant 0 : index
    %c0_1 = arith.constant 0 : index
    %0 = vector.load %arg1[%c0, %c0_0, %c0_1] : memref<1x64x32xf32, #tpu.memory_space<vmem>>, vector<1x64x32xf32>
    %c0_2 = arith.constant 0 : index
    %c0_3 = arith.constant 0 : index
    %1 = vector.load %arg2[%c0_2, %c0_3] : memref<64x32xf32, #tpu.memory_space<vmem>>, vector<64x32xf32>
    %c0_4 = arith.constant 0 : index
    %c0_5 = arith.constant 0 : index
    %2 = vector.load %arg3[%c0_4, %c0_5] : memref<64x32xf32, #tpu.memory_space<vmem>>, vector<64x32xf32>
    %cst = arith.constant dense<0.000000e+00> : vector<1xf32>
    %3 = vector.multi_reduction <add>, %0, %cst [1, 2] : vector<1x64x32xf32> to vector<1xf32>
    %4 = vector.shape_cast %3 : vector<1xf32> to vector<1x1x1xf32>
    %5 = arith.mulf %0, %0 : vector<1x64x32xf32>
    %cst_6 = arith.constant dense<0.000000e+00> : vector<1xf32>
    %6 = vector.multi_reduction <add>, %5, %cst_6 [1, 2] : vector<1x64x32xf32> to vector<1xf32>
    %7 = vector.shape_cast %6 : vector<1xf32> to vector<1x1x1xf32>
    %cst_7 = arith.constant 4.8828125E-4 : f32
    %8 = vector.broadcast %cst_7 : f32 to vector<1x1x1xf32>
    %9 = arith.mulf %4, %8 : vector<1x1x1xf32>
    %cst_8 = arith.constant 4.8828125E-4 : f32
    %10 = vector.broadcast %cst_8 : f32 to vector<1x1x1xf32>
    %11 = arith.mulf %7, %10 : vector<1x1x1xf32>
    %12 = arith.mulf %9, %9 : vector<1x1x1xf32>
    %13 = arith.subf %11, %12 : vector<1x1x1xf32>
    %cst_9 = arith.constant 0.000000e+00 : f32
    %14 = vector.broadcast %cst_9 : f32 to vector<1x1x1xf32>
    %15 = arith.maximumf %13, %14 : vector<1x1x1xf32>
    %16 = vector.broadcast %9 : vector<1x1x1xf32> to vector<1x64x32xf32>
    %17 = arith.subf %0, %16 : vector<1x64x32xf32>
    %cst_10 = arith.constant 9.99999974E-6 : f32
    %18 = vector.broadcast %cst_10 : f32 to vector<1x1x1xf32>
    %19 = arith.addf %15, %18 : vector<1x1x1xf32>
    %20 = math.rsqrt %19 : vector<1x1x1xf32>
    %21 = vector.broadcast %20 : vector<1x1x1xf32> to vector<1x64x32xf32>
    %22 = arith.mulf %17, %21 : vector<1x64x32xf32>
    %23 = vector.shape_cast %1 : vector<64x32xf32> to vector<1x64x32xf32>
    %24 = arith.mulf %22, %23 : vector<1x64x32xf32>
    %25 = vector.shape_cast %2 : vector<64x32xf32> to vector<1x64x32xf32>
    %26 = arith.addf %24, %25 : vector<1x64x32xf32>
    %27 = vector.shape_cast %26 : vector<1x64x32xf32> to vector<64x32xf32>
    %c0_11 = arith.constant 0 : index
    %c0_12 = arith.constant 0 : index
    %28 = vector.load %arg4[%c0_11, %c0_12] : memref<32x128xf32, #tpu.memory_space<vmem>>, vector<32x128xf32>
    %cst_13 = arith.constant dense<0.000000e+00> : vector<64x128xf32>
    %29 = tpu.matmul %27, %28, %cst_13 {dimension_numbers = #tpu.dot_dimension_numbers<[1], [0], [0], [1], [0, 0, 1, 1], [], []>} : vector<64x32xf32>, vector<32x128xf32>, vector<64x128xf32> -> vector<64x128xf32>
    %30 = vector.shape_cast %29 : vector<64x128xf32> to vector<1x64x128xf32>
    %c0_14 = arith.constant 0 : index
    %c0_15 = arith.constant 0 : index
    %31 = vector.load %arg5[%c0_14, %c0_15] : memref<64x128xf32, #tpu.memory_space<vmem>>, vector<64x128xf32>
    %c0_16 = arith.constant 0 : index
    %c0_17 = arith.constant 0 : index
    %32 = vector.load %arg6[%c0_16, %c0_17] : memref<64x128xf32, #tpu.memory_space<vmem>>, vector<64x128xf32>
    %cst_18 = arith.constant dense<0.000000e+00> : vector<1xf32>
    %33 = vector.multi_reduction <add>, %30, %cst_18 [1, 2] : vector<1x64x128xf32> to vector<1xf32>
    %34 = vector.shape_cast %33 : vector<1xf32> to vector<1x1x1xf32>
    %35 = arith.mulf %30, %30 : vector<1x64x128xf32>
    %cst_19 = arith.constant dense<0.000000e+00> : vector<1xf32>
    %36 = vector.multi_reduction <add>, %35, %cst_19 [1, 2] : vector<1x64x128xf32> to vector<1xf32>
    %37 = vector.shape_cast %36 : vector<1xf32> to vector<1x1x1xf32>
    %cst_20 = arith.constant 1.22070313E-4 : f32
    %38 = vector.broadcast %cst_20 : f32 to vector<1x1x1xf32>
    %39 = arith.mulf %34, %38 : vector<1x1x1xf32>
    %cst_21 = arith.constant 1.22070313E-4 : f32
    %40 = vector.broadcast %cst_21 : f32 to vector<1x1x1xf32>
    %41 = arith.mulf %37, %40 : vector<1x1x1xf32>
    %42 = arith.mulf %39, %39 : vector<1x1x1xf32>
    %43 = arith.subf %41, %42 : vector<1x1x1xf32>
    %cst_22 = arith.constant 0.000000e+00 : f32
    %44 = vector.broadcast %cst_22 : f32 to vector<1x1x1xf32>
    %45 = arith.maximumf %43, %44 : vector<1x1x1xf32>
    %46 = vector.broadcast %39 : vector<1x1x1xf32> to vector<1x64x128xf32>
    %47 = arith.subf %30, %46 : vector<1x64x128xf32>
    %cst_23 = arith.constant 9.99999974E-6 : f32
    %48 = vector.broadcast %cst_23 : f32 to vector<1x1x1xf32>
    %49 = arith.addf %45, %48 : vector<1x1x1xf32>
    %50 = math.rsqrt %49 : vector<1x1x1xf32>
    %51 = vector.broadcast %50 : vector<1x1x1xf32> to vector<1x64x128xf32>
    %52 = arith.mulf %47, %51 : vector<1x64x128xf32>
    %53 = vector.shape_cast %31 : vector<64x128xf32> to vector<1x64x128xf32>
    %54 = arith.mulf %52, %53 : vector<1x64x128xf32>
    %55 = vector.shape_cast %32 : vector<64x128xf32> to vector<1x64x128xf32>
    %56 = arith.addf %54, %55 : vector<1x64x128xf32>
    %cst_24 = arith.constant 5.000000e-01 : f32
    %57 = vector.broadcast %cst_24 : f32 to vector<1x64x128xf32>
    %58 = arith.mulf %57, %56 : vector<1x64x128xf32>
    %cst_25 = arith.constant 0.707106769 : f32
    %59 = vector.broadcast %cst_25 : f32 to vector<1x64x128xf32>
    %60 = arith.mulf %56, %59 : vector<1x64x128xf32>
    %cst_26 = arith.constant 0.000000e+00 : f32
    %61 = vector.broadcast %cst_26 : f32 to vector<1x64x128xf32>
    %62 = arith.cmpf oge, %60, %61 : vector<1x64x128xf32>
    %cst_27 = arith.constant 1.000000e+00 : f32
    %cst_28 = arith.constant -1.000000e+00 : f32
    %63 = vector.broadcast %cst_27 : f32 to vector<1x64x128xf32>
    %64 = vector.broadcast %cst_28 : f32 to vector<1x64x128xf32>
    %65 = arith.select %62, %63, %64 : vector<1x64x128xi1>, vector<1x64x128xf32>
    %66 = math.absf %60 : vector<1x64x128xf32>
    %cst_29 = arith.constant 0.327591091 : f32
    %67 = vector.broadcast %cst_29 : f32 to vector<1x64x128xf32>
    %68 = arith.mulf %67, %66 : vector<1x64x128xf32>
    %cst_30 = arith.constant 1.000000e+00 : f32
    %69 = vector.broadcast %cst_30 : f32 to vector<1x64x128xf32>
    %70 = arith.addf %69, %68 : vector<1x64x128xf32>
    %71 = tpu.reciprocal %70 {approx = true} : vector<1x64x128xf32> -> vector<1x64x128xf32>
    %cst_31 = arith.constant 1.06140542 : f32
    %72 = vector.broadcast %cst_31 : f32 to vector<1x64x128xf32>
    %73 = arith.mulf %72, %71 : vector<1x64x128xf32>
    %cst_32 = arith.constant -1.45315206 : f32
    %74 = vector.broadcast %cst_32 : f32 to vector<1x64x128xf32>
    %75 = arith.addf %73, %74 : vector<1x64x128xf32>
    %76 = arith.mulf %75, %71 : vector<1x64x128xf32>
    %cst_33 = arith.constant 1.42141378 : f32
    %77 = vector.broadcast %cst_33 : f32 to vector<1x64x128xf32>
    %78 = arith.addf %76, %77 : vector<1x64x128xf32>
    %79 = arith.mulf %78, %71 : vector<1x64x128xf32>
    %cst_34 = arith.constant -0.284496725 : f32
    %80 = vector.broadcast %cst_34 : f32 to vector<1x64x128xf32>
    %81 = arith.addf %79, %80 : vector<1x64x128xf32>
    %82 = arith.mulf %81, %71 : vector<1x64x128xf32>
    %cst_35 = arith.constant 0.254829586 : f32
    %83 = vector.broadcast %cst_35 : f32 to vector<1x64x128xf32>
    %84 = arith.addf %82, %83 : vector<1x64x128xf32>
    %85 = arith.mulf %84, %71 : vector<1x64x128xf32>
    %cst_36 = arith.constant 0.000000e+00 : f32
    %86 = vector.broadcast %cst_36 : f32 to vector<1x64x128xf32>
    %87 = arith.subf %86, %66 : vector<1x64x128xf32>
    %88 = arith.mulf %87, %66 : vector<1x64x128xf32>
    %89 = math.exp %88 : vector<1x64x128xf32>
    %90 = arith.mulf %85, %89 : vector<1x64x128xf32>
    %cst_37 = arith.constant 1.000000e+00 : f32
    %91 = vector.broadcast %cst_37 : f32 to vector<1x64x128xf32>
    %92 = arith.subf %91, %90 : vector<1x64x128xf32>
    %93 = arith.mulf %65, %92 : vector<1x64x128xf32>
    %cst_38 = arith.constant 1.000000e+00 : f32
    %94 = vector.broadcast %cst_38 : f32 to vector<1x64x128xf32>
    %95 = arith.addf %94, %93 : vector<1x64x128xf32>
    %96 = arith.mulf %58, %95 : vector<1x64x128xf32>
    %97 = vector.shape_cast %96 : vector<1x64x128xf32> to vector<64x128xf32>
    %cst_39 = arith.constant 0.000000e+00 : f32
    %98 = vector.broadcast %cst_39 : f32 to vector<64x128xf32>
    %c16_i32 = arith.constant 16 : i32
    %99 = tpu.dynamic_rotate %97 by %c16_i32 dim 1 : vector<64x128xf32>, i32 -> vector<64x128xf32>
    %c9_i32 = arith.constant 9 : i32
    %100 = tpu.dynamic_rotate %99 by %c9_i32 dim 0 : vector<64x128xf32>, i32 -> vector<64x128xf32>
    %c0_40 = arith.constant 0 : index
    %c0_41 = arith.constant 0 : index
    %c0_42 = arith.constant 0 : index
    %101 = vector.load %arg7[%c0_40, %c0_41, %c0_42] : memref<27x64x128xf32, #tpu.memory_space<vmem>>, vector<1x64x128xf32>
    %102 = vector.shape_cast %101 : vector<1x64x128xf32> to vector<64x128xf32>
    %103 = arith.mulf %100, %102 : vector<64x128xf32>
    %104 = arith.addf %98, %103 : vector<64x128xf32>
    %c8_i32 = arith.constant 8 : i32
    %105 = tpu.dynamic_rotate %99 by %c8_i32 dim 0 : vector<64x128xf32>, i32 -> vector<64x128xf32>
    %c3 = arith.constant 3 : index
    %c0_43 = arith.constant 0 : index
    %c0_44 = arith.constant 0 : index
    %106 = vector.load %arg7[%c3, %c0_43, %c0_44] : memref<27x64x128xf32, #tpu.memory_space<vmem>>, vector<1x64x128xf32>
    %107 = vector.shape_cast %106 : vector<1x64x128xf32> to vector<64x128xf32>
    %108 = arith.mulf %105, %107 : vector<64x128xf32>
    %109 = arith.addf %104, %108 : vector<64x128xf32>
    %c7_i32 = arith.constant 7 : i32
    %110 = tpu.dynamic_rotate %99 by %c7_i32 dim 0 : vector<64x128xf32>, i32 -> vector<64x128xf32>
    %c6 = arith.constant 6 : index
    %c0_45 = arith.constant 0 : index
    %c0_46 = arith.constant 0 : index
    %111 = vector.load %arg7[%c6, %c0_45, %c0_46] : memref<27x64x128xf32, #tpu.memory_space<vmem>>, vector<1x64x128xf32>
    %112 = vector.shape_cast %111 : vector<1x64x128xf32> to vector<64x128xf32>
    %113 = arith.mulf %110, %112 : vector<64x128xf32>
    %114 = arith.addf %109, %113 : vector<64x128xf32>
    %c1_i32 = arith.constant 1 : i32
    %115 = tpu.dynamic_rotate %99 by %c1_i32 dim 0 : vector<64x128xf32>, i32 -> vector<64x128xf32>
    %c9 = arith.constant 9 : index
    %c0_47 = arith.constant 0 : index
    %c0_48 = arith.constant 0 : index
    %116 = vector.load %arg7[%c9, %c0_47, %c0_48] : memref<27x64x128xf32, #tpu.memory_space<vmem>>, vector<1x64x128xf32>
    %117 = vector.shape_cast %116 : vector<1x64x128xf32> to vector<64x128xf32>
    %118 = arith.mulf %115, %117 : vector<64x128xf32>
    %119 = arith.addf %114, %118 : vector<64x128xf32>
    %c12 = arith.constant 12 : index
    %c0_49 = arith.constant 0 : index
    %c0_50 = arith.constant 0 : index
    %120 = vector.load %arg7[%c12, %c0_49, %c0_50] : memref<27x64x128xf32, #tpu.memory_space<vmem>>, vector<1x64x128xf32>
    %121 = vector.shape_cast %120 : vector<1x64x128xf32> to vector<64x128xf32>
    %122 = arith.mulf %99, %121 : vector<64x128xf32>
    %123 = arith.addf %119, %122 : vector<64x128xf32>
    %c63_i32 = arith.constant 63 : i32
    %124 = tpu.dynamic_rotate %99 by %c63_i32 dim 0 : vector<64x128xf32>, i32 -> vector<64x128xf32>
    %c15 = arith.constant 15 : index
    %c0_51 = arith.constant 0 : index
    %c0_52 = arith.constant 0 : index
    %125 = vector.load %arg7[%c15, %c0_51, %c0_52] : memref<27x64x128xf32, #tpu.memory_space<vmem>>, vector<1x64x128xf32>
    %126 = vector.shape_cast %125 : vector<1x64x128xf32> to vector<64x128xf32>
    %127 = arith.mulf %124, %126 : vector<64x128xf32>
    %128 = arith.addf %123, %127 : vector<64x128xf32>
    %c57_i32 = arith.constant 57 : i32
    %129 = tpu.dynamic_rotate %99 by %c57_i32 dim 0 : vector<64x128xf32>, i32 -> vector<64x128xf32>
    %c18 = arith.constant 18 : index
    %c0_53 = arith.constant 0 : index
    %c0_54 = arith.constant 0 : index
    %130 = vector.load %arg7[%c18, %c0_53, %c0_54] : memref<27x64x128xf32, #tpu.memory_space<vmem>>, vector<1x64x128xf32>
    %131 = vector.shape_cast %130 : vector<1x64x128xf32> to vector<64x128xf32>
    %132 = arith.mulf %129, %131 : vector<64x128xf32>
    %133 = arith.addf %128, %132 : vector<64x128xf32>
    %c56_i32 = arith.constant 56 : i32
    %134 = tpu.dynamic_rotate %99 by %c56_i32 dim 0 : vector<64x128xf32>, i32 -> vector<64x128xf32>
    %c21 = arith.constant 21 : index
    %c0_55 = arith.constant 0 : index
    %c0_56 = arith.constant 0 : index
    %135 = vector.load %arg7[%c21, %c0_55, %c0_56] : memref<27x64x128xf32, #tpu.memory_space<vmem>>, vector<1x64x128xf32>
    %136 = vector.shape_cast %135 : vector<1x64x128xf32> to vector<64x128xf32>
    %137 = arith.mulf %134, %136 : vector<64x128xf32>
    %138 = arith.addf %133, %137 : vector<64x128xf32>
    %c55_i32 = arith.constant 55 : i32
    %139 = tpu.dynamic_rotate %99 by %c55_i32 dim 0 : vector<64x128xf32>, i32 -> vector<64x128xf32>
    %c24 = arith.constant 24 : index
    %c0_57 = arith.constant 0 : index
    %c0_58 = arith.constant 0 : index
    %140 = vector.load %arg7[%c24, %c0_57, %c0_58] : memref<27x64x128xf32, #tpu.memory_space<vmem>>, vector<1x64x128xf32>
    %141 = vector.shape_cast %140 : vector<1x64x128xf32> to vector<64x128xf32>
    %142 = arith.mulf %139, %141 : vector<64x128xf32>
    %143 = arith.addf %138, %142 : vector<64x128xf32>
    %c9_i32_59 = arith.constant 9 : i32
    %144 = tpu.dynamic_rotate %97 by %c9_i32_59 dim 0 : vector<64x128xf32>, i32 -> vector<64x128xf32>
    %c1 = arith.constant 1 : index
    %c0_60 = arith.constant 0 : index
    %c0_61 = arith.constant 0 : index
    %145 = vector.load %arg7[%c1, %c0_60, %c0_61] : memref<27x64x128xf32, #tpu.memory_space<vmem>>, vector<1x64x128xf32>
    %146 = vector.shape_cast %145 : vector<1x64x128xf32> to vector<64x128xf32>
    %147 = arith.mulf %144, %146 : vector<64x128xf32>
    %148 = arith.addf %143, %147 : vector<64x128xf32>
    %c8_i32_62 = arith.constant 8 : i32
    %149 = tpu.dynamic_rotate %97 by %c8_i32_62 dim 0 : vector<64x128xf32>, i32 -> vector<64x128xf32>
    %c4 = arith.constant 4 : index
    %c0_63 = arith.constant 0 : index
    %c0_64 = arith.constant 0 : index
    %150 = vector.load %arg7[%c4, %c0_63, %c0_64] : memref<27x64x128xf32, #tpu.memory_space<vmem>>, vector<1x64x128xf32>
    %151 = vector.shape_cast %150 : vector<1x64x128xf32> to vector<64x128xf32>
    %152 = arith.mulf %149, %151 : vector<64x128xf32>
    %153 = arith.addf %148, %152 : vector<64x128xf32>
    %c7_i32_65 = arith.constant 7 : i32
    %154 = tpu.dynamic_rotate %97 by %c7_i32_65 dim 0 : vector<64x128xf32>, i32 -> vector<64x128xf32>
    %c7 = arith.constant 7 : index
    %c0_66 = arith.constant 0 : index
    %c0_67 = arith.constant 0 : index
    %155 = vector.load %arg7[%c7, %c0_66, %c0_67] : memref<27x64x128xf32, #tpu.memory_space<vmem>>, vector<1x64x128xf32>
    %156 = vector.shape_cast %155 : vector<1x64x128xf32> to vector<64x128xf32>
    %157 = arith.mulf %154, %156 : vector<64x128xf32>
    %158 = arith.addf %153, %157 : vector<64x128xf32>
    %c1_i32_68 = arith.constant 1 : i32
    %159 = tpu.dynamic_rotate %97 by %c1_i32_68 dim 0 : vector<64x128xf32>, i32 -> vector<64x128xf32>
    %c10 = arith.constant 10 : index
    %c0_69 = arith.constant 0 : index
    %c0_70 = arith.constant 0 : index
    %160 = vector.load %arg7[%c10, %c0_69, %c0_70] : memref<27x64x128xf32, #tpu.memory_space<vmem>>, vector<1x64x128xf32>
    %161 = vector.shape_cast %160 : vector<1x64x128xf32> to vector<64x128xf32>
    %162 = arith.mulf %159, %161 : vector<64x128xf32>
    %163 = arith.addf %158, %162 : vector<64x128xf32>
    %c13 = arith.constant 13 : index
    %c0_71 = arith.constant 0 : index
    %c0_72 = arith.constant 0 : index
    %164 = vector.load %arg7[%c13, %c0_71, %c0_72] : memref<27x64x128xf32, #tpu.memory_space<vmem>>, vector<1x64x128xf32>
    %165 = vector.shape_cast %164 : vector<1x64x128xf32> to vector<64x128xf32>
    %166 = arith.mulf %97, %165 : vector<64x128xf32>
    %167 = arith.addf %163, %166 : vector<64x128xf32>
    %c63_i32_73 = arith.constant 63 : i32
    %168 = tpu.dynamic_rotate %97 by %c63_i32_73 dim 0 : vector<64x128xf32>, i32 -> vector<64x128xf32>
    %c16 = arith.constant 16 : index
    %c0_74 = arith.constant 0 : index
    %c0_75 = arith.constant 0 : index
    %169 = vector.load %arg7[%c16, %c0_74, %c0_75] : memref<27x64x128xf32, #tpu.memory_space<vmem>>, vector<1x64x128xf32>
    %170 = vector.shape_cast %169 : vector<1x64x128xf32> to vector<64x128xf32>
    %171 = arith.mulf %168, %170 : vector<64x128xf32>
    %172 = arith.addf %167, %171 : vector<64x128xf32>
    %c57_i32_76 = arith.constant 57 : i32
    %173 = tpu.dynamic_rotate %97 by %c57_i32_76 dim 0 : vector<64x128xf32>, i32 -> vector<64x128xf32>
    %c19 = arith.constant 19 : index
    %c0_77 = arith.constant 0 : index
    %c0_78 = arith.constant 0 : index
    %174 = vector.load %arg7[%c19, %c0_77, %c0_78] : memref<27x64x128xf32, #tpu.memory_space<vmem>>, vector<1x64x128xf32>
    %175 = vector.shape_cast %174 : vector<1x64x128xf32> to vector<64x128xf32>
    %176 = arith.mulf %173, %175 : vector<64x128xf32>
    %177 = arith.addf %172, %176 : vector<64x128xf32>
    %c56_i32_79 = arith.constant 56 : i32
    %178 = tpu.dynamic_rotate %97 by %c56_i32_79 dim 0 : vector<64x128xf32>, i32 -> vector<64x128xf32>
    %c22 = arith.constant 22 : index
    %c0_80 = arith.constant 0 : index
    %c0_81 = arith.constant 0 : index
    %179 = vector.load %arg7[%c22, %c0_80, %c0_81] : memref<27x64x128xf32, #tpu.memory_space<vmem>>, vector<1x64x128xf32>
    %180 = vector.shape_cast %179 : vector<1x64x128xf32> to vector<64x128xf32>
    %181 = arith.mulf %178, %180 : vector<64x128xf32>
    %182 = arith.addf %177, %181 : vector<64x128xf32>
    %c55_i32_82 = arith.constant 55 : i32
    %183 = tpu.dynamic_rotate %97 by %c55_i32_82 dim 0 : vector<64x128xf32>, i32 -> vector<64x128xf32>
    %c25 = arith.constant 25 : index
    %c0_83 = arith.constant 0 : index
    %c0_84 = arith.constant 0 : index
    %184 = vector.load %arg7[%c25, %c0_83, %c0_84] : memref<27x64x128xf32, #tpu.memory_space<vmem>>, vector<1x64x128xf32>
    %185 = vector.shape_cast %184 : vector<1x64x128xf32> to vector<64x128xf32>
    %186 = arith.mulf %183, %185 : vector<64x128xf32>
    %187 = arith.addf %182, %186 : vector<64x128xf32>
    %c112_i32 = arith.constant 112 : i32
    %188 = tpu.dynamic_rotate %97 by %c112_i32 dim 1 : vector<64x128xf32>, i32 -> vector<64x128xf32>
    %c9_i32_85 = arith.constant 9 : i32
    %189 = tpu.dynamic_rotate %188 by %c9_i32_85 dim 0 : vector<64x128xf32>, i32 -> vector<64x128xf32>
    %c2 = arith.constant 2 : index
    %c0_86 = arith.constant 0 : index
    %c0_87 = arith.constant 0 : index
    %190 = vector.load %arg7[%c2, %c0_86, %c0_87] : memref<27x64x128xf32, #tpu.memory_space<vmem>>, vector<1x64x128xf32>
    %191 = vector.shape_cast %190 : vector<1x64x128xf32> to vector<64x128xf32>
    %192 = arith.mulf %189, %191 : vector<64x128xf32>
    %193 = arith.addf %187, %192 : vector<64x128xf32>
    %c8_i32_88 = arith.constant 8 : i32
    %194 = tpu.dynamic_rotate %188 by %c8_i32_88 dim 0 : vector<64x128xf32>, i32 -> vector<64x128xf32>
    %c5 = arith.constant 5 : index
    %c0_89 = arith.constant 0 : index
    %c0_90 = arith.constant 0 : index
    %195 = vector.load %arg7[%c5, %c0_89, %c0_90] : memref<27x64x128xf32, #tpu.memory_space<vmem>>, vector<1x64x128xf32>
    %196 = vector.shape_cast %195 : vector<1x64x128xf32> to vector<64x128xf32>
    %197 = arith.mulf %194, %196 : vector<64x128xf32>
    %198 = arith.addf %193, %197 : vector<64x128xf32>
    %c7_i32_91 = arith.constant 7 : i32
    %199 = tpu.dynamic_rotate %188 by %c7_i32_91 dim 0 : vector<64x128xf32>, i32 -> vector<64x128xf32>
    %c8 = arith.constant 8 : index
    %c0_92 = arith.constant 0 : index
    %c0_93 = arith.constant 0 : index
    %200 = vector.load %arg7[%c8, %c0_92, %c0_93] : memref<27x64x128xf32, #tpu.memory_space<vmem>>, vector<1x64x128xf32>
    %201 = vector.shape_cast %200 : vector<1x64x128xf32> to vector<64x128xf32>
    %202 = arith.mulf %199, %201 : vector<64x128xf32>
    %203 = arith.addf %198, %202 : vector<64x128xf32>
    %c1_i32_94 = arith.constant 1 : i32
    %204 = tpu.dynamic_rotate %188 by %c1_i32_94 dim 0 : vector<64x128xf32>, i32 -> vector<64x128xf32>
    %c11 = arith.constant 11 : index
    %c0_95 = arith.constant 0 : index
    %c0_96 = arith.constant 0 : index
    %205 = vector.load %arg7[%c11, %c0_95, %c0_96] : memref<27x64x128xf32, #tpu.memory_space<vmem>>, vector<1x64x128xf32>
    %206 = vector.shape_cast %205 : vector<1x64x128xf32> to vector<64x128xf32>
    %207 = arith.mulf %204, %206 : vector<64x128xf32>
    %208 = arith.addf %203, %207 : vector<64x128xf32>
    %c14 = arith.constant 14 : index
    %c0_97 = arith.constant 0 : index
    %c0_98 = arith.constant 0 : index
    %209 = vector.load %arg7[%c14, %c0_97, %c0_98] : memref<27x64x128xf32, #tpu.memory_space<vmem>>, vector<1x64x128xf32>
    %210 = vector.shape_cast %209 : vector<1x64x128xf32> to vector<64x128xf32>
    %211 = arith.mulf %188, %210 : vector<64x128xf32>
    %212 = arith.addf %208, %211 : vector<64x128xf32>
    %c63_i32_99 = arith.constant 63 : i32
    %213 = tpu.dynamic_rotate %188 by %c63_i32_99 dim 0 : vector<64x128xf32>, i32 -> vector<64x128xf32>
    %c17 = arith.constant 17 : index
    %c0_100 = arith.constant 0 : index
    %c0_101 = arith.constant 0 : index
    %214 = vector.load %arg7[%c17, %c0_100, %c0_101] : memref<27x64x128xf32, #tpu.memory_space<vmem>>, vector<1x64x128xf32>
    %215 = vector.shape_cast %214 : vector<1x64x128xf32> to vector<64x128xf32>
    %216 = arith.mulf %213, %215 : vector<64x128xf32>
    %217 = arith.addf %212, %216 : vector<64x128xf32>
    %c57_i32_102 = arith.constant 57 : i32
    %218 = tpu.dynamic_rotate %188 by %c57_i32_102 dim 0 : vector<64x128xf32>, i32 -> vector<64x128xf32>
    %c20 = arith.constant 20 : index
    %c0_103 = arith.constant 0 : index
    %c0_104 = arith.constant 0 : index
    %219 = vector.load %arg7[%c20, %c0_103, %c0_104] : memref<27x64x128xf32, #tpu.memory_space<vmem>>, vector<1x64x128xf32>
    %220 = vector.shape_cast %219 : vector<1x64x128xf32> to vector<64x128xf32>
    %221 = arith.mulf %218, %220 : vector<64x128xf32>
    %222 = arith.addf %217, %221 : vector<64x128xf32>
    %c56_i32_105 = arith.constant 56 : i32
    %223 = tpu.dynamic_rotate %188 by %c56_i32_105 dim 0 : vector<64x128xf32>, i32 -> vector<64x128xf32>
    %c23 = arith.constant 23 : index
    %c0_106 = arith.constant 0 : index
    %c0_107 = arith.constant 0 : index
    %224 = vector.load %arg7[%c23, %c0_106, %c0_107] : memref<27x64x128xf32, #tpu.memory_space<vmem>>, vector<1x64x128xf32>
    %225 = vector.shape_cast %224 : vector<1x64x128xf32> to vector<64x128xf32>
    %226 = arith.mulf %223, %225 : vector<64x128xf32>
    %227 = arith.addf %222, %226 : vector<64x128xf32>
    %c55_i32_108 = arith.constant 55 : i32
    %228 = tpu.dynamic_rotate %188 by %c55_i32_108 dim 0 : vector<64x128xf32>, i32 -> vector<64x128xf32>
    %c26 = arith.constant 26 : index
    %c0_109 = arith.constant 0 : index
    %c0_110 = arith.constant 0 : index
    %229 = vector.load %arg7[%c26, %c0_109, %c0_110] : memref<27x64x128xf32, #tpu.memory_space<vmem>>, vector<1x64x128xf32>
    %230 = vector.shape_cast %229 : vector<1x64x128xf32> to vector<64x128xf32>
    %231 = arith.mulf %228, %230 : vector<64x128xf32>
    %232 = arith.addf %227, %231 : vector<64x128xf32>
    %233 = vector.shape_cast %232 : vector<64x128xf32> to vector<1x64x128xf32>
    %c0_111 = arith.constant 0 : index
    %c0_112 = arith.constant 0 : index
    %234 = vector.load %arg8[%c0_111, %c0_112] : memref<64x128xf32, #tpu.memory_space<vmem>>, vector<64x128xf32>
    %c0_113 = arith.constant 0 : index
    %c0_114 = arith.constant 0 : index
    %235 = vector.load %arg9[%c0_113, %c0_114] : memref<64x128xf32, #tpu.memory_space<vmem>>, vector<64x128xf32>
    %cst_115 = arith.constant dense<0.000000e+00> : vector<1xf32>
    %236 = vector.multi_reduction <add>, %233, %cst_115 [1, 2] : vector<1x64x128xf32> to vector<1xf32>
    %237 = vector.shape_cast %236 : vector<1xf32> to vector<1x1x1xf32>
    %238 = arith.mulf %233, %233 : vector<1x64x128xf32>
    %cst_116 = arith.constant dense<0.000000e+00> : vector<1xf32>
    %239 = vector.multi_reduction <add>, %238, %cst_116 [1, 2] : vector<1x64x128xf32> to vector<1xf32>
    %240 = vector.shape_cast %239 : vector<1xf32> to vector<1x1x1xf32>
    %cst_117 = arith.constant 1.22070313E-4 : f32
    %241 = vector.broadcast %cst_117 : f32 to vector<1x1x1xf32>
    %242 = arith.mulf %237, %241 : vector<1x1x1xf32>
    %cst_118 = arith.constant 1.22070313E-4 : f32
    %243 = vector.broadcast %cst_118 : f32 to vector<1x1x1xf32>
    %244 = arith.mulf %240, %243 : vector<1x1x1xf32>
    %245 = arith.mulf %242, %242 : vector<1x1x1xf32>
    %246 = arith.subf %244, %245 : vector<1x1x1xf32>
    %cst_119 = arith.constant 0.000000e+00 : f32
    %247 = vector.broadcast %cst_119 : f32 to vector<1x1x1xf32>
    %248 = arith.maximumf %246, %247 : vector<1x1x1xf32>
    %249 = vector.broadcast %242 : vector<1x1x1xf32> to vector<1x64x128xf32>
    %250 = arith.subf %233, %249 : vector<1x64x128xf32>
    %cst_120 = arith.constant 9.99999974E-6 : f32
    %251 = vector.broadcast %cst_120 : f32 to vector<1x1x1xf32>
    %252 = arith.addf %248, %251 : vector<1x1x1xf32>
    %253 = math.rsqrt %252 : vector<1x1x1xf32>
    %254 = vector.broadcast %253 : vector<1x1x1xf32> to vector<1x64x128xf32>
    %255 = arith.mulf %250, %254 : vector<1x64x128xf32>
    %256 = vector.shape_cast %234 : vector<64x128xf32> to vector<1x64x128xf32>
    %257 = arith.mulf %255, %256 : vector<1x64x128xf32>
    %258 = vector.shape_cast %235 : vector<64x128xf32> to vector<1x64x128xf32>
    %259 = arith.addf %257, %258 : vector<1x64x128xf32>
    %cst_121 = arith.constant 5.000000e-01 : f32
    %260 = vector.broadcast %cst_121 : f32 to vector<1x64x128xf32>
    %261 = arith.mulf %260, %259 : vector<1x64x128xf32>
    %cst_122 = arith.constant 0.707106769 : f32
    %262 = vector.broadcast %cst_122 : f32 to vector<1x64x128xf32>
    %263 = arith.mulf %259, %262 : vector<1x64x128xf32>
    %cst_123 = arith.constant 0.000000e+00 : f32
    %264 = vector.broadcast %cst_123 : f32 to vector<1x64x128xf32>
    %265 = arith.cmpf oge, %263, %264 : vector<1x64x128xf32>
    %cst_124 = arith.constant 1.000000e+00 : f32
    %cst_125 = arith.constant -1.000000e+00 : f32
    %266 = vector.broadcast %cst_124 : f32 to vector<1x64x128xf32>
    %267 = vector.broadcast %cst_125 : f32 to vector<1x64x128xf32>
    %268 = arith.select %265, %266, %267 : vector<1x64x128xi1>, vector<1x64x128xf32>
    %269 = math.absf %263 : vector<1x64x128xf32>
    %cst_126 = arith.constant 0.327591091 : f32
    %270 = vector.broadcast %cst_126 : f32 to vector<1x64x128xf32>
    %271 = arith.mulf %270, %269 : vector<1x64x128xf32>
    %cst_127 = arith.constant 1.000000e+00 : f32
    %272 = vector.broadcast %cst_127 : f32 to vector<1x64x128xf32>
    %273 = arith.addf %272, %271 : vector<1x64x128xf32>
    %274 = tpu.reciprocal %273 {approx = true} : vector<1x64x128xf32> -> vector<1x64x128xf32>
    %cst_128 = arith.constant 1.06140542 : f32
    %275 = vector.broadcast %cst_128 : f32 to vector<1x64x128xf32>
    %276 = arith.mulf %275, %274 : vector<1x64x128xf32>
    %cst_129 = arith.constant -1.45315206 : f32
    %277 = vector.broadcast %cst_129 : f32 to vector<1x64x128xf32>
    %278 = arith.addf %276, %277 : vector<1x64x128xf32>
    %279 = arith.mulf %278, %274 : vector<1x64x128xf32>
    %cst_130 = arith.constant 1.42141378 : f32
    %280 = vector.broadcast %cst_130 : f32 to vector<1x64x128xf32>
    %281 = arith.addf %279, %280 : vector<1x64x128xf32>
    %282 = arith.mulf %281, %274 : vector<1x64x128xf32>
    %cst_131 = arith.constant -0.284496725 : f32
    %283 = vector.broadcast %cst_131 : f32 to vector<1x64x128xf32>
    %284 = arith.addf %282, %283 : vector<1x64x128xf32>
    %285 = arith.mulf %284, %274 : vector<1x64x128xf32>
    %cst_132 = arith.constant 0.254829586 : f32
    %286 = vector.broadcast %cst_132 : f32 to vector<1x64x128xf32>
    %287 = arith.addf %285, %286 : vector<1x64x128xf32>
    %288 = arith.mulf %287, %274 : vector<1x64x128xf32>
    %cst_133 = arith.constant 0.000000e+00 : f32
    %289 = vector.broadcast %cst_133 : f32 to vector<1x64x128xf32>
    %290 = arith.subf %289, %269 : vector<1x64x128xf32>
    %291 = arith.mulf %290, %269 : vector<1x64x128xf32>
    %292 = math.exp %291 : vector<1x64x128xf32>
    %293 = arith.mulf %288, %292 : vector<1x64x128xf32>
    %cst_134 = arith.constant 1.000000e+00 : f32
    %294 = vector.broadcast %cst_134 : f32 to vector<1x64x128xf32>
    %295 = arith.subf %294, %293 : vector<1x64x128xf32>
    %296 = arith.mulf %268, %295 : vector<1x64x128xf32>
    %cst_135 = arith.constant 1.000000e+00 : f32
    %297 = vector.broadcast %cst_135 : f32 to vector<1x64x128xf32>
    %298 = arith.addf %297, %296 : vector<1x64x128xf32>
    %299 = arith.mulf %261, %298 : vector<1x64x128xf32>
    %cst_136 = arith.constant dense<0.000000e+00> : vector<1x128xf32>
    %300 = vector.multi_reduction <add>, %299, %cst_136 [1] : vector<1x64x128xf32> to vector<1x128xf32>
    %cst_137 = arith.constant 0.001953125 : f32
    %301 = vector.broadcast %cst_137 : f32 to vector<1x128xf32>
    %302 = arith.mulf %300, %301 : vector<1x128xf32>
    %303 = vector.shape_cast %302 : vector<1x128xf32> to vector<1x1x128xf32>
    %c0_138 = arith.constant 0 : index
    %c0_139 = arith.constant 0 : index
    %304 = vector.load %arg10[%c0_138, %c0_139] : memref<1x128xf32, #tpu.memory_space<vmem>>, vector<1x128xf32>
    %305 = vector.shape_cast %304 : vector<1x128xf32> to vector<1x1x128xf32>
    %306 = arith.mulf %303, %305 : vector<1x1x128xf32>
    %cst_140 = arith.constant dense<0.000000e+00> : vector<1x1xf32>
    %307 = vector.multi_reduction <add>, %306, %cst_140 [2] : vector<1x1x128xf32> to vector<1x1xf32>
    %cst_141 = arith.constant 5.000000e-01 : f32
    %308 = vector.broadcast %cst_141 : f32 to vector<1x1xf32>
    %309 = arith.mulf %308, %307 : vector<1x1xf32>
    %cst_142 = arith.constant 0.707106769 : f32
    %310 = vector.broadcast %cst_142 : f32 to vector<1x1xf32>
    %311 = arith.mulf %307, %310 : vector<1x1xf32>
    %cst_143 = arith.constant 0.000000e+00 : f32
    %312 = vector.broadcast %cst_143 : f32 to vector<1x1xf32>
    %313 = arith.cmpf oge, %311, %312 : vector<1x1xf32>
    %cst_144 = arith.constant 1.000000e+00 : f32
    %cst_145 = arith.constant -1.000000e+00 : f32
    %314 = vector.broadcast %cst_144 : f32 to vector<1x1xf32>
    %315 = vector.broadcast %cst_145 : f32 to vector<1x1xf32>
    %316 = arith.select %313, %314, %315 : vector<1x1xi1>, vector<1x1xf32>
    %317 = math.absf %311 : vector<1x1xf32>
    %cst_146 = arith.constant 0.327591091 : f32
    %318 = vector.broadcast %cst_146 : f32 to vector<1x1xf32>
    %319 = arith.mulf %318, %317 : vector<1x1xf32>
    %cst_147 = arith.constant 1.000000e+00 : f32
    %320 = vector.broadcast %cst_147 : f32 to vector<1x1xf32>
    %321 = arith.addf %320, %319 : vector<1x1xf32>
    %322 = tpu.reciprocal %321 {approx = true} : vector<1x1xf32> -> vector<1x1xf32>
    %cst_148 = arith.constant 1.06140542 : f32
    %323 = vector.broadcast %cst_148 : f32 to vector<1x1xf32>
    %324 = arith.mulf %323, %322 : vector<1x1xf32>
    %cst_149 = arith.constant -1.45315206 : f32
    %325 = vector.broadcast %cst_149 : f32 to vector<1x1xf32>
    %326 = arith.addf %324, %325 : vector<1x1xf32>
    %327 = arith.mulf %326, %322 : vector<1x1xf32>
    %cst_150 = arith.constant 1.42141378 : f32
    %328 = vector.broadcast %cst_150 : f32 to vector<1x1xf32>
    %329 = arith.addf %327, %328 : vector<1x1xf32>
    %330 = arith.mulf %329, %322 : vector<1x1xf32>
    %cst_151 = arith.constant -0.284496725 : f32
    %331 = vector.broadcast %cst_151 : f32 to vector<1x1xf32>
    %332 = arith.addf %330, %331 : vector<1x1xf32>
    %333 = arith.mulf %332, %322 : vector<1x1xf32>
    %cst_152 = arith.constant 0.254829586 : f32
    %334 = vector.broadcast %cst_152 : f32 to vector<1x1xf32>
    %335 = arith.addf %333, %334 : vector<1x1xf32>
    %336 = arith.mulf %335, %322 : vector<1x1xf32>
    %cst_153 = arith.constant 0.000000e+00 : f32
    %337 = vector.broadcast %cst_153 : f32 to vector<1x1xf32>
    %338 = arith.subf %337, %317 : vector<1x1xf32>
    %339 = arith.mulf %338, %317 : vector<1x1xf32>
    %340 = math.exp %339 : vector<1x1xf32>
    %341 = arith.mulf %336, %340 : vector<1x1xf32>
    %cst_154 = arith.constant 1.000000e+00 : f32
    %342 = vector.broadcast %cst_154 : f32 to vector<1x1xf32>
    %343 = arith.subf %342, %341 : vector<1x1xf32>
    %344 = arith.mulf %316, %343 : vector<1x1xf32>
    %cst_155 = arith.constant 1.000000e+00 : f32
    %345 = vector.broadcast %cst_155 : f32 to vector<1x1xf32>
    %346 = arith.addf %345, %344 : vector<1x1xf32>
    %347 = arith.mulf %309, %346 : vector<1x1xf32>
    %348 = vector.shape_cast %347 : vector<1x1xf32> to vector<1x1x1xf32>
    %c0_156 = arith.constant 0 : index
    %c0_157 = arith.constant 0 : index
    %349 = vector.load %arg11[%c0_156, %c0_157] : memref<1x128xf32, #tpu.memory_space<vmem>>, vector<1x128xf32>
    %350 = vector.shape_cast %349 : vector<1x128xf32> to vector<1x1x128xf32>
    %351 = vector.broadcast %348 : vector<1x1x1xf32> to vector<1x1x128xf32>
    %352 = arith.mulf %351, %350 : vector<1x1x128xf32>
    %cst_158 = arith.constant dense<0.000000e+00> : vector<1x128xf32>
    %353 = vector.multi_reduction <add>, %352, %cst_158 [1] : vector<1x1x128xf32> to vector<1x128xf32>
    %354 = arith.negf %353 : vector<1x128xf32>
    %355 = math.exp %354 : vector<1x128xf32>
    %cst_159 = arith.constant 1.000000e+00 : f32
    %356 = vector.broadcast %cst_159 : f32 to vector<1x128xf32>
    %357 = arith.addf %356, %355 : vector<1x128xf32>
    %358 = arith.divf %356, %357 : vector<1x128xf32>
    %359 = vector.shape_cast %358 : vector<1x128xf32> to vector<1x1x128xf32>
    %360 = vector.broadcast %359 : vector<1x1x128xf32> to vector<1x64x128xf32>
    %361 = arith.mulf %299, %360 : vector<1x64x128xf32>
    %362 = vector.shape_cast %361 : vector<1x64x128xf32> to vector<64x128xf32>
    %c0_160 = arith.constant 0 : index
    %c0_161 = arith.constant 0 : index
    %363 = vector.load %arg12[%c0_160, %c0_161] : memref<128x32xf32, #tpu.memory_space<vmem>>, vector<128x32xf32>
    %cst_162 = arith.constant dense<0.000000e+00> : vector<64x32xf32>
    %364 = tpu.matmul %362, %363, %cst_162 {dimension_numbers = #tpu.dot_dimension_numbers<[1], [0], [0], [1], [0, 0, 1, 1], [], []>} : vector<64x128xf32>, vector<128x32xf32>, vector<64x32xf32> -> vector<64x32xf32>
    %365 = vector.shape_cast %364 : vector<64x32xf32> to vector<1x64x32xf32>
    %c0_163 = arith.constant 0 : index
    %c0_164 = arith.constant 0 : index
    %366 = vector.load %arg13[%c0_163, %c0_164] : memref<64x32xf32, #tpu.memory_space<vmem>>, vector<64x32xf32>
    %c0_165 = arith.constant 0 : index
    %c0_166 = arith.constant 0 : index
    %367 = vector.load %arg14[%c0_165, %c0_166] : memref<64x32xf32, #tpu.memory_space<vmem>>, vector<64x32xf32>
    %cst_167 = arith.constant dense<0.000000e+00> : vector<1xf32>
    %368 = vector.multi_reduction <add>, %365, %cst_167 [1, 2] : vector<1x64x32xf32> to vector<1xf32>
    %369 = vector.shape_cast %368 : vector<1xf32> to vector<1x1x1xf32>
    %370 = arith.mulf %365, %365 : vector<1x64x32xf32>
    %cst_168 = arith.constant dense<0.000000e+00> : vector<1xf32>
    %371 = vector.multi_reduction <add>, %370, %cst_168 [1, 2] : vector<1x64x32xf32> to vector<1xf32>
    %372 = vector.shape_cast %371 : vector<1xf32> to vector<1x1x1xf32>
    %cst_169 = arith.constant 4.8828125E-4 : f32
    %373 = vector.broadcast %cst_169 : f32 to vector<1x1x1xf32>
    %374 = arith.mulf %369, %373 : vector<1x1x1xf32>
    %cst_170 = arith.constant 4.8828125E-4 : f32
    %375 = vector.broadcast %cst_170 : f32 to vector<1x1x1xf32>
    %376 = arith.mulf %372, %375 : vector<1x1x1xf32>
    %377 = arith.mulf %374, %374 : vector<1x1x1xf32>
    %378 = arith.subf %376, %377 : vector<1x1x1xf32>
    %cst_171 = arith.constant 0.000000e+00 : f32
    %379 = vector.broadcast %cst_171 : f32 to vector<1x1x1xf32>
    %380 = arith.maximumf %378, %379 : vector<1x1x1xf32>
    %381 = vector.broadcast %374 : vector<1x1x1xf32> to vector<1x64x32xf32>
    %382 = arith.subf %365, %381 : vector<1x64x32xf32>
    %cst_172 = arith.constant 9.99999974E-6 : f32
    %383 = vector.broadcast %cst_172 : f32 to vector<1x1x1xf32>
    %384 = arith.addf %380, %383 : vector<1x1x1xf32>
    %385 = math.rsqrt %384 : vector<1x1x1xf32>
    %386 = vector.broadcast %385 : vector<1x1x1xf32> to vector<1x64x32xf32>
    %387 = arith.mulf %382, %386 : vector<1x64x32xf32>
    %388 = vector.shape_cast %366 : vector<64x32xf32> to vector<1x64x32xf32>
    %389 = arith.mulf %387, %388 : vector<1x64x32xf32>
    %390 = vector.shape_cast %367 : vector<64x32xf32> to vector<1x64x32xf32>
    %391 = arith.addf %389, %390 : vector<1x64x32xf32>
    %c0_173 = arith.constant 0 : index
    %c0_174 = arith.constant 0 : index
    %c0_175 = arith.constant 0 : index
    %392 = vector.load %arg1[%c0_173, %c0_174, %c0_175] : memref<1x64x32xf32, #tpu.memory_space<vmem>>, vector<1x64x32xf32>
    %393 = arith.addf %392, %391 : vector<1x64x32xf32>
    %c0_176 = arith.constant 0 : index
    %c0_177 = arith.constant 0 : index
    %c0_178 = arith.constant 0 : index
    %394 = vector.load %arg15[%c0_176, %c0_177, %c0_178] : memref<1x64x32xf32, #tpu.memory_space<vmem>>, vector<1x64x32xf32>
    tpu.vector_store %arg15[%c0_176, %c0_177, %c0_178], %393 {strides = array<i32>} : memref<1x64x32xf32, #tpu.memory_space<vmem>>, vector<1x64x32xf32>,
    return
  }
  func.func @transform_0(%arg0: i32) -> (i32, i32, i32) {
    %c0_i32 = arith.constant 0 : i32
    %c0_i32_0 = arith.constant 0 : i32
    %c0_i32_1 = arith.constant 0 : i32
    return %arg0, %c0_i32, %c0_i32_0 : i32, i32, i32
  }
  func.func @transform_1(%arg0: i32) -> (i32, i32) {
    %c0_i32 = arith.constant 0 : i32
    %c0_i32_0 = arith.constant 0 : i32
    %c0_i32_1 = arith.constant 0 : i32
    return %c0_i32, %c0_i32_0 : i32, i32
  }
  func.func @transform_2(%arg0: i32) -> (i32, i32) {
    %c0_i32 = arith.constant 0 : i32
    %c0_i32_0 = arith.constant 0 : i32
    %c0_i32_1 = arith.constant 0 : i32
    return %c0_i32, %c0_i32_0 : i32, i32
  }
  func.func @transform_3(%arg0: i32) -> (i32, i32) {
    %c0_i32 = arith.constant 0 : i32
    %c0_i32_0 = arith.constant 0 : i32
    %c0_i32_1 = arith.constant 0 : i32
    return %c0_i32, %c0_i32_0 : i32, i32
  }
  func.func @transform_4(%arg0: i32) -> (i32, i32) {
    %c0_i32 = arith.constant 0 : i32
    %c0_i32_0 = arith.constant 0 : i32
    %c0_i32_1 = arith.constant 0 : i32
    return %c0_i32, %c0_i32_0 : i32, i32
  }
  func.func @transform_5(%arg0: i32) -> (i32, i32) {
    %c0_i32 = arith.constant 0 : i32
    %c0_i32_0 = arith.constant 0 : i32
    %c0_i32_1 = arith.constant 0 : i32
    return %c0_i32, %c0_i32_0 : i32, i32
  }
  func.func @transform_6(%arg0: i32) -> (i32, i32, i32) {
    %c0_i32 = arith.constant 0 : i32
    %c0_i32_0 = arith.constant 0 : i32
    %c0_i32_1 = arith.constant 0 : i32
    %c0_i32_2 = arith.constant 0 : i32
    return %c0_i32, %c0_i32_0, %c0_i32_1 : i32, i32, i32
  }
  func.func @transform_7(%arg0: i32) -> (i32, i32) {
    %c0_i32 = arith.constant 0 : i32
    %c0_i32_0 = arith.constant 0 : i32
    %c0_i32_1 = arith.constant 0 : i32
    return %c0_i32, %c0_i32_0 : i32, i32
  }
  func.func @transform_8(%arg0: i32) -> (i32, i32) {
    %c0_i32 = arith.constant 0 : i32
    %c0_i32_0 = arith.constant 0 : i32
    %c0_i32_1 = arith.constant 0 : i32
    return %c0_i32, %c0_i32_0 : i32, i32
  }
  func.func @transform_9(%arg0: i32) -> (i32, i32) {
    %c0_i32 = arith.constant 0 : i32
    %c0_i32_0 = arith.constant 0 : i32
    %c0_i32_1 = arith.constant 0 : i32
    return %c0_i32, %c0_i32_0 : i32, i32
  }
  func.func @transform_10(%arg0: i32) -> (i32, i32) {
    %c0_i32 = arith.constant 0 : i32
    %c0_i32_0 = arith.constant 0 : i32
    %c0_i32_1 = arith.constant 0 : i32
    return %c0_i32, %c0_i32_0 : i32, i32
  }
  func.func @transform_11(%arg0: i32) -> (i32, i32) {
    %c0_i32 = arith.constant 0 : i32
    %c0_i32_0 = arith.constant 0 : i32
    %c0_i32_1 = arith.constant 0 : i32
    return %c0_i32, %c0_i32_0 : i32, i32
  }
  func.func @transform_12(%arg0: i32) -> (i32, i32) {
    %c0_i32 = arith.constant 0 : i32
    %c0_i32_0 = arith.constant 0 : i32
    %c0_i32_1 = arith.constant 0 : i32
    return %c0_i32, %c0_i32_0 : i32, i32
  }
  func.func @transform_13(%arg0: i32) -> (i32, i32) {
    %c0_i32 = arith.constant 0 : i32
    %c0_i32_0 = arith.constant 0 : i32
    %c0_i32_1 = arith.constant 0 : i32
    return %c0_i32, %c0_i32_0 : i32, i32
  }
  func.func @transform_14(%arg0: i32) -> (i32, i32, i32) {
    %c0_i32 = arith.constant 0 : i32
    %c0_i32_0 = arith.constant 0 : i32
    %c0_i32_1 = arith.constant 0 : i32
    return %arg0, %c0_i32, %c0_i32_0 : i32, i32, i32
  }
}

</mosaic_0001>

<bundles_post_ra>
// kernel: mbconv_forward.1
= control target key start
LH: loop header
LB: loop body
LE: loop exit
PB: predicated region body
PF: predicated region fallthrough
CT: control target
= control target key end

     0   :  { %s3066_s29 = smov 0   ;;  %s5390_s0 = inlined_call_operand.vmem [shape: f32[2,64,32], index: 0, kind: input, shape index: {}, may-alias: {0,14}]   ;;  %s5391_s1 = inlined_call_operand.vmem [shape: f32[64,32], index: 1, kind: input, shape index: {}]   ;;  %s5392_s2 = inlined_call_operand.vmem [shape: f32[64,32], index: 2, kind: input, shape index: {}]   ;;  %s5393_s3 = inlined_call_operand.vmem [shape: f32[32,128], index: 3, kind: input, shape index: {}]   ;;  %s5394_s4 = inlined_call_operand.vmem [shape: f32[64,128], index: 4, kind: input, shape index: {}]   ;;  %s5395_s5 = inlined_call_operand.vmem [shape: f32[64,128], index: 5, kind: input, shape index: {}]   ;;  %s5396_s6 = inlined_call_operand.vmem [shape: f32[27,64,128], index: 6, kind: input, shape index: {}]   ;;  %s5397_s7 = inlined_call_operand.vmem [shape: f32[64,128], index: 7, kind: input, shape index: {}]   ;;  %s5398_s8 = inlined_call_operand.vmem [shape: f32[64,128], index: 8, kind: input, shape index: {}]   ;;  %s5399_s9 = inlined_call_operand.vmem [shape: f32[1,128], index: 9, kind: input, shape index: {}]   ;;  %s5400_s10 = inlined_call_operand.vmem [shape: f32[1,128], index: 10, kind: input, shape index: {}]   ;;  %s5401_s11 = inlined_call_operand.vmem [shape: f32[128,32], index: 11, kind: input, shape index: {}]   ;;  %s5402_s12 = inlined_call_operand.vmem [shape: f32[64,32], index: 12, kind: input, shape index: {}]   ;;  %s5403_s13 = inlined_call_operand.vmem [shape: f32[64,32], index: 13, kind: input, shape index: {}]   ;;  %s5404_s14 = inlined_call_operand.vmem [shape: f32[2,64,32], index: 14, kind: output, shape index: {}, may-alias: {0,14}]  }
   0x1 LB: > { %s2495_s30 = sadd.s32 4294967295, %s2986_s29   ;;  %p2499_p0 = scmp.ge.s32.totalorder %s2986_s29, 1  ;;  %s2986_s29 = sphi %s3066_s29, %s24_s29  }
   0x2   : > { %p412_p1 = scmp.lt.s32.totalorder %s2986_s29, 3 }
   0x4   : > { %p413_p2 = pnand %p2499_p0, %p412_p1 }
   0x6   : > { %416 = sbr.rel (%p413_p2) target bundleno = 1822 (0x71e), region = 76 }
   0xd   : > { %p458_p3 = scmp.lt.s32.totalorder %s2495_s30, 1  ;;  %vm492_vm0 = vcmask 261120   ;;  %v586_v46 = vld [vmem:[%s5393_s3] sm:$0xff]  ;;  %v587_v47 = vld [vmem:[%s5393_s3 + $0x8] sm:$0xff]  ;;  %v588_v48 = vld [vmem:[%s5393_s3 + $0x10] sm:$0xff]  ;;  %s2989_s19 = smov 16  }
   0xe   : > { %v2825_v49 = vpack.c.bf16 %v587_v47, %v586_v46  ;;  %v589_v50 = vld [vmem:[%s5393_s3 + $0x18] sm:$0xff]  ;;  %s2990_s20 = smov 112  }
   0xf   : > { %s5574_s30 = smov (!%p458_p3, %s2495_s30), 1  ;;  %v2829_v51 = vpack.c.bf16 %v589_v50, %v588_v48 }
  0x10   : > { %s2723_s15 = sshll.u32 %s5574_s30, 6  ;;  %2826 = vmatprep.subr.bf16.mxu0 %v2825_v49 }
  0x11   : > { %s3082_s18 = scalar_lea.vmem %s5390_s0, %s2723_s15  ;;  %2828 = vmatpush3.bf16.msra.mxu0 %v2825_v49  ;;  %v489_v49 = vld [vmem:[%s5392_s2 + $0x28] sm:$0xff]  ;;  %s467_s27 = scalar_lea.vmem %s5404_s14, %s2723_s15 }
  0x12   : > { %v3085_v0 = vld [vmem:[%s3082_s18] sm:$0xff]  ;;  %v3088_v1 = vld [vmem:[%s3082_s18 + $0x8] sm:$0xff]  ;;  %v3091_v2 = vld [vmem:[%s3082_s18 + $0x10] sm:$0xff]  ;;  %2830 = vmatprep.subr.bf16.mxu0 %v2829_v51 }
  0x13   : > { %v3094_v3 = vld [vmem:[%s3082_s18 + $0x18] sm:$0xff]  ;;  %v493_v4 = vsel %vm492_vm0, %v3085_v0, 0.0  ;;  %v494_v5 = vsel %vm492_vm0, %v3088_v1, 0.0  ;;  %v496_v6 = vsel %vm492_vm0, %v3091_v2, 0.0  ;;  %v516_v7 = vmul.f32 %v3085_v0, %v3085_v0  ;;  %v3105_v8 = vld [vmem:[%s3082_s18 + $0x20] sm:$0xff]  ;;  %v3114_v13 = vld [vmem:[%s3082_s18 + $0x28] sm:$0xff] }
  0x14   : > { %v495_v9 = vadd.f32 %v494_v5, %v493_v4  ;;  %v498_v10 = vsel %vm492_vm0, %v3094_v3, 0.0  ;;  %v517_v11 = vmul.f32 %v3088_v1, %v3088_v1  ;;  %v518_v12 = vmul.f32 %v3091_v2, %v3091_v2  ;;  %v3125_v20 = vld [vmem:[%s3082_s18 + $0x30] sm:$0xff]  ;;  %v3134_v27 = vld [vmem:[%s3082_s18 + $0x38] sm:$0xff] }
  0x15   : > { %v519_v15 = vmul.f32 %v3094_v3, %v3094_v3  ;;  %v500_v16 = vsel %vm492_vm0, %v3105_v8, 0.0  ;;  %v520_v17 = vmul.f32 %v3105_v8, %v3105_v8  ;;  %v524_v18 = vsel %vm492_vm0, %v516_v7, 0.0  ;;  %2832 = vmatpush3.bf16.msra.mxu0 %v2829_v51  ;;  %v483_v51 = vld [vmem:[%s5391_s1 + $0x38] sm:$0xff] }
  0x16   : > { %v497_v14 = vadd.f32 %v496_v6, %v495_v9  ;;  %v525_v19 = vsel %vm492_vm0, %v517_v11, 0.0  ;;  %v527_v23 = vsel %vm492_vm0, %v518_v12, 0.0  ;;  %v502_v24 = vsel %vm492_vm0, %v3114_v13, 0.0 }
  0x17   : > { %v526_v22 = vadd.f32 %v525_v19, %v524_v18  ;;  %v521_v25 = vmul.f32 %v3114_v13, %v3114_v13  ;;  %v529_v26 = vsel %vm492_vm0, %v519_v15, 0.0  ;;  %v504_v30 = vsel %vm492_vm0, %v3125_v20, 0.0  ;;  %v476_v18 = vld [vmem:[%s5391_s1] sm:$0xff]  ;;  %v477_v19 = vld [vmem:[%s5391_s1 + $0x8] sm:$0xff] }
  0x18   : > { %v499_v21 = vadd.f32 %v498_v10, %v497_v14  ;;  %v522_v31 = vmul.f32 %v3125_v20, %v3125_v20  ;;  %v531_v32 = vsel %vm492_vm0, %v520_v17, 0.0  ;;  %v506_v35 = vsel %vm492_vm0, %v3134_v27, 0.0 }
  0x19   : > { %v528_v29 = vadd.f32 %v527_v23, %v526_v22  ;;  %v523_v36 = vmul.f32 %v3134_v27, %v3134_v27  ;;  %v533_v37 = vsel %vm492_vm0, %v521_v25, 0.0  ;;  %v485_v25 = vld [vmem:[%s5392_s2 + $0x8] sm:$0xff] }
  0x1a   : > { %v501_v28 = vadd.f32 %v500_v16, %v499_v21  ;;  %v535_v40 = vsel %vm492_vm0, %v522_v31, 0.0  ;;  %v478_v21 = vld [vmem:[%s5391_s1 + $0x10] sm:$0xff] }
  0x1b   : > { %v530_v34 = vadd.f32 %v529_v26, %v528_v29  ;;  %v537_v43 = vsel %vm492_vm0, %v523_v36, 0.0 }
  0x1c   : > { %v503_v33 = vadd.f32 %v502_v24, %v501_v28  ;;  %v484_v24 = vld [vmem:[%s5392_s2] sm:$0xff] }
  0x1d   : > { %v532_v39 = vadd.f32 %v531_v32, %v530_v34  ;;  %v480_v32 = vld [vmem:[%s5391_s1 + $0x20] sm:$0xff] }
  0x1e   : > { %v505_v38 = vadd.f32 %v504_v30, %v503_v33 }
  0x1f   : > { %v534_v42 = vadd.f32 %v533_v37, %v532_v39 }
  0x20   : > { %v507_v41 = vadd.f32 %v506_v35, %v505_v38 }
  0x21   : > { %v536_v44 = vadd.f32 %v535_v40, %v534_v42  ;;  %v487_v40 = vld [vmem:[%s5392_s2 + $0x18] sm:$0xff]  ;;  %v481_v42 = vld [vmem:[%s5391_s1 + $0x28] sm:$0xff] }
  0x22   : > { %508 = vadd.xlane.f32.xlu0 %v507_v41 }
  0x23   : > { %v538_v45 = vadd.f32 %v537_v43, %v536_v44 }
  0x26   : > { %539 = vadd.xlane.f32.xlu0 %v538_v45 }
  0xaf   : > { %v509_v52 = vpop.xlane.xlu0 %508 }
  0xb0   : > { %v510_v53 = vrot.slane %v509_v52, 4 }
  0xb2   : > { %v511_v54 = vadd.f32 %v510_v53, %v509_v52 }
  0xb3   : > { %v540_v55 = vpop.xlane.xlu0 %539 }
  0xb4   : > { %v512_v56 = vrot.slane %v511_v54, 2  ;;  %v541_v57 = vrot.slane %v540_v55, 4 }
  0xb6   : > { %v513_v58 = vadd.f32 %v512_v56, %v511_v54  ;;  %v542_v59 = vadd.f32 %v541_v57, %v540_v55  ;;  %v491_v55 = vld [vmem:[%s5392_s2 + $0x38] sm:$0xff] }
  0xb8   : > { %v514_v60 = vrot.slane %v513_v58, 1  ;;  %v543_v61 = vrot.slane %v542_v59, 2 }
  0xba   : > { %v515_v62 = vadd.f32 %v514_v60, %v513_v58  ;;  %v544_v63 = vadd.f32 %v543_v61, %v542_v59 }
  0xbc   : > { %v547_v4 = vmul.f32 0.00048828125, %v515_v62  ;;  %v545_v5 = vrot.slane %v544_v63, 1 }
  0xbe   : > { %v546_v6 = vadd.f32 %v545_v5, %v544_v63  ;;  %v549_v7 = vmul.f32 %v547_v4, %v547_v4  ;;  %v552_v14 = vsub.f32 %v3085_v0, %v547_v4  ;;  %v553_v15 = vsub.f32 %v3088_v1, %v547_v4 }
  0xbf   : > { %v554_v16 = vsub.f32 %v3091_v2, %v547_v4  ;;  %v555_v22 = vsub.f32 %v3094_v3, %v547_v4  ;;  %v556_v2 = vsub.f32 %v3105_v8, %v547_v4  ;;  %v479_v3 = vld [vmem:[%s5391_s1 + $0x18] sm:$0xff]  ;;  %v486_v8 = vld [vmem:[%s5392_s2 + $0x10] sm:$0xff]  ;;  %v557_v33 = vsub.f32 %v3114_v13, %v547_v4  ;;  %v488_v13 = vld [vmem:[%s5392_s2 + $0x20] sm:$0xff] }
  0xc0   : > { %v548_v9 = vmul.f32 0.00048828125, %v546_v6  ;;  %v558_v36 = vsub.f32 %v3125_v20, %v547_v4  ;;  %v482_v20 = vld [vmem:[%s5391_s1 + $0x30] sm:$0xff]  ;;  %v559_v44 = vsub.f32 %v3134_v27, %v547_v4 }
  0xc1   : > { %v490_v27 = vld [vmem:[%s5392_s2 + $0x30] sm:$0xff] }
  0xc2   : > { %v550_v10 = vsub.f32 %v548_v9, %v549_v7 }
  0xc4   : > { %v551_v11 = vmax.f32 %v550_v10, 0.0 }
  0xc6   : > { %v560_v12 = vadd.f32 1e-05, %v551_v11 }
  0xc8   : > { %2892 = vrsqrt.f32 %v560_v12 }
  0xd2   : > { %v2893_v17 = vpop.eup %2892 }
  0xd3   : > { %v562_v0 = vmul.f32 %v2893_v17, %v552_v14  ;;  %v563_v23 = vmul.f32 %v2893_v17, %v553_v15  ;;  %v564_v1 = vmul.f32 %v2893_v17, %v554_v16  ;;  %v565_v26 = vmul.f32 %v2893_v17, %v555_v22 }
  0xd4   : > { %v566_v31 = vmul.f32 %v2893_v17, %v556_v2  ;;  %v567_v38 = vmul.f32 %v2893_v17, %v557_v33  ;;  %v568_v43 = vmul.f32 %v2893_v17, %v558_v36  ;;  %v569_v47 = vmul.f32 %v2893_v17, %v559_v44  ;;  %v725_v44 = vld [vmem:[%s5394_s4 + $0x30] sm:$0xff] }
  0xd5   : > { %v570_v28 = vmul.f32 %v562_v0, %v476_v18  ;;  %v571_v29 = vmul.f32 %v563_v23, %v477_v19  ;;  %v572_v30 = vmul.f32 %v564_v1, %v478_v21  ;;  %v573_v37 = vmul.f32 %v565_v26, %v479_v3 }
  0xd6   : > { %v574_v41 = vmul.f32 %v566_v31, %v480_v32  ;;  %v575_v46 = vmul.f32 %v567_v38, %v481_v42  ;;  %v576_v50 = vmul.f32 %v568_v43, %v482_v20  ;;  %v577_v53 = vmul.f32 %v569_v47, %v483_v51  ;;  %v726_v51 = vld [vmem:[%s5394_s4 + $0x38] sm:$0xff] }
  0xd7   : > { %v578_v34 = vadd.f32 %v570_v28, %v484_v24  ;;  %v579_v35 = vadd.f32 %v571_v29, %v485_v25  ;;  %v580_v39 = vadd.f32 %v572_v30, %v486_v8  ;;  %v581_v45 = vadd.f32 %v573_v37, %v487_v40 }
  0xd8   : > { %v582_v48 = vadd.f32 %v574_v41, %v488_v13  ;;  %v583_v52 = vadd.f32 %v575_v46, %v489_v49  ;;  %v584_v54 = vadd.f32 %v576_v50, %v490_v27  ;;  %v585_v56 = vadd.f32 %v577_v53, %v491_v55  ;;  %v719_v50 = vld [vmem:[%s5394_s4] sm:$0xff]  ;;  %v721_v27 = vld [vmem:[%s5394_s4 + $0x10] sm:$0xff] }
  0xd9   : > { %2769 = vmatprep.mubr.msk.f32.mxu0 %vm492_vm0, %v578_v34 }
  0xda   : > { %2770 = vmatmul.mubr.msk.f32.vlgmr.msra.gmra.mrb[0].mxu0 %vm492_vm0, %v579_v35 }
  0xdb   : > { %2772 = vmatprep.mubr.msk.f32.mxu0 %vm492_vm0, %v580_v39 }
  0xde   : > { %2773 = vmatmul.mubr.msk.f32.gmra.mrb[2].mxu0 %vm492_vm0, %v581_v45 }
  0xdf   : > { %2775 = vmatprep.mubr.msk.f32.mxu0 %vm492_vm0, %v582_v48 }
  0xe2   : > { %2776 = vmatmul.mubr.msk.f32.gmra.mrb[4].mxu0 %vm492_vm0, %v583_v52 }
  0xe3   : > { %2778 = vmatprep.mubr.msk.f32.mxu0 %vm492_vm0, %v584_v54 }
  0xe6   : > { %2779 = vmatmul.mubr.msk.f32.gmra.mrb[6].mxu0 %vm492_vm0, %v585_v56  ;;  %v733_v56 = vld [vmem:[%s5395_s5 + $0x30] sm:$0xff] }
 0x1ad   : > { %v3224_v57 = vpop.f32.mrb[0].mxu0 }
 0x1ae   : > { %v751_v58 = vmul.f32 %v3224_v57, %v3224_v57  ;;  %v680_v59 = vpop.f32.mrb[1].mxu0 }
 0x1af   : > { %v735_v60 = vadd.f32 %v3224_v57, %v680_v59  ;;  %v750_v61 = vmul.f32 %v680_v59, %v680_v59 }
 0x1b1   : > { %v758_v62 = vadd.f32 %v751_v58, %v750_v61  ;;  %v3229_v63 = vpop.f32.mrb[2].mxu0  ;;  %v727_v58 = vld [vmem:[%s5395_s5] sm:$0xff] }
 0x1b2   : > { %v690_v4 = vpop.f32.mrb[3].mxu0  ;;  %v753_v7 = vmul.f32 %v3229_v63, %v3229_v63 }
 0x1b3   : > { %v736_v5 = vadd.f32 %v735_v60, %v690_v4  ;;  %v752_v6 = vmul.f32 %v690_v4, %v690_v4 }
 0x1b5   : > { %v759_v9 = vadd.f32 %v758_v62, %v752_v6  ;;  %v3233_v10 = vpop.f32.mrb[4].mxu0  ;;  %v737_v11 = vadd.f32 %v3229_v63, %v736_v5  ;;  %v729_v6 = vld [vmem:[%s5395_s5 + $0x10] sm:$0xff] }
 0x1b6   : > { %v3236_v12 = vpop.f32.mrb[5].mxu0  ;;  %v755_v17 = vmul.f32 %v3233_v10, %v3233_v10 }
 0x1b7   : > { %v738_v14 = vadd.f32 %v737_v11, %v3236_v12  ;;  %v754_v15 = vmul.f32 %v3236_v12, %v3236_v12  ;;  %v760_v16 = vadd.f32 %v759_v9, %v753_v7 }
 0x1b9   : > { %v761_v18 = vadd.f32 %v760_v16, %v754_v15  ;;  %v2780_v19 = vpop.f32.mrb[6].mxu0  ;;  %v739_v21 = vadd.f32 %v3233_v10, %v738_v14 }
 0x1ba   : > { %v710_v22 = vpop.f32.mrb[7].mxu0  ;;  %v757_v24 = vmul.f32 %v2780_v19, %v2780_v19 }
 0x1bb   : > { %v756_v0 = vmul.f32 %v710_v22, %v710_v22  ;;  %v740_v23 = vadd.f32 %v739_v21, %v710_v22  ;;  %v762_v1 = vadd.f32 %v761_v18, %v755_v17 }
 0x1bd   : > { %v741_v2 = vadd.f32 %v2780_v19, %v740_v23  ;;  %v763_v25 = vadd.f32 %v762_v1, %v756_v0 }
 0x1bf   : > { %742 = vadd.xlane.f32.xlu1 %v741_v2  ;;  %v764_v26 = vadd.f32 %v763_v25, %v757_v24 }
 0x1c3   : > { %765 = vadd.xlane.f32.xlu1 %v764_v26 }
 0x24c   : > { %v743_v28 = vpop.xlane.xlu1 %742 }
 0x24d   : > { %v744_v29 = vrot.slane %v743_v28, 4 }
 0x24f   : > { %v745_v30 = vadd.f32 %v744_v29, %v743_v28  ;;  %v722_v28 = vld [vmem:[%s5394_s4 + $0x18] sm:$0xff] }
 0x250   : > { %v766_v3 = vpop.xlane.xlu1 %765 }
 0x251   : > { %v746_v31 = vrot.slane %v745_v30, 2  ;;  %v767_v8 = vrot.slane %v766_v3, 4 }
 0x253   : > { %v747_v32 = vadd.f32 %v746_v31, %v745_v30  ;;  %v768_v33 = vadd.f32 %v767_v8, %v766_v3  ;;  %v728_v30 = vld [vmem:[%s5395_s5 + $0x8] sm:$0xff]  ;;  %v731_v3 = vld [vmem:[%s5395_s5 + $0x20] sm:$0xff] }
 0x255   : > { %v748_v34 = vrot.slane %v747_v32, 1  ;;  %v769_v35 = vrot.slane %v768_v33, 2 }
 0x257   : > { %v749_v36 = vadd.f32 %v748_v34, %v747_v32  ;;  %v770_v37 = vadd.f32 %v769_v35, %v768_v33  ;;  %v1044_v35 = vlaneseq }
 0x259   : > { %v773_v38 = vmul.f32 0.00012207031, %v749_v36  ;;  %v771_v39 = vrot.slane %v770_v37, 1 }
 0x25b   : > { %v772_v40 = vadd.f32 %v771_v39, %v770_v37  ;;  %v775_v41 = vmul.f32 %v773_v38, %v773_v38  ;;  %v784_v45 = vsub.f32 %v710_v22, %v773_v38  ;;  %v778_v46 = vsub.f32 %v680_v59, %v773_v38  ;;  %v734_v59 = vld [vmem:[%s5395_s5 + $0x38] sm:$0xff] }
 0x25c   : > { %v785_v47 = vsub.f32 %v2780_v19, %v773_v38  ;;  %v780_v48 = vsub.f32 %v690_v4, %v773_v38  ;;  %v779_v60 = vsub.f32 %v3224_v57, %v773_v38  ;;  %v782_v61 = vsub.f32 %v3236_v12, %v773_v38  ;;  %v720_v57 = vld [vmem:[%s5394_s4 + $0x8] sm:$0xff]  ;;  %v723_v12 = vld [vmem:[%s5394_s4 + $0x20] sm:$0xff] }
 0x25d   : > { %v774_v42 = vmul.f32 0.00012207031, %v772_v40  ;;  %v781_v18 = vsub.f32 %v3229_v63, %v773_v38  ;;  %v783_v19 = vsub.f32 %v3233_v10, %v773_v38  ;;  %v724_v63 = vld [vmem:[%s5394_s4 + $0x28] sm:$0xff]  ;;  %v730_v40 = vld [vmem:[%s5395_s5 + $0x18] sm:$0xff] }
 0x25f   : > { %v776_v43 = vsub.f32 %v774_v42, %v775_v41  ;;  %v732_v42 = vld [vmem:[%s5395_s5 + $0x28] sm:$0xff] }
 0x261   : > { %v777_v13 = vmax.f32 %v776_v43, 0.0 }
 0x263   : > { %v786_v20 = vadd.f32 1e-05, %v777_v13 }
 0x265   : > { %2894 = vrsqrt.f32 %v786_v20 }
 0x26f   : > { %v2895_v49 = vpop.eup %2894 }
 0x270   : > { %v794_v52 = vmul.f32 %v2895_v49, %v784_v45  ;;  %v788_v53 = vmul.f32 %v2895_v49, %v778_v46  ;;  %v795_v54 = vmul.f32 %v2895_v49, %v785_v47  ;;  %v790_v55 = vmul.f32 %v2895_v49, %v780_v48 }
 0x271   : > { %v789_v9 = vmul.f32 %v2895_v49, %v779_v60  ;;  %v792_v16 = vmul.f32 %v2895_v49, %v782_v61  ;;  %v791_v23 = vmul.f32 %v2895_v49, %v781_v18  ;;  %v793_v1 = vmul.f32 %v2895_v49, %v783_v19 }
 0x272   : > { %v802_v62 = vmul.f32 %v794_v52, %v725_v44  ;;  %v796_v4 = vmul.f32 %v788_v53, %v719_v50  ;;  %v803_v5 = vmul.f32 %v795_v54, %v726_v51  ;;  %v798_v7 = vmul.f32 %v790_v55, %v721_v27 }
 0x273   : > { %v797_v25 = vmul.f32 %v789_v9, %v720_v57  ;;  %v800_v26 = vmul.f32 %v792_v16, %v723_v12  ;;  %v799_v33 = vmul.f32 %v791_v23, %v722_v28  ;;  %v801_v34 = vmul.f32 %v793_v1, %v724_v63 }
 0x274   : > { %v810_v11 = vadd.f32 %v802_v62, %v733_v56  ;;  %v804_v14 = vadd.f32 %v796_v4, %v727_v58  ;;  %v811_v15 = vadd.f32 %v803_v5, %v734_v59  ;;  %v806_v17 = vadd.f32 %v798_v7, %v729_v6 }
 0x275   : > { %v3298_v38 = vadd.f32 %v797_v25, %v728_v30  ;;  %v3300_v39 = vadd.f32 %v800_v26, %v731_v3  ;;  %v3309_v44 = vadd.f32 %v799_v33, %v730_v40  ;;  %v3311_v45 = vshrl.u32 %v1044_v35, 7 }
 0x276   : > { %v826_v21 = vmul.f32 0.70710677, %v810_v11  ;;  %v3278_v22 = vmul.f32 0.70710677, %v804_v14  ;;  %v3280_v0 = vmul.f32 0.70710677, %v811_v15  ;;  %v3319_v48 = vadd.f32 %v801_v34, %v732_v42 }
 0x277   : > { %v3290_v29 = vmul.f32 0.70710677, %v806_v17  ;;  %v3314_v46 = vmul.f32 0.70710677, %v3298_v38  ;;  %v3317_v47 = vmul.f32 0.70710677, %v3300_v39 }
 0x278   : > { %v850_v2 = vand.u32 2147483647, %v826_v21  ;;  %v844_v24 = vand.u32 2147483647, %v3278_v22  ;;  %v851_v10 = vand.u32 2147483647, %v3280_v0 }
 0x279   : > { %v846_v41 = vand.u32 2147483647, %v3290_v29  ;;  %vm834_vm1 = vcmp.ge.f32.partialorder %v826_v21, 0.0  ;;  %v3321_v49 = vmul.f32 0.5, %v810_v11  ;;  %v3323_v50 = vmul.f32 0.5, %v804_v14 }
 0x27a   : > { %v858_v31 = vmul.f32 0.3275911, %v850_v2  ;;  %v852_v8 = vmul.f32 0.3275911, %v844_v24  ;;  %v859_v32 = vmul.f32 0.3275911, %v851_v10 }
 0x27b   : > { %v954_v43 = vsub.f32 0.0, %v850_v2  ;;  %v854_v20 = vmul.f32 0.3275911, %v846_v41  ;;  %v3325_v51 = vmul.f32 0.5, %v811_v15  ;;  %v948_v53 = vsub.f32 0.0, %v844_v24 }
 0x27c   : > { %v866_v36 = vadd.f32 1.0, %v858_v31  ;;  %v860_v37 = vadd.f32 1.0, %v852_v8  ;;  %v867_v13 = vadd.f32 1.0, %v859_v32  ;;  %v845_v54 = vand.u32 2147483647, %v3314_v46 }
 0x27d   : > { %v862_v27 = vadd.f32 1.0, %v854_v20  ;;  %v962_v52 = vmul.f32 %v954_v43, %v850_v2  ;;  %v5405_v55 = vmov -1.0   ;;  %vm828_vm2 = vcmp.ge.f32.partialorder %v3278_v22, 0.0 }
 0x27e   : > { %2896 = vrcp.f32 %v866_v36  ;;  %v3329_v56 = vsel %vm834_vm1, 1.0, %v5405_v55  ;;  %v955_v58 = vsub.f32 0.0, %v851_v10  ;;  %v3332_v59 = vmul.f32 0.5, %v806_v17 }
 0x27f   : > { %2898 = vrcp.f32 %v860_v37  ;;  %vm835_vm3 = vcmp.ge.f32.partialorder %v3280_v0, 0.0  ;;  %v853_v60 = vmul.f32 0.3275911, %v845_v54  ;;  %v848_v61 = vand.u32 2147483647, %v3317_v47 }
 0x280   : > { %2900 = vrcp.f32 %v867_v13  ;;  %vm830_vm4 = vcmp.ge.f32.partialorder %v3290_v29, 0.0  ;;  %v950_v62 = vsub.f32 0.0, %v846_v41  ;;  %v3338_v4 = vmul.f32 0.70710677, %v3309_v44 }
 0x281   : > { %2902 = vrcp.f32 %v862_v27  ;;  %v3341_v5 = vmul.f32 0.70710677, %v3319_v48  ;;  %v976_v6 = vmul.f32 1.442695, %v962_v52  ;;  %v956_v7 = vmul.f32 %v948_v53, %v844_v24 }
 0x282   : > { %v861_v9 = vadd.f32 1.0, %v853_v60  ;;  %v856_v11 = vmul.f32 0.3275911, %v848_v61  ;;  %v3344_v14 = vsel %vm828_vm2, 1.0, %v5405_v55  ;;  %v3347_v15 = vsel %vm835_vm3, 1.0, %v5405_v55 }
 0x283   : > { %v963_v16 = vmul.f32 %v955_v58, %v851_v10  ;;  %v847_v17 = vand.u32 2147483647, %v3338_v4  ;;  %v949_v12 = vsub.f32 0.0, %v845_v54  ;;  %v849_v19 = vand.u32 2147483647, %v3341_v5 }
 0x284   : > { %2904 = vrcp.f32 %v861_v9  ;;  %v864_v18 = vadd.f32 1.0, %v856_v11  ;;  %v3359_v0 = vsel %vm830_vm4, 1.0, %v5405_v55  ;;  %v958_v23 = vmul.f32 %v950_v62, %v846_v41 }
 0x285   : > { %v855_v1 = vmul.f32 0.3275911, %v847_v17  ;;  %2906 = vpow2.f32 %v976_v6  ;;  %v964_v24 = vmul.f32 1.442695, %v956_v7  ;;  %v952_v25 = vsub.f32 0.0, %v848_v61 }
 0x286   : > { %v978_v28 = vmul.f32 1.442695, %v963_v16  ;;  %2908 = vrcp.f32 %v864_v18  ;;  %v957_v3 = vmul.f32 %v949_v12, %v845_v54  ;;  %v951_v31 = vsub.f32 0.0, %v847_v17 }
 0x287   : > { %v863_v63 = vadd.f32 1.0, %v855_v1  ;;  %v857_v8 = vmul.f32 0.3275911, %v849_v19  ;;  %v968_v33 = vmul.f32 1.442695, %v958_v23  ;;  %v960_v36 = vmul.f32 %v952_v25, %v848_v61 }
 0x288   : > { %v3350_v57 = vpop.eup %2896  ;;  %v953_v40 = vsub.f32 0.0, %v849_v19  ;;  %v966_v20 = vmul.f32 1.442695, %v957_v3  ;;  %v959_v27 = vmul.f32 %v951_v31, %v847_v17  ;;  %v3378_v12 = vmul.f32 0.5, %v3298_v38 }
 0x289   : > { %v3353_v21 = vpop.eup %2898  ;;  %v882_v22 = vmul.f32 1.0614054, %v3350_v57  ;;  %2910 = vrcp.f32 %v863_v63  ;;  %v865_v37 = vadd.f32 1.0, %v857_v8  ;;  %v972_v61 = vmul.f32 1.442695, %v960_v36 }
 0x28a   : > { %v876_v2 = vmul.f32 1.0614054, %v3353_v21  ;;  %v3362_v10 = vpop.eup %2900  ;;  %2912 = vpow2.f32 %v964_v24  ;;  %v961_v62 = vmul.f32 %v953_v40, %v849_v19  ;;  %v970_v18 = vmul.f32 1.442695, %v959_v27 }
 0x28b   : > { %v890_v26 = vadd.f32 -1.4531521, %v882_v22  ;;  %v883_v32 = vmul.f32 1.0614054, %v3362_v10  ;;  %v3366_v34 = vpop.eup %2902  ;;  %2914 = vrcp.f32 %v865_v37  ;;  %vm829_vm5 = vcmp.ge.f32.partialorder %v3314_v46, 0.0 }
 0x28c   : > { %v884_v30 = vadd.f32 -1.4531521, %v876_v2  ;;  %v878_v43 = vmul.f32 1.0614054, %v3366_v34  ;;  %2916 = vpow2.f32 %v978_v28  ;;  %vm832_vm6 = vcmp.ge.f32.partialorder %v3317_v47, 0.0 }
 0x28d   : > { %v898_v29 = vmul.f32 %v3350_v57, %v890_v26  ;;  %v891_v42 = vadd.f32 -1.4531521, %v883_v32  ;;  %2918 = vpow2.f32 %v968_v33  ;;  %v974_v26 = vmul.f32 1.442695, %v961_v62 }
 0x28e   : > { %v892_v35 = vmul.f32 %v3353_v21, %v884_v30  ;;  %v886_v54 = vadd.f32 -1.4531521, %v878_v43  ;;  %v3372_v58 = vpop.eup %2904  ;;  %2920 = vpow2.f32 %v966_v20  ;;  %vm1046_vm7 = vcmp.lt.s32.totalorder %v3311_v45, 1 }
 0x28f   : > { %v906_v41 = vadd.f32 1.4214138, %v898_v29  ;;  %v899_v53 = vmul.f32 %v3362_v10, %v891_v42  ;;  %v877_v11 = vmul.f32 1.0614054, %v3372_v58  ;;  %v2907_v16 = vpop.eup %2906  ;;  %2922 = vpow2.f32 %v972_v61 }
 0x290   : > { %v900_v13 = vadd.f32 1.4214138, %v892_v35  ;;  %v894_v9 = vmul.f32 %v3366_v34, %v886_v54  ;;  %v3380_v22 = vpop.eup %2908  ;;  %2924 = vpow2.f32 %v970_v18  ;;  %vm1112_vm8 = vcmp.lt.s32.totalorder %v3311_v45, 7 }
 0x291   : > { %v914_v52 = vmul.f32 %v3350_v57, %v906_v41  ;;  %v907_v7 = vadd.f32 1.4214138, %v899_v53  ;;  %v885_v2 = vadd.f32 -1.4531521, %v877_v11  ;;  %v880_v25 = vmul.f32 1.0614054, %v3380_v22 }
 0x292   : > { %v908_v60 = vmul.f32 %v3353_v21, %v900_v13  ;;  %v902_v19 = vadd.f32 1.4214138, %v894_v9  ;;  %2926 = vpow2.f32 %v974_v26  ;;  %v840_v46 = vsel %vm832_vm6, 1.0, %v5405_v55 }
 0x293   : > { %v922_v6 = vadd.f32 -0.28449672, %v914_v52  ;;  %v915_v1 = vmul.f32 %v3362_v10, %v907_v7  ;;  %v3386_v28 = vpop.eup %2910  ;;  %v893_v3 = vmul.f32 %v3372_v58, %v885_v2  ;;  %v888_v8 = vadd.f32 -1.4531521, %v880_v25 }
 0x294   : > { %v916_v17 = vadd.f32 -0.28449672, %v908_v60  ;;  %v910_v30 = vmul.f32 %v3366_v34, %v902_v19  ;;  %v879_v29 = vmul.f32 1.0614054, %v3386_v28  ;;  %v2913_v32 = vpop.eup %2912  ;;  %vm831_vm9 = vcmp.ge.f32.partialorder %v3338_v4, 0.0 }
 0x295   : > { %v930_v23 = vmul.f32 %v3350_v57, %v922_v6  ;;  %v923_v63 = vadd.f32 -0.28449672, %v915_v1  ;;  %v901_v37 = vadd.f32 1.4214138, %v893_v3  ;;  %v3393_v40 = vpop.eup %2914  ;;  %v896_v42 = vmul.f32 %v3380_v22, %v888_v8 }
 0x296   : > { %v924_v24 = vmul.f32 %v3353_v21, %v916_v17  ;;  %v918_v36 = vadd.f32 -0.28449672, %v910_v30  ;;  %v887_v43 = vadd.f32 -1.4531521, %v879_v29  ;;  %v2917_v13 = vpop.eup %2916  ;;  %vm833_vm10 = vcmp.ge.f32.partialorder %v3341_v5, 0.0 }
 0x297   : > { %v938_v38 = vadd.f32 0.2548296, %v930_v23  ;;  %v931_v35 = vmul.f32 %v3362_v10, %v923_v63  ;;  %v2919_v53 = vpop.eup %2918  ;;  %v904_v60 = vadd.f32 1.4214138, %v896_v42  ;;  %vm2143_vm4 = vcmask 1040384  }
 0x298   : > { %v932_v31 = vadd.f32 0.2548296, %v924_v24  ;;  %v926_v52 = vmul.f32 %v3366_v34, %v918_v36  ;;  %v895_v61 = vmul.f32 %v3386_v28, %v887_v43  ;;  %v2921_v11 = vpop.eup %2920 }
 0x299   : > { %v946_v33 = vmul.f32 %v3350_v57, %v938_v38  ;;  %v939_v27 = vadd.f32 0.2548296, %v931_v35  ;;  %v909_v57 = vmul.f32 %v3372_v58, %v901_v37  ;;  %v912_v17 = vmul.f32 %v3380_v22, %v904_v60  ;;  %v2923_v25 = vpop.eup %2922 }
 0x29a   : > { %v940_v41 = vmul.f32 %v3353_v21, %v932_v31  ;;  %v881_v21 = vmul.f32 1.0614054, %v3393_v40  ;;  %v934_v7 = vadd.f32 0.2548296, %v926_v52  ;;  %v903_v18 = vadd.f32 1.4214138, %v895_v61 }
 0x29b   : > { %v986_v20 = vmul.f32 %v2907_v16, %v946_v33  ;;  %v947_v6 = vmul.f32 %v3362_v10, %v939_v27  ;;  %v917_v9 = vadd.f32 -0.28449672, %v909_v57  ;;  %v920_v26 = vadd.f32 -0.28449672, %v912_v17 }
 0x29c   : > { %v980_v54 = vmul.f32 %v2913_v32, %v940_v41  ;;  %v889_v23 = vadd.f32 -1.4531521, %v881_v21  ;;  %v942_v2 = vmul.f32 %v3366_v34, %v934_v7  ;;  %v911_v38 = vmul.f32 %v3386_v28, %v903_v18 }
 0x29d   : > { %v994_v62 = vsub.f32 1.0, %v986_v20  ;;  %v987_v19 = vmul.f32 %v2917_v13, %v947_v6  ;;  %v925_v24 = vmul.f32 %v3372_v58, %v917_v9  ;;  %v928_v34 = vmul.f32 %v3380_v22, %v920_v26 }
 0x29e   : > { %v988_v16 = vsub.f32 1.0, %v980_v54  ;;  %v897_v63 = vmul.f32 %v3393_v40, %v889_v23  ;;  %v982_v31 = vmul.f32 %v2919_v53, %v942_v2  ;;  %v919_v32 = vadd.f32 -0.28449672, %v911_v38 }
 0x29f   : > { %v1002_v1 = vmul.f32 %v994_v62, %v3329_v56  ;;  %v995_v3 = vsub.f32 1.0, %v987_v19  ;;  %v933_v8 = vadd.f32 0.2548296, %v925_v24  ;;  %v2925_v56 = vpop.eup %2924  ;;  %v936_v43 = vadd.f32 0.2548296, %v928_v34 }
 0x2a0   : > { %v996_v10 = vmul.f32 %v988_v16, %v3344_v14  ;;  %v905_v33 = vadd.f32 1.4214138, %v897_v63  ;;  %v990_v36 = vsub.f32 1.0, %v982_v31  ;;  %v2927_v41 = vpop.eup %2926  ;;  %v927_v13 = vmul.f32 %v3386_v28, %v919_v32 }
 0x2a1   : > { %v1010_v30 = vadd.f32 1.0, %v1002_v1  ;;  %v1003_v35 = vmul.f32 %v995_v3, %v3347_v15  ;;  %v941_v37 = vmul.f32 %v3372_v58, %v933_v8  ;;  %v837_v15 = vsel %vm829_vm5, 1.0, %v5405_v55 }
 0x2a2   : > { %v1004_v29 = vadd.f32 1.0, %v996_v10  ;;  %v913_v20 = vmul.f32 %v3393_v40, %v905_v33  ;;  %v998_v27 = vmul.f32 %v990_v36, %v3359_v0  ;;  %v935_v52 = vadd.f32 0.2548296, %v927_v13 }
 0x2a3   : > { %v3415_v14 = vmul.f32 %v1010_v30, %v3321_v49  ;;  %v1011_v49 = vadd.f32 1.0, %v1003_v35  ;;  %v981_v58 = vmul.f32 %v2921_v11, %v941_v37  ;;  %v816_v2 = vmul.f32 0.5, %v3300_v39 }
 0x2a4   : > { %v3420_v42 = vmul.f32 %v1004_v29, %v3323_v50  ;;  %v944_v50 = vmul.f32 %v3380_v22, %v936_v43  ;;  %v921_v57 = vadd.f32 -0.28449672, %v913_v20  ;;  %v1006_v60 = vadd.f32 1.0, %v998_v27 }
 0x2a5   : > { %1032 = vrot.lane.b32.xlu1 %v3415_v14, %s2989_s19  ;;  %v1302_v53 = vrot.slane %v3415_v14, 7  ;;  %v3435_v54 = vmul.f32 %v1011_v49, %v3325_v51  ;;  %v989_v61 = vsub.f32 1.0, %v981_v58  ;;  %v943_v62 = vmul.f32 %v3386_v28, %v935_v52 }
 0x2a6   : > { %5424 = vst [vmem:[#allocation2_spill] sm:$0xff] %v3420_v42  ;;  %1020 = vrot.lane.b32.xlu0 %v3420_v42, %s2989_s19  ;;  %v1296_v0 = vrot.slane %v3420_v42, 7  ;;  %v984_v21 = vmul.f32 %v2923_v25, %v944_v50  ;;  %v929_v22 = vmul.f32 %v3393_v40, %v921_v57  ;;  %v3446_v6 = vmul.f32 %v1006_v60, %v3332_v59 }
 0x2a7   : > { %v997_v51 = vmul.f32 %v989_v61, %v837_v15  ;;  %v1303_v7 = vrot.slane %v3435_v54, 7  ;;  %v1362_v9 = vrot.slane %v3420_v42, 1  ;;  %v983_v47 = vmul.f32 %v2925_v56, %v943_v62  ;;  %v2608_v62 = vld [vmem:[%s5396_s6 + $0x340] sm:$0xff] }
 0x2a8   : > { %v992_v11 = vsub.f32 1.0, %v984_v21  ;;  %v937_v16 = vadd.f32 0.2548296, %v929_v22  ;;  %v1369_v17 = vrot.slane %v3435_v54, 1  ;;  %v839_v24 = vsel %vm831_vm9, 1.0, %v5405_v55  ;;  %v2576_v21 = vld [vmem:[%s5396_s6 + $0x40] sm:$0xff] }
 0x2a9   : > { %1034 = vrot.lane.b32.xlu1 %v3435_v54, %s2989_s19  ;;  %v1005_v28 = vadd.f32 1.0, %v997_v51  ;;  %v3457_v59 = vsel %vm1046_vm7, %v1302_v53, %v1303_v7  ;;  %v3462_v18 = vsel %vm1046_vm7, %v1303_v7, %v1296_v0  ;;  %v991_v4 = vsub.f32 1.0, %v983_v47  ;;  %v2585_v22 = vld [vmem:[%s5396_s6 + $0x108] sm:$0xff]  ;;  %v2592_v51 = vld [vmem:[%s5396_s6 + $0x1c0] sm:$0xff]  ;;  %v2623_v47 = vld [vmem:[%s5396_s6 + $0x438] sm:$0xff] }
 0x2aa   : > { %1024 = vrot.lane.b32.xlu0 %v3446_v6, %s2989_s19  ;;  %5425 = vst [vmem:[#allocation3_spill] sm:$0xff] %v3462_v18  ;;  %v1000_v23 = vmul.f32 %v992_v11, %v840_v46  ;;  %v945_v1 = vmul.f32 %v3393_v40, %v937_v16  ;;  %v3472_v25 = vsel %vm1112_vm8, %v1369_v17, %v1362_v9  ;;  %v1298_v40 = vrot.slane %v3446_v6, 7  ;;  %v2600_v7 = vld [vmem:[%s5396_s6 + $0x280] sm:$0xff]  ;;  %v2586_v11 = vld [vmem:[%s5396_s6 + $0x110] sm:$0xff]  ;;  %v2577_v16 = vld [vmem:[%s5396_s6 + $0x48] sm:$0xff] }
 0x2ab   : > { %v3466_v19 = vmul.f32 %v1005_v28, %v3378_v12  ;;  %5426 = vst [vmem:[#allocation4_spill] sm:$0xff] %v3472_v25  ;;  %v999_v26 = vmul.f32 %v991_v4, %v839_v24  ;;  %v1364_v12 = vrot.slane %v3446_v6, 1  ;;  %v815_v30 = vmul.f32 0.5, %v3309_v44  ;;  %v2578_v28 = vld [vmem:[%s5396_s6 + $0x50] sm:$0xff] }
 0x2ac   : > { %v1008_v10 = vadd.f32 1.0, %v1000_v23  ;;  %v985_v38 = vmul.f32 %v2927_v41, %v945_v1  ;;  %v841_v8 = vsel %vm833_vm10, 1.0, %v5405_v55  ;;  %v817_v35 = vmul.f32 0.5, %v3319_v48  ;;  %v2593_v23 = vld [vmem:[%s5396_s6 + $0x1c8] sm:$0xff]  ;;  %v2594_v4 = vld [vmem:[%s5396_s6 + $0x1d0] sm:$0xff]  ;;  %v2632_v55 = vld [vmem:[%s5396_s6 + $0x580] sm:$0xff] }
 0x2ad   : > { %1022 = vrot.lane.b32.xlu1 %v3466_v19, %s2989_s19  ;;  %v1297_v39 = vrot.slane %v3466_v19, 7  ;;  %v1007_v3 = vadd.f32 1.0, %v999_v26  ;;  %v1363_v29 = vrot.slane %v3466_v19, 1  ;;  %v1368_v57 = vrot.slane %v3415_v14, 1  ;;  %v2601_v1 = vld [vmem:[%s5396_s6 + $0x288] sm:$0xff]  ;;  %v2616_v26 = vld [vmem:[%s5396_s6 + $0x400] sm:$0xff] }
 0x2ae   : > { %v3480_v63 = vmul.f32 %v1008_v10, %v816_v2  ;;  %v993_v31 = vsub.f32 1.0, %v985_v38  ;;  %v3614_v24 = vmul.f32 %v2608_v62, %v3420_v42  ;;  %v2602_v10 = vld [vmem:[%s5396_s6 + $0x290] sm:$0xff]  ;;  %v2617_v38 = vld [vmem:[%s5396_s6 + $0x408] sm:$0xff] }
 0x2af   : > { %v3486_v5 = vsel %vm1046_vm7, %v1297_v39, %v1298_v40  ;;  %v3490_v56 = vsel %vm1046_vm7, %v1296_v0, %v1297_v39  ;;  %v3495_v34 = vmul.f32 %v1007_v3, %v815_v30  ;;  %v3499_v32 = vsel %vm1112_vm8, %v1363_v29, %v1364_v12  ;;  %v2589_v39 = vld [vmem:[%s5396_s6 + $0x128] sm:$0xff] }
 0x2b0   : > { %1028 = vrot.lane.b32.xlu0 %v3480_v63, %s2989_s19  ;;  %v1001_v44 = vmul.f32 %v993_v31, %v841_v8  ;;  %v3503_v33 = vsel %vm1112_vm8, %v1362_v9, %v1363_v29  ;;  %v1300_v41 = vrot.slane %v3480_v63, 7  ;;  %v1366_v49 = vrot.slane %v3480_v63, 1  ;;  %v2607_v9 = vld [vmem:[%s5396_s6 + $0x2b8] sm:$0xff]  ;;  %v2624_v8 = vld [vmem:[%s5396_s6 + $0x4c0] sm:$0xff] }
 0x2b1   : > { %5427 = vst [vmem:[#allocation5_spill] sm:$0xff] %v3503_v33  ;;  %1026 = vrot.lane.b32.xlu1 %v3495_v34, %s2989_s19  ;;  %v1299_v37 = vrot.slane %v3495_v34, 7  ;;  %v1365_v48 = vrot.slane %v3495_v34, 1  ;;  %v3556_v0 = vsel %vm1112_vm8, %v1368_v57, %v1369_v17  ;;  %v2609_v17 = vld [vmem:[%s5396_s6 + $0x348] sm:$0xff]  ;;  %v3635_v30 = vmul.f32 %v2576_v21, %v3457_v59  ;;  %v2611_v21 = vld [vmem:[%s5396_s6 + $0x358] sm:$0xff] }
 0x2b2   : > { %v1009_v36 = vadd.f32 1.0, %v1001_v44  ;;  %v3638_v3 = vmul.f32 %v2607_v9, %v3457_v59  ;;  %v3641_v31 = vmul.f32 %v2600_v7, %v3462_v18  ;;  %v3647_v29 = vmul.f32 %v2585_v22, %v3420_v42  ;;  %v2580_v44 = vld [vmem:[%s5396_s6 + $0x60] sm:$0xff]  ;;  %v2619_v9 = vld [vmem:[%s5396_s6 + $0x418] sm:$0xff] }
 0x2b3   : > { %v3515_v13 = vsel %vm1046_vm7, %v1299_v37, %v1300_v41  ;;  %v3519_v20 = vsel %vm1046_vm7, %v1298_v40, %v1299_v37  ;;  %v3527_v27 = vsel %vm1112_vm8, %v1365_v48, %v1366_v49  ;;  %v3531_v15 = vsel %vm1112_vm8, %v1364_v12, %v1365_v48  ;;  %v2587_v40 = vld [vmem:[%s5396_s6 + $0x118] sm:$0xff]  ;;  %v2588_v12 = vld [vmem:[%s5396_s6 + $0x120] sm:$0xff] }
 0x2b4   : > { %1553 = vrot.lane.b32.xlu0 %v3420_v42, %s2990_s20  ;;  %v3511_v43 = vmul.f32 %v1009_v36, %v817_v35  ;;  %5428 = vst [vmem:[#allocation6_spill] sm:$0xff] %v3638_v3  ;;  %v2581_v35 = vld [vmem:[%s5396_s6 + $0x68] sm:$0xff]  ;;  %v3656_v36 = vmul.f32 %v2592_v51, %v3472_v25  ;;  %v3659_v37 = vmul.f32 %v2623_v47, %v3472_v25  ;;  %v2610_v3 = vld [vmem:[%s5396_s6 + $0x350] sm:$0xff]  ;;  %v2591_v25 = vld [vmem:[%s5396_s6 + $0x138] sm:$0xff] }
 0x2b5   : > { %v3665_v48 = vmul.f32 %v2586_v11, %v3466_v19  ;;  %v3686_v62 = vmul.f32 %v2578_v28, %v3490_v56  ;;  %v3689_v22 = vmul.f32 %v2601_v1, %v3490_v56  ;;  %v3692_v51 = vmul.f32 %v2602_v10, %v3486_v5  ;;  %v2625_v11 = vld [vmem:[%s5396_s6 + $0x4c8] sm:$0xff]  ;;  %v2582_v42 = vld [vmem:[%s5396_s6 + $0x70] sm:$0xff] }
 0x2b6   : > { %1030 = vrot.lane.b32.xlu1 %v3511_v43, %s2989_s19  ;;  %v1367_v58 = vrot.slane %v3511_v43, 1  ;;  %v1301_v52 = vrot.slane %v3511_v43, 7  ;;  %5429 = vst [vmem:[#allocation7_spill] sm:$0xff] %v3659_v37  ;;  %v3695_v7 = vmul.f32 %v2609_v17, %v3466_v19  ;;  %v2633_v47 = vld [vmem:[%s5396_s6 + $0x588] sm:$0xff]  ;;  %v3710_v28 = vmul.f32 %v2594_v4, %v3499_v32 }
 0x2b7   : > { %v3713_v17 = vmul.f32 %v2616_v26, %v3503_v33  ;;  %v3716_v1 = vmul.f32 %v2617_v38, %v3499_v32  ;;  %v2641_v10 = vld [vmem:[%s5396_s6 + $0x648] sm:$0xff]  ;;  %v3728_v4 = vmul.f32 %v2624_v8, %v3490_v56  ;;  %v3731_v26 = vmul.f32 %v2587_v40, %v3446_v6  ;;  %v2635_v56 = vld [vmem:[%s5396_s6 + $0x598] sm:$0xff] }
 0x2b8   : > { %1567 = vrot.lane.b32.xlu0 %v3435_v54, %s2990_s20  ;;  %v3539_v50 = vsel %vm1112_vm8, %v1366_v49, %v1367_v58  ;;  %v3548_v60 = vsel %vm1046_vm7, %v1301_v52, %v1302_v53  ;;  %v3552_v61 = vsel %vm1046_vm7, %v1300_v41, %v1301_v52  ;;  %v3560_v46 = vsel %vm1112_vm8, %v1367_v58, %v1368_v57  ;;  %v2584_v53 = vld [vmem:[%s5396_s6 + $0x100] sm:$0xff]  ;;  %v2579_v49 = vld [vmem:[%s5396_s6 + $0x58] sm:$0xff] }
 0x2b9   : > { %v3611_v2 = vmul.f32 %v2584_v53, %v3435_v54  ;;  %v3662_v41 = vmul.f32 %v2577_v16, %v3462_v18  ;;  %v2595_v58 = vld [vmem:[%s5396_s6 + $0x1d8] sm:$0xff]  ;;  %v2596_v52 = vld [vmem:[%s5396_s6 + $0x1e0] sm:$0xff]  ;;  %v3707_v16 = vmul.f32 %v2593_v23, %v3503_v33  ;;  %5430 = vst [vmem:[#allocation8_spill] sm:$0xff] %v3731_v26  ;;  %v3734_v38 = vmul.f32 %v2588_v12, %v3495_v34  ;;  %v2634_v33 = vld [vmem:[%s5396_s6 + $0x590] sm:$0xff] }
 0x2ba   : > { %1565 = vrot.lane.b32.xlu1 %v3415_v14, %s2990_s20  ;;  %v2603_v57 = vld [vmem:[%s5396_s6 + $0x298] sm:$0xff]  ;;  %v2604_v53 = vld [vmem:[%s5396_s6 + $0x2a0] sm:$0xff]  ;;  %v3737_v37 = vmul.f32 %v2589_v39, %v3480_v63  ;;  %v3749_v40 = vmul.f32 %v2580_v44, %v3519_v20  ;;  %v3752_v12 = vmul.f32 %v2581_v35, %v3515_v13  ;;  %v2626_v44 = vld [vmem:[%s5396_s6 + $0x4d0] sm:$0xff]  ;;  %v3770_v35 = vmul.f32 %v2595_v58, %v3531_v15 }
 0x2bb   : > { %v2640_v23 = vld [vmem:[%s5396_s6 + $0x640] sm:$0xff]  ;;  %5431 = vst [vmem:[#allocation9_spill] sm:$0xff] %v3734_v38  ;;  %v3755_v39 = vmul.f32 %v2603_v57, %v3519_v20  ;;  %v3758_v8 = vmul.f32 %v2604_v53, %v3515_v13  ;;  %v2618_v38 = vld [vmem:[%s5396_s6 + $0x410] sm:$0xff]  ;;  %v3773_v57 = vmul.f32 %v2596_v52, %v3527_v27  ;;  %v3776_v53 = vmul.f32 %v2611_v21, %v3495_v34  ;;  %v2643_v58 = vld [vmem:[%s5396_s6 + $0x658] sm:$0xff] }
 0x2bc   : > { %1557 = vrot.lane.b32.xlu0 %v3446_v6, %s2990_s20  ;;  %5432 = vst [vmem:[#allocation10_spill] sm:$0xff] %v3737_v37  ;;  %5433 = vst [vmem:[#allocation11_spill] sm:$0xff] %v3749_v40  ;;  %v2597_v37 = vld [vmem:[%s5396_s6 + $0x1e8] sm:$0xff]  ;;  %v3791_v52 = vmul.f32 %v2619_v9, %v3527_v27  ;;  %v3794_v21 = vmul.f32 %v2625_v11, %v3486_v5  ;;  %v2612_v9 = vld [vmem:[%s5396_s6 + $0x360] sm:$0xff]  ;;  %v3814_v11 = vmul.f32 %v2632_v55, %v3466_v19 }
 0x2bd   : > { %5434 = vst [vmem:[#allocation12_spill] sm:$0xff] %v3752_v12  ;;  %5435 = vst [vmem:[#allocation13_spill] sm:$0xff] %v3755_v39  ;;  %v2627_v12 = vld [vmem:[%s5396_s6 + $0x4d8] sm:$0xff]  ;;  %v2642_v39 = vld [vmem:[%s5396_s6 + $0x650] sm:$0xff] }
 0x2be   : > { %1555 = vrot.lane.b32.xlu1 %v3466_v19, %s2990_s20  ;;  %5436 = vst [vmem:[#allocation14_spill] sm:$0xff] %v3758_v8  ;;  %5437 = vst [vmem:[#allocation15_spill] sm:$0xff] %v3770_v35  ;;  %v3779_v8 = vmul.f32 %v2579_v49, %v3486_v5  ;;  %v3797_v49 = vmul.f32 %v2633_v47, %v3446_v6  ;;  %v3817_v47 = vmul.f32 %v2640_v23, %v3499_v32  ;;  %v2613_v35 = vld [vmem:[%s5396_s6 + $0x368] sm:$0xff]  ;;  %v2620_v55 = vld [vmem:[%s5396_s6 + $0x420] sm:$0xff] }
 0x2bf   : > { %5438 = vst [vmem:[#allocation16_spill] sm:$0xff] %v3773_v57  ;;  %5439 = vst [vmem:[#allocation17_spill] sm:$0xff] %v3776_v53  ;;  %v3800_v53 = vmul.f32 %v2641_v10, %v3531_v15  ;;  %v2590_v57 = vld [vmem:[%s5396_s6 + $0x130] sm:$0xff]  ;;  %v3820_v10 = vmul.f32 %v2610_v3, %v3446_v6  ;;  %v3835_v19 = vmul.f32 %v2626_v44, %v3519_v20  ;;  %v2583_v3 = vld [vmem:[%s5396_s6 + $0x78] sm:$0xff] }
 0x2c0   : > { %1561 = vrot.lane.b32.xlu0 %v3480_v63, %s2990_s20  ;;  %5440 = vst [vmem:[#allocation18_spill] sm:$0xff] %v3791_v52  ;;  %5441 = vst [vmem:[#allocation19_spill] sm:$0xff] %v3797_v49  ;;  %v3823_v52 = vmul.f32 %v2618_v38, %v3531_v15  ;;  %v3838_v6 = vmul.f32 %v2627_v12, %v3515_v13  ;;  %v3841_v32 = vmul.f32 %v2634_v33, %v3495_v34  ;;  %v2598_v23 = vld [vmem:[%s5396_s6 + $0x1f0] sm:$0xff]  ;;  %v2599_v20 = vld [vmem:[%s5396_s6 + $0x1f8] sm:$0xff] }
 0x2c1   : > { %5442 = vst [vmem:[#allocation20_spill] sm:$0xff] %v3800_v53  ;;  %5443 = vst [vmem:[#allocation21_spill] sm:$0xff] %v3814_v11  ;;  %v3844_v15 = vmul.f32 %v2635_v56, %v3480_v63  ;;  %v3861_v33 = vmul.f32 %v2642_v39, %v3527_v27  ;;  %v3864_v38 = vmul.f32 %v2590_v57, %v3511_v43  ;;  %v2605_v12 = vld [vmem:[%s5396_s6 + $0x2a8] sm:$0xff]  ;;  %v2628_v39 = vld [vmem:[%s5396_s6 + $0x4e0] sm:$0xff] }
 0x2c2   : > { %1559 = vrot.lane.b32.xlu1 %v3495_v34, %s2990_s20  ;;  %5444 = vst [vmem:[#allocation22_spill] sm:$0xff] %v3817_v47  ;;  %5445 = vst [vmem:[#allocation23_spill] sm:$0xff] %v3820_v10  ;;  %v3858_v34 = vmul.f32 %v2597_v37, %v3539_v50  ;;  %v3867_v56 = vmul.f32 %v2591_v25, %v3415_v14  ;;  %v3873_v44 = vmul.f32 %v2643_v58, %v3539_v50  ;;  %v2621_v27 = vld [vmem:[%s5396_s6 + $0x428] sm:$0xff]  ;;  %v1059_v49 = vld [vmem:[%s5396_s6 + $0x20] sm:$0xff] }
 0x2c3   : > { %5446 = vst [vmem:[#allocation24_spill] sm:$0xff] %v3823_v52  ;;  %5447 = vst [vmem:[#allocation25_spill] sm:$0xff] %v3835_v19  ;;  %v3879_v37 = vmul.f32 %v2613_v35, %v3511_v43  ;;  %v3885_v25 = vmul.f32 %v2620_v55, %v3539_v50  ;;  %v2629_v57 = vld [vmem:[%s5396_s6 + $0x4e8] sm:$0xff]  ;;  %v3896_v35 = vmul.f32 %v2582_v42, %v3552_v61  ;;  %v2636_v55 = vld [vmem:[%s5396_s6 + $0x5a0] sm:$0xff] }
 0x2c4   : > { %5448 = vst [vmem:[#allocation26_spill] sm:$0xff] %v3838_v6  ;;  %5449 = vst [vmem:[#allocation27_spill] sm:$0xff] %v3841_v32  ;;  %v3876_v32 = vmul.f32 %v2612_v9, %v3480_v63  ;;  %v3899_v58 = vmul.f32 %v2583_v3, %v3548_v60  ;;  %v3902_v9 = vmul.f32 %v2598_v23, %v3560_v46  ;;  %v2644_v42 = vld [vmem:[%s5396_s6 + $0x660] sm:$0xff] }
 0x2c5   : > { %5450 = vst [vmem:[#allocation28_spill] sm:$0xff] %v3844_v15  ;;  %5452 = vst [vmem:[#allocation30_spill] sm:$0xff] %v3858_v34  ;;  %v3905_v50 = vmul.f32 %v2599_v20, %v3556_v0  ;;  %v1055_v20 = vld [vmem:[%s5396_s6] sm:$0xff]  ;;  %v3933_v23 = vmul.f32 %v2628_v39, %v3552_v61  ;;  %v3936_v3 = vmul.f32 %v2629_v57, %v3548_v60  ;;  %v2561_v34 = vld [vmem:[%s5396_s6 + $0x548] sm:$0xff] }
 0x2c6   : > { %1563 = vrot.lane.b32.xlu1 %v3511_v43, %s2990_s20  ;;  %5453 = vst [vmem:[#allocation31_spill] sm:$0xff] %v3861_v33  ;;  %5454 = vst [vmem:[#allocation32_spill] sm:$0xff] %v3864_v38  ;;  %v3930_v38 = vmul.f32 %v2621_v27, %v3560_v46  ;;  %v2520_v27 = vld [vmem:[%s5396_s6 + $0x180] sm:$0xff] }
 0x2c7   : > { %5455 = vst [vmem:[#allocation33_spill] sm:$0xff] %v3867_v56  ;;  %5456 = vst [vmem:[#allocation34_spill] sm:$0xff] %v3873_v44  ;;  %v3927_v56 = vmul.f32 %v2605_v12, %v3552_v61  ;;  %v2513_v44 = vld [vmem:[%s5396_s6 + $0xc8] sm:$0xff] }
 0x2c8   : > { %5457 = vst [vmem:[#allocation35_spill] sm:$0xff] %v3876_v32  ;;  %5458 = vst [vmem:[#allocation36_spill] sm:$0xff] %v3879_v37  ;;  %v2645_v32 = vld [vmem:[%s5396_s6 + $0x668] sm:$0xff] }
 0x2c9   : > { %5459 = vst [vmem:[#allocation37_spill] sm:$0xff] %v3885_v25  ;;  %5460 = vst [vmem:[#allocation38_spill] sm:$0xff] %v3896_v35  ;;  %v2637_v25 = vld [vmem:[%s5396_s6 + $0x5a8] sm:$0xff] }
 0x2ca   : > { %5461 = vst [vmem:[#allocation39_spill] sm:$0xff] %v3899_v58  ;;  %5462 = vst [vmem:[#allocation40_spill] sm:$0xff] %v3902_v9  ;;  %v2606_v58 = vld [vmem:[%s5396_s6 + $0x2b0] sm:$0xff]  ;;  %v3975_v33 = vmul.f32 %v2637_v25, %v3415_v14  ;;  %v2528_v25 = vld [vmem:[%s5396_s6 + $0x240] sm:$0xff] }
 0x2cb   : > { %5463 = vst [vmem:[#allocation41_spill] sm:$0xff] %v3905_v50  ;;  %v2512_v50 = vld [vmem:[%s5396_s6 + $0xc0] sm:$0xff]  ;;  %5464 = vst [vmem:[#allocation42_spill] sm:$0xff] %v3927_v56  ;;  %v2615_v56 = vld [vmem:[%s5396_s6 + $0x378] sm:$0xff] }
 0x2cc   : > { %5465 = vst [vmem:[#allocation43_spill] sm:$0xff] %v3930_v38  ;;  %5466 = vst [vmem:[#allocation44_spill] sm:$0xff] %v3933_v23  ;;  %v3961_v23 = vmul.f32 %v2636_v55, %v3511_v43  ;;  %v2614_v38 = vld [vmem:[%s5396_s6 + $0x370] sm:$0xff]  ;;  %v3978_v43 = vmul.f32 %v2644_v42, %v3560_v46  ;;  %v3998_v42 = vmul.f32 %v2645_v32, %v3556_v0 }
 0x2cd   : > { %5467 = vst [vmem:[#allocation45_spill] sm:$0xff] %v3936_v3  ;;  %5473 = vst [vmem:[#allocation49_spill] sm:$0xff] %v3975_v33  ;;  %v2622_v55 = vld [vmem:[%s5396_s6 + $0x430] sm:$0xff]  ;;  %v4013_v32 = vmul.f32 %v2614_v38, %v3415_v14 }
 0x2ce   : > { %5472 = vst [vmem:[#allocation48_spill] sm:$0xff] %v3961_v23  ;;  %5474 = vst [vmem:[#allocation50_spill] sm:$0xff] %v3978_v43  ;;  %v2630_v23 = vld [vmem:[%s5396_s6 + $0x4f0] sm:$0xff]  ;;  %v2536_v43 = vld [vmem:[%s5396_s6 + $0x300] sm:$0xff] }
 0x2cf   : > { %5476 = vst [vmem:[#allocation52_spill] sm:$0xff] %v3998_v42  ;;  %5478 = vst [vmem:[#allocation54_spill] sm:$0xff] %v4013_v32  ;;  %v4034_v14 = vmul.f32 %v2630_v23, %v3457_v59  ;;  %v2535_v59 = vld [vmem:[%s5396_s6 + $0x278] sm:$0xff] }
 0x2d1   : > { %5482 = vst [vmem:[#allocation57_spill] sm:$0xff] %v4034_v14 }
 0x317   : > { %v3811_v5 = vpop.permute.xlu1 %1032 }
 0x318   : > { %v3855_v13 = vpop.permute.xlu0 %1020  ;;  %v5468_v61 = vrot.slane %v3811_v5, 7 }
 0x319   : > { %5451 = vst [vmem:[#allocation29_spill] sm:$0xff] %v3855_v13  ;;  %v1036_v12 = vrot.slane %v3855_v13, 7  ;;  %v5470_v57 = vrot.slane %v3855_v13, 1 }
 0x31b   : > { %v3893_v63 = vpop.permute.xlu1 %1034 }
 0x31c   : > { %v1043_v9 = vrot.slane %v3893_v63, 7  ;;  %v1111_v37 = vrot.slane %v3893_v63, 1  ;;  %v4010_v19 = vpop.permute.xlu0 %1024 }
 0x31d   : > { %v1038_v14 = vrot.slane %v4010_v19, 7  ;;  %v5483_v42 = vrot.slane %v4010_v19, 1 }
 0x31e   : > { %v3952_v39 = vsel %vm1046_vm7, %v5468_v61, %v1043_v9  ;;  %v3958_v3 = vsel %vm1112_vm8, %v1111_v37, %v5470_v57  ;;  %v2519_v61 = vld [vmem:[%s5396_s6 + $0xf8] sm:$0xff]  ;;  %v1088_v57 = vmul.f32 %v2512_v50, %v3893_v63  ;;  %v1056_v50 = vld [vmem:[%s5396_s6 + $0x8] sm:$0xff]  ;;  %v3995_v46 = vsel %vm1046_vm7, %v1043_v9, %v1036_v12 }
 0x31f   : > { %5469 = vst [vmem:[#allocation46_spill] sm:$0xff] %v3952_v39  ;;  %5471 = vst [vmem:[#allocation47_spill] sm:$0xff] %v3958_v3  ;;  %v1063_v35 = vmul.f32 %v1055_v20, %v3952_v39  ;;  %v4001_v20 = vmul.f32 %v2606_v58, %v3548_v60  ;;  %v1130_v15 = vmul.f32 %v2520_v27, %v3958_v3  ;;  %v1023_v9 = vpop.permute.xlu1 %1022  ;;  %v2516_v3 = vld [vmem:[%s5396_s6 + $0xe0] sm:$0xff] }
 0x320   : > { %5475 = vst [vmem:[#allocation51_spill] sm:$0xff] %v3995_v46  ;;  %v4016_v60 = vmul.f32 %v2615_v56, %v3435_v54  ;;  %v4019_v58 = vmul.f32 %v2519_v61, %v3811_v5  ;;  %v1064_v38 = vmul.f32 %v1056_v50, %v3995_v46  ;;  %v1155_v61 = vmul.f32 %v2528_v25, %v3995_v46 }
 0x321   : > { %5477 = vst [vmem:[#allocation53_spill] sm:$0xff] %v4001_v20  ;;  %v1096_v33 = vadd.f32 %v1088_v57, %v1063_v35  ;;  %v2527_v20 = vld [vmem:[%s5396_s6 + $0x1b8] sm:$0xff]  ;;  %v5480_v35 = vrot.slane %v3811_v5, 1  ;;  %v4031_v57 = vmul.f32 %v2622_v55, %v3556_v0  ;;  %v1089_v0 = vmul.f32 %v2513_v44, %v3855_v13  ;;  %v2522_v44 = vld [vmem:[%s5396_s6 + $0x190] sm:$0xff] }
 0x322   : > { %5479 = vst [vmem:[#allocation55_spill] sm:$0xff] %v4016_v60  ;;  %v1057_v60 = vld [vmem:[%s5396_s6 + $0x10] sm:$0xff]  ;;  %v1180_v55 = vmul.f32 %v2536_v43, %v3855_v13  ;;  %v1105_v23 = vrot.slane %v1023_v9, 1  ;;  %v2544_v43 = vld [vmem:[%s5396_s6 + $0x3c0] sm:$0xff]  ;;  %v4085_v10 = vmul.f32 %v2535_v59, %v3952_v39  ;;  %v2537_v59 = vld [vmem:[%s5396_s6 + $0x308] sm:$0xff] }
 0x323   : > { %v4028_v27 = vsel %vm1112_vm8, %v5480_v35, %v1111_v37  ;;  %5481 = vst [vmem:[#allocation56_spill] sm:$0xff] %v4031_v57  ;;  %v1138_v56 = vadd.f32 %v1130_v15, %v1096_v33  ;;  %v2514_v37 = vld [vmem:[%s5396_s6 + $0xd0] sm:$0xff]  ;;  %v1037_v35 = vrot.slane %v1023_v9, 7  ;;  %v2521_v33 = vld [vmem:[%s5396_s6 + $0x188] sm:$0xff]  ;;  %v2515_v57 = vld [vmem:[%s5396_s6 + $0xd8] sm:$0xff]  ;;  %v4114_v18 = vpop.permute.xlu1 %1026 }
 0x324   : > { %v4054_v50 = vmul.f32 %v2527_v20, %v4028_v27  ;;  %v2538_v20 = vld [vmem:[%s5396_s6 + $0x310] sm:$0xff]  ;;  %v1090_v32 = vmul.f32 %v2514_v37, %v1023_v9  ;;  %v1118_v6 = vsel %vm1112_vm8, %v1105_v23, %v5483_v42  ;;  %v1097_v37 = vadd.f32 %v1089_v0, %v1064_v38  ;;  %v2545_v39 = vld [vmem:[%s5396_s6 + $0x3c8] sm:$0xff] }
 0x325   : > { %v1163_v25 = vadd.f32 %v1155_v61, %v1138_v56  ;;  %v1053_v15 = vsel %vm1046_vm7, %v1036_v12, %v1037_v35  ;;  %v2529_v56 = vld [vmem:[%s5396_s6 + $0x248] sm:$0xff]  ;;  %v5484_v12 = vrot.slane %v3855_v13, 1  ;;  %v1052_v42 = vsel %vm1046_vm7, %v1037_v35, %v1038_v14 }
 0x326   : > { %v1065_v61 = vmul.f32 %v1057_v60, %v1053_v15  ;;  %v2552_v60 = vld [vmem:[%s5396_s6 + $0x480] sm:$0xff]  ;;  %v1132_v11 = vmul.f32 %v2522_v44, %v1118_v6  ;;  %v1091_v38 = vmul.f32 %v2515_v57, %v4010_v19  ;;  %v1182_v0 = vmul.f32 %v2538_v20, %v4010_v19  ;;  %v2553_v57 = vld [vmem:[%s5396_s6 + $0x488] sm:$0xff] }
 0x327   : > { %v4082_v52 = vsel %vm1112_vm8, %v5484_v12, %v1105_v23  ;;  %v1058_v23 = vld [vmem:[%s5396_s6 + $0x18] sm:$0xff]  ;;  %v2560_v12 = vld [vmem:[%s5396_s6 + $0x540] sm:$0xff]  ;;  %v1188_v46 = vadd.f32 %v1180_v55, %v1163_v25  ;;  %v1156_v53 = vmul.f32 %v2529_v56, %v1053_v15  ;;  %v4123_v56 = vpop.permute.xlu0 %1028  ;;  %v1206_v26 = vmul.f32 %v2545_v39, %v1118_v6 }
 0x328   : > { %5485 = vst [vmem:[#allocation58_spill] sm:$0xff] %v4082_v52  ;;  %v1131_v13 = vmul.f32 %v2521_v33, %v4082_v52  ;;  %v1098_v47 = vadd.f32 %v1090_v32, %v1065_v61  ;;  %v1205_v35 = vmul.f32 %v2544_v43, %v4082_v52  ;;  %v2530_v33 = vld [vmem:[%s5396_s6 + $0x250] sm:$0xff]  ;;  %v1256_v32 = vmul.f32 %v2561_v34, %v4010_v19  ;;  %v2568_v55 = vld [vmem:[%s5396_s6 + $0x600] sm:$0xff] }
 0x329   : > { %v1230_v43 = vmul.f32 %v2552_v60, %v1053_v15  ;;  %v1066_v20 = vmul.f32 %v1058_v23, %v1052_v42  ;;  %v1181_v52 = vmul.f32 %v2537_v59, %v1023_v9  ;;  %v1107_v39 = vrot.slane %v4114_v18, 1  ;;  %v2523_v23 = vld [vmem:[%s5396_s6 + $0x198] sm:$0xff] }
 0x32a   : > { %v1139_v40 = vadd.f32 %v1131_v13, %v1097_v37  ;;  %v1140_v25 = vadd.f32 %v1132_v11, %v1098_v47  ;;  %v1213_v44 = vadd.f32 %v1205_v35, %v1188_v46  ;;  %v1255_v13 = vmul.f32 %v2560_v12, %v1023_v9 }
 0x32b   : > { %v1157_v37 = vmul.f32 %v2530_v33, %v1052_v42  ;;  %v1039_v11 = vrot.slane %v4114_v18, 7  ;;  %v1231_v46 = vmul.f32 %v2553_v57, %v1052_v42  ;;  %v1108_v60 = vrot.slane %v4123_v56, 1  ;;  %v2546_v42 = vld [vmem:[%s5396_s6 + $0x3d0] sm:$0xff] }
 0x32c   : > { %v1164_v61 = vadd.f32 %v1156_v53, %v1139_v40  ;;  %v1238_v34 = vadd.f32 %v1230_v43, %v1213_v44  ;;  %v1280_v40 = vmul.f32 %v2568_v55, %v1118_v6  ;;  %v2517_v53 = vld [vmem:[%s5396_s6 + $0xe8] sm:$0xff]  ;;  %v1040_v6 = vrot.slane %v4123_v56, 7  ;;  %v2524_v55 = vld [vmem:[%s5396_s6 + $0x1a0] sm:$0xff]  ;;  %v2554_v43 = vld [vmem:[%s5396_s6 + $0x490] sm:$0xff] }
 0x32d   : > { %v1165_v9 = vadd.f32 %v1157_v37, %v1140_v25  ;;  %v1051_v59 = vsel %vm1046_vm7, %v1038_v14, %v1039_v11  ;;  %v1092_v35 = vmul.f32 %v2516_v3, %v4114_v18  ;;  %v4148_v57 = vmul.f32 %v2517_v53, %v4123_v56  ;;  %v2540_v44 = vld [vmem:[%s5396_s6 + $0x320] sm:$0xff] }
 0x32e   : > { %v1189_v47 = vadd.f32 %v1181_v52, %v1164_v61  ;;  %v1263_v15 = vadd.f32 %v1255_v13, %v1238_v34  ;;  %v1067_v12 = vmul.f32 %v1059_v49, %v1051_v59  ;;  %v1116_v14 = vsel %vm1112_vm8, %v1107_v39, %v1108_v60 }
 0x32f   : > { %v5486_v49 = vrot.slane %v4010_v19, 1  ;;  %v1099_v61 = vadd.f32 %v1091_v38, %v1066_v20  ;;  %v2539_v19 = vld [vmem:[%s5396_s6 + $0x318] sm:$0xff]  ;;  %v2562_v20 = vld [vmem:[%s5396_s6 + $0x550] sm:$0xff] }
 0x330   : > { %v1214_v52 = vadd.f32 %v1206_v26, %v1189_v47  ;;  %v1288_v33 = vadd.f32 %v1280_v40, %v1263_v15  ;;  %v2531_v26 = vld [vmem:[%s5396_s6 + $0x258] sm:$0xff]  ;;  %v1100_v13 = vadd.f32 %v1092_v35, %v1067_v12  ;;  %v2569_v47 = vld [vmem:[%s5396_s6 + $0x608] sm:$0xff]  ;;  %v1190_v40 = vadd.f32 %v1182_v0, %v1165_v9  ;;  %v2532_v0 = vld [vmem:[%s5396_s6 + $0x260] sm:$0xff] }
 0x331   : > { %v1117_v3 = vsel %vm1112_vm8, %v5486_v49, %v1107_v39  ;;  %v1134_v39 = vmul.f32 %v2524_v55, %v1116_v14  ;;  %v4189_v12 = vmul.f32 %v2540_v44, %v4123_v56  ;;  %v1232_v9 = vmul.f32 %v2554_v43, %v1051_v59 }
 0x332   : > { %v1239_v25 = vadd.f32 %v1231_v46, %v1214_v52  ;;  %v1133_v37 = vmul.f32 %v2523_v23, %v1117_v3  ;;  %v1329_v34 = vadd.f32 %v3635_v30, %v1288_v33  ;;  %v1050_v46 = vsel %vm1046_vm7, %v1039_v11, %v1040_v6  ;;  %v1060_v30 = vld [vmem:[%s5396_s6 + $0x28] sm:$0xff] }
 0x333   : > { %v1207_v53 = vmul.f32 %v2546_v42, %v1117_v3  ;;  %v1158_v23 = vmul.f32 %v2531_v26, %v1051_v59  ;;  %v2570_v42 = vld [vmem:[%s5396_s6 + $0x610] sm:$0xff]  ;;  %v1142_v35 = vadd.f32 %v1134_v39, %v1100_v13  ;;  %v1281_v55 = vmul.f32 %v2569_v47, %v1117_v3  ;;  %v4201_v26 = vpop.permute.xlu1 %1030  ;;  %v1062_v47 = vld [vmem:[%s5396_s6 + $0x38] sm:$0xff] }
 0x334   : > { %v1264_v38 = vadd.f32 %v1256_v32, %v1239_v25  ;;  %v1141_v15 = vadd.f32 %v1133_v37, %v1099_v61  ;;  %v1354_v52 = vadd.f32 %v3611_v2, %v1329_v34  ;;  %v2547_v32 = vld [vmem:[%s5396_s6 + $0x3d8] sm:$0xff]  ;;  %v1183_v2 = vmul.f32 %v2539_v19, %v4114_v18 }
 0x335   : > { %v1215_v11 = vadd.f32 %v1207_v53, %v1190_v40  ;;  %v2555_v25 = vld [vmem:[%s5396_s6 + $0x498] sm:$0xff]  ;;  %v1068_v44 = vmul.f32 %v1060_v30, %v1050_v46  ;;  %v1257_v59 = vmul.f32 %v2562_v20, %v4114_v18  ;;  %v1159_v43 = vmul.f32 %v2532_v0, %v1050_v46  ;;  %v2518_v18 = vld [vmem:[%s5396_s6 + $0xf0] sm:$0xff] }
 0x336   : > { %v1166_v33 = vadd.f32 %v1158_v23, %v1141_v15  ;;  %v1395_v49 = vadd.f32 %v3656_v36, %v1354_v52  ;;  %v1208_v34 = vmul.f32 %v2547_v32, %v1116_v14  ;;  %v1289_v13 = vadd.f32 %v1281_v55, %v1264_v38  ;;  %v1061_v36 = vld [vmem:[%s5396_s6 + $0x30] sm:$0xff] }
 0x337   : > { %v1240_v61 = vadd.f32 %v1232_v9, %v1215_v11  ;;  %v1282_v3 = vmul.f32 %v2570_v42, %v1116_v14  ;;  %v1041_v53 = vrot.slane %v4201_v26, 7  ;;  %v1167_v30 = vadd.f32 %v1159_v43, %v1142_v35  ;;  %v2525_v9 = vld [vmem:[%s5396_s6 + $0x1a8] sm:$0xff]  ;;  %v2526_v42 = vld [vmem:[%s5396_s6 + $0x1b0] sm:$0xff]  ;;  %v2563_v35 = vld [vmem:[%s5396_s6 + $0x558] sm:$0xff] }
 0x338   : > { %v1191_v37 = vadd.f32 %v1183_v2, %v1166_v33  ;;  %v1420_v40 = vadd.f32 %v3641_v31, %v1395_v49  ;;  %v1233_v20 = vmul.f32 %v2555_v25, %v1050_v46  ;;  %v1330_v31 = vadd.f32 %v3662_v41, %v1289_v13  ;;  %v2534_v25 = vld [vmem:[%s5396_s6 + $0x270] sm:$0xff]  ;;  %v2541_v13 = vld [vmem:[%s5396_s6 + $0x328] sm:$0xff] }
 0x339   : > { %v1265_v19 = vadd.f32 %v1257_v59, %v1240_v61  ;;  %v5487_v15 = vrot.slane %v3811_v5, 7  ;;  %v1049_v52 = vsel %vm1046_vm7, %v1040_v6, %v1041_v53  ;;  %v1094_v41 = vmul.f32 %v2518_v18, %v4201_v26 }
 0x33a   : > { %v1216_v38 = vadd.f32 %v1208_v34, %v1191_v37  ;;  %v1445_v14 = vadd.f32 %v3614_v24, %v1420_v40  ;;  %v1355_v0 = vadd.f32 %v3647_v29, %v1330_v31  ;;  %v1069_v32 = vmul.f32 %v1061_v36, %v1049_v52 }
 0x33b   : > { %v1290_v39 = vadd.f32 %v1282_v3, %v1265_v19  ;;  %v4225_v23 = vsel %vm1046_vm7, %v1041_v53, %v5487_v15  ;;  %v1101_v6 = vadd.f32 %v4148_v57, %v1068_v44  ;;  %v1109_v29 = vrot.slane %v4201_v26, 1  ;;  %v2543_v19 = vld [vmem:[%s5396_s6 + $0x338] sm:$0xff] }
 0x33c   : > { %v1070_v46 = vmul.f32 %v1062_v47, %v4225_v23  ;;  %v1470_v11 = vadd.f32 %v3713_v17, %v1445_v14  ;;  %v1241_v33 = vadd.f32 %v1233_v20, %v1216_v38  ;;  %v2533_v17 = vld [vmem:[%s5396_s6 + $0x268] sm:$0xff]  ;;  %v1102_v2 = vadd.f32 %v1094_v41, %v1069_v32  ;;  %v2542_v47 = vld [vmem:[%s5396_s6 + $0x330] sm:$0xff]  ;;  %v2564_v20 = vld [vmem:[%s5396_s6 + $0x560] sm:$0xff] }
 0x33d   : > { %v1331_v24 = vadd.f32 %v3686_v62, %v1290_v39  ;;  %v1396_v62 = vadd.f32 %v3707_v16, %v1355_v0  ;;  %v5488_v44 = vrot.slane %v3811_v5, 1  ;;  %v1115_v61 = vsel %vm1112_vm8, %v1108_v60, %v1109_v29  ;;  %v2557_v0 = vld [vmem:[%s5396_s6 + $0x4a8] sm:$0xff] }
 0x33e   : > { %v1103_v55 = vadd.f32 %v4019_v58, %v1070_v46  ;;  %v4254_v57 = vadd.f32 %v3728_v4, %v1470_v11  ;;  %v1135_v4 = vmul.f32 %v2525_v9, %v1115_v61  ;;  %v1258_v37 = vmul.f32 %v2563_v35, %v4123_v56  ;;  %v2571_v56 = vld [vmem:[%s5396_s6 + $0x618] sm:$0xff]  ;;  %v2565_v41 = vld [vmem:[%s5396_s6 + $0x568] sm:$0xff]  ;;  %v4317_v11 = vpop.permute.xlu0 %1553 }
 0x33f   : > { %v1356_v49 = vadd.f32 %v3665_v48, %v1331_v24  ;;  %v1114_v16 = vsel %vm1112_vm8, %v1109_v29, %v5488_v44  ;;  %v1421_v58 = vadd.f32 %v3689_v22, %v1396_v62  ;;  %v2548_v48 = vld [vmem:[%s5396_s6 + $0x3e0] sm:$0xff]  ;;  %v1160_v40 = vmul.f32 %v2533_v17, %v1049_v52  ;;  %v2638_v22 = vld [vmem:[%s5396_s6 + $0x5b0] sm:$0xff]  ;;  %v2551_v29 = vld [vmem:[%s5396_s6 + $0x3f8] sm:$0xff] }
 0x340   : > { %v1136_v59 = vmul.f32 %v2526_v42, %v1114_v16  ;;  %v1145_v43 = vadd.f32 %v4054_v50, %v1103_v55  ;;  %v1192_v60 = vadd.f32 %v4189_v12, %v1167_v30  ;;  %v1143_v3 = vadd.f32 %v1135_v4, %v1101_v6  ;;  %v2631_v44 = vld [vmem:[%s5396_s6 + $0x4f8] sm:$0xff] }
 0x341   : > { %v1397_v34 = vadd.f32 %v3710_v28, %v1356_v49  ;;  %v1446_v50 = vadd.f32 %v3695_v7, %v1421_v58  ;;  %v2556_v28 = vld [vmem:[%s5396_s6 + $0x4a0] sm:$0xff]  ;;  %v1161_v36 = vmul.f32 %v2534_v25, %v4225_v23  ;;  %v1266_v18 = vadd.f32 %v1258_v37, %v1241_v33  ;;  %v2549_v7 = vld [vmem:[%s5396_s6 + $0x3e8] sm:$0xff] }
 0x342   : > { %v1144_v12 = vadd.f32 %v1136_v59, %v1102_v2  ;;  %v1170_v30 = vadd.f32 %v4085_v10, %v1145_v43  ;;  %v1209_v38 = vmul.f32 %v2548_v48, %v1115_v61  ;;  %v1168_v31 = vadd.f32 %v1160_v40, %v1143_v3  ;;  %v2573_v2 = vld [vmem:[%s5396_s6 + $0x628] sm:$0xff] }
 0x343   : > { %v4296_v53 = vadd.f32 %v3692_v51, %v1397_v34  ;;  %v1185_v39 = vmul.f32 %v2541_v13, %v4201_v26  ;;  %v4307_v15 = vmul.f32 %v2638_v22, %v3435_v54  ;;  %v1187_v51 = vmul.f32 %v2543_v19, %v3893_v63  ;;  %v2572_v54 = vld [vmem:[%s5396_s6 + $0x620] sm:$0xff]  ;;  %v5489_v59 = vld [vmem:[#allocation47_spill] sm:$0xff] }
 0x344   : > { %v1169_v14 = vadd.f32 %v1161_v36, %v1144_v12  ;;  %v1217_v32 = vadd.f32 %v1209_v38, %v1192_v60  ;;  %v1234_v10 = vmul.f32 %v2556_v28, %v1049_v52  ;;  %v1283_v46 = vmul.f32 %v2571_v56, %v1115_v61  ;;  %v2550_v52 = vld [vmem:[%s5396_s6 + $0x3f0] sm:$0xff]  ;;  %v5490_v34 = vld [vmem:[#allocation19_spill] sm:$0xff]  ;;  %v4360_v12 = vpop.permute.xlu0 %1567 }
 0x345   : > { %v1186_v24 = vmul.f32 %v2542_v47, %v3811_v5  ;;  %v1193_v9 = vadd.f32 %v1185_v39, %v1168_v31  ;;  %v1210_v42 = vmul.f32 %v2549_v7, %v1114_v16  ;;  %v1471_v6 = vadd.f32 %v3716_v1, %v1446_v50  ;;  %v5491_v60 = vld [vmem:[#allocation8_spill] sm:$0xff]  ;;  %v5492_v19 = vld [vmem:[#allocation3_spill] sm:$0xff] }
 0x346   : > { %v1195_v35 = vadd.f32 %v1187_v51, %v1170_v30  ;;  %v1242_v33 = vadd.f32 %v1234_v10, %v1217_v32  ;;  %v1259_v62 = vmul.f32 %v2564_v20, %v4201_v26  ;;  %v1291_v17 = vadd.f32 %v1283_v46, %v1266_v18  ;;  %v5493_v36 = vld [vmem:[#allocation20_spill] sm:$0xff]  ;;  %v2647_v18 = vld [vmem:[%s5396_s6 + $0x678] sm:$0xff]  ;;  %v5494_v7 = vld [vmem:[#allocation11_spill] sm:$0xff] }
 0x347   : > { %v1194_v55 = vadd.f32 %v1186_v24, %v1169_v14  ;;  %v1218_v49 = vadd.f32 %v1210_v42, %v1193_v9  ;;  %v1235_v1 = vmul.f32 %v2557_v0, %v4225_v23  ;;  %v1496_v25 = vadd.f32 %v3794_v21, %v1471_v6  ;;  %v2639_v21 = vld [vmem:[%s5396_s6 + $0x5b8] sm:$0xff]  ;;  %v2646_v23 = vld [vmem:[%s5396_s6 + $0x670] sm:$0xff]  ;;  %v5495_v30 = vld [vmem:[#allocation15_spill] sm:$0xff]  ;;  %v4381_v24 = vpop.permute.xlu1 %1565 }
 0x348   : > { %v1260_v61 = vmul.f32 %v2565_v41, %v3811_v5  ;;  %v1267_v58 = vadd.f32 %v1259_v62, %v1242_v33  ;;  %v1284_v48 = vmul.f32 %v2572_v54, %v1114_v16  ;;  %v1332_v26 = vadd.f32 %v3779_v8, %v1291_v17  ;;  %v2558_v5 = vld [vmem:[%s5396_s6 + $0x4b0] sm:$0xff]  ;;  %v2559_v8 = vld [vmem:[%s5396_s6 + $0x4b8] sm:$0xff]  ;;  %v5496_v20 = vld [vmem:[#allocation2_spill] sm:$0xff] }
 0x349   : > { %v1211_v4 = vmul.f32 %v2550_v52, %v4028_v27  ;;  %v1212_v43 = vmul.f32 %v2551_v29, %v5489_v59  ;;  %v1243_v37 = vadd.f32 %v1235_v1, %v1218_v49  ;;  %v1521_v13 = vadd.f32 %v5490_v34, %v1496_v25  ;;  %v5497_v14 = vld [vmem:[#allocation4_spill] sm:$0xff]  ;;  %v2567_v51 = vld [vmem:[%s5396_s6 + $0x578] sm:$0xff]  ;;  %v5498_v0 = vld [vmem:[#allocation46_spill] sm:$0xff] }
 0x34a   : > { %v1285_v16 = vmul.f32 %v2573_v2, %v4028_v27  ;;  %v1292_v40 = vadd.f32 %v1284_v48, %v1267_v58  ;;  %v1357_v22 = vadd.f32 %v5491_v60, %v1332_v26  ;;  %v4358_v50 = vmul.f32 %v2631_v44, %v5492_v19  ;;  %v5499_v10 = vld [vmem:[#allocation51_spill] sm:$0xff]  ;;  %v5500_v54 = vld [vmem:[#allocation21_spill] sm:$0xff]  ;;  %v2566_v42 = vld [vmem:[%s5396_s6 + $0x570] sm:$0xff] }
 0x34b   : > { %v1219_v28 = vadd.f32 %v1211_v4, %v1194_v55  ;;  %v1220_v56 = vadd.f32 %v1212_v43, %v1195_v35  ;;  %v1268_v3 = vadd.f32 %v1260_v61, %v1243_v37  ;;  %v4363_v47 = vadd.f32 %v5493_v36, %v1521_v13  ;;  %v2574_v6 = vld [vmem:[%s5396_s6 + $0x630] sm:$0xff]  ;;  %v2575_v52 = vld [vmem:[%s5396_s6 + $0x638] sm:$0xff]  ;;  %v2657_v55 = vld [vmem:[%s5396_s6 + $0x148] sm:$0xff] }
 0x34c   : > { %v1333_v27 = vadd.f32 %v5494_v7, %v1292_v40  ;;  %v1398_v38 = vadd.f32 %v5495_v30, %v1357_v22  ;;  %v4371_v31 = vmul.f32 %v2639_v21, %v5496_v20  ;;  %v4374_v39 = vmul.f32 %v2646_v23, %v5497_v14  ;;  %v5501_v29 = vld [vmem:[#allocation9_spill] sm:$0xff]  ;;  %v5504_v25 = vld [vmem:[#allocation12_spill] sm:$0xff]  ;;  %v5505_v61 = vld [vmem:[#allocation22_spill] sm:$0xff] }
 0x34d   : > { %v1236_v32 = vmul.f32 %v2558_v5, %v5498_v0  ;;  %v1237_v46 = vmul.f32 %v2559_v8, %v5499_v10  ;;  %v1293_v41 = vadd.f32 %v1285_v16, %v1268_v3  ;;  %v1520_v9 = vadd.f32 %v5500_v54, %v4254_v57  ;;  %v5502_v33 = vld [vmem:[#allocation13_spill] sm:$0xff]  ;;  %v5507_v43 = vld [vmem:[#allocation16_spill] sm:$0xff]  ;;  %v5509_v5 = vld [vmem:[#allocation58_spill] sm:$0xff] }
 0x34e   : > { %v1358_v35 = vadd.f32 %v5501_v29, %v1333_v27  ;;  %v1423_v62 = vadd.f32 %v5502_v33, %v1398_v38  ;;  %v1576_v17 = vrot.slane %v4360_v12, 7  ;;  %v5503_v2 = vld [vmem:[#allocation5_spill] sm:$0xff]  ;;  %v1569_v4 = vrot.slane %v4317_v11, 7  ;;  %v2680_v16 = vld [vmem:[%s5396_s6 + $0x380] sm:$0xff]  ;;  %v4438_v38 = vpop.permute.xlu1 %1555  ;;  %v2709_v33 = vld [vmem:[%s5396_s6 + $0x5e8] sm:$0xff] }
 0x34f   : > { %v4398_v57 = vmul.f32 %v2647_v18, %v5503_v2  ;;  %v1244_v49 = vadd.f32 %v1236_v32, %v1219_v28  ;;  %v1245_v1 = vadd.f32 %v1237_v46, %v1220_v56  ;;  %v1334_v44 = vadd.f32 %v5504_v25, %v1293_v41  ;;  %v5506_v48 = vld [vmem:[#allocation29_spill] sm:$0xff]  ;;  %v5510_v40 = vld [vmem:[#allocation10_spill] sm:$0xff]  ;;  %v5514_v32 = vld [vmem:[#allocation23_spill] sm:$0xff] }
 0x350   : > { %v1545_v58 = vadd.f32 %v5505_v61, %v1520_v9  ;;  %v1262_v26 = vmul.f32 %v2567_v51, %v5506_v48  ;;  %v1399_v37 = vadd.f32 %v5507_v43, %v1358_v35  ;;  %v5508_v34 = vld [vmem:[#allocation17_spill] sm:$0xff]  ;;  %v1261_v21 = vmul.f32 %v2566_v42, %v3893_v63  ;;  %v5511_v19 = vld [vmem:[#allocation14_spill] sm:$0xff]  ;;  %v2649_v63 = vld [vmem:[%s5396_s6 + $0x88] sm:$0xff] }
 0x351   : > { %v1448_v13 = vadd.f32 %v5508_v34, %v1423_v62  ;;  %v1286_v23 = vmul.f32 %v2574_v6, %v5489_v59  ;;  %v1287_v8 = vmul.f32 %v2575_v52, %v5509_v5  ;;  %v1359_v60 = vadd.f32 %v5510_v40, %v1334_v44  ;;  %v2656_v59 = vld [vmem:[%s5396_s6 + $0x140] sm:$0xff]  ;;  %v2687_v14 = vld [vmem:[%s5396_s6 + $0x3b8] sm:$0xff]  ;;  %v5517_v2 = vld [vmem:[#allocation24_spill] sm:$0xff] }
 0x352   : > { %v4417_v22 = vmul.f32 %v2657_v55, %v4317_v11  ;;  %v4420_v28 = vadd.f32 %v5511_v19, %v1399_v37  ;;  %v2672_v56 = vld [vmem:[%s5396_s6 + $0x2c0] sm:$0xff]  ;;  %v4433_v3 = vsel %vm1046_vm7, %v1576_v17, %v1569_v4  ;;  %v5420_v36 = vrot.slane %v4381_v24, 7  ;;  %v2663_v52 = vld [vmem:[%s5396_s6 + $0x178] sm:$0xff]  ;;  %v2694_v37 = vld [vmem:[%s5396_s6 + $0x470] sm:$0xff] }
 0x353   : > { %5512 = vst [vmem:[#allocation47_spill] sm:$0xff] %v4433_v3  ;;  %v1269_v7 = vadd.f32 %v1261_v21, %v1244_v49  ;;  %v1270_v27 = vadd.f32 %v1262_v26, %v1245_v1  ;;  %v5419_v30 = vrot.slane %v4381_v24, 1  ;;  %v4441_v20 = vmul.f32 %v2680_v16, %v4317_v11  ;;  %v5513_v51 = vld [vmem:[#allocation30_spill] sm:$0xff]  ;;  %v2679_v35 = vld [vmem:[%s5396_s6 + $0x2f8] sm:$0xff]  ;;  %v4508_v21 = vpop.permute.xlu0 %1557  ;;  %v5541_v18 = vld [vmem:[#allocation48_spill] sm:$0xff] }
 0x354   : > { %v1400_v0 = vadd.f32 %v5513_v51, %v1359_v60  ;;  %v1447_v10 = vadd.f32 %v5514_v32, %v4296_v53  ;;  %v5515_v46 = vld [vmem:[#allocation18_spill] sm:$0xff]  ;;  %v1595_v54 = vmul.f32 %v2649_v63, %v4433_v3  ;;  %v4452_v9 = vmul.f32 %v2656_v59, %v4360_v12  ;;  %v2686_v53 = vld [vmem:[%s5396_s6 + $0x3b0] sm:$0xff]  ;;  %v2671_v26 = vld [vmem:[%s5396_s6 + $0x238] sm:$0xff] }
 0x355   : > { %v1473_v41 = vadd.f32 %v5515_v46, %v1448_v13  ;;  %v5417_v42 = vrot.slane %v4360_v12, 1  ;;  %v4456_v6 = vmul.f32 %v2672_v56, %v4433_v3  ;;  %v2648_v29 = vld [vmem:[%s5396_s6 + $0x80] sm:$0xff]  ;;  %v4477_v62 = vsel %vm1046_vm7, %v5420_v36, %v1576_v17  ;;  %v2659_v13 = vld [vmem:[%s5396_s6 + $0x158] sm:$0xff]  ;;  %v2650_v59 = vld [vmem:[%s5396_s6 + $0x90] sm:$0xff] }
 0x356   : > { %5516 = vst [vmem:[#allocation19_spill] sm:$0xff] %v4477_v62  ;;  %v1472_v55 = vadd.f32 %v5517_v2, %v1447_v10  ;;  %v5518_v49 = vld [vmem:[#allocation26_spill] sm:$0xff]  ;;  %v1570_v25 = vrot.slane %v4438_v38, 7  ;;  %v1294_v44 = vadd.f32 %v1286_v23, %v1269_v7  ;;  %v1295_v61 = vadd.f32 %v1287_v8, %v1270_v27  ;;  %v5520_v23 = vld [vmem:[#allocation25_spill] sm:$0xff]  ;;  %v5521_v8 = vld [vmem:[#allocation28_spill] sm:$0xff] }
 0x357   : > { %v1498_v1 = vadd.f32 %v5518_v49, %v1473_v41  ;;  %v4483_v48 = vmul.f32 %v2687_v14, %v4360_v12  ;;  %v4494_v17 = vsel %vm1112_vm8, %v5419_v30, %v5417_v42  ;;  %v4497_v43 = vadd.f32 %v1595_v54, %v4363_v47  ;;  %v5523_v56 = vld [vmem:[#allocation27_spill] sm:$0xff]  ;;  %v5524_v27 = vld [vmem:[#allocation34_spill] sm:$0xff]  ;;  %v4543_v54 = vpop.permute.xlu1 %1559  ;;  %v2658_v49 = vld [vmem:[%s5396_s6 + $0x150] sm:$0xff] }
 0x358   : > { %5519 = vst [vmem:[#allocation8_spill] sm:$0xff] %v4494_v17  ;;  %v4503_v34 = vmul.f32 %v2663_v52, %v4381_v24  ;;  %v1497_v5 = vadd.f32 %v5520_v23, %v1472_v55  ;;  %v1594_v47 = vmul.f32 %v2648_v29, %v4477_v62  ;;  %v4514_v40 = vmul.f32 %v2679_v35, %v4477_v62  ;;  %v2682_v52 = vld [vmem:[%s5396_s6 + $0x390] sm:$0xff]  ;;  %v2705_v55 = vld [vmem:[%s5396_s6 + $0x5c8] sm:$0xff] }
 0x359   : > { %v1523_v16 = vadd.f32 %v5521_v8, %v1498_v1  ;;  %v4517_v60 = vmul.f32 %v2686_v53, %v4381_v24  ;;  %v4520_v19 = vmul.f32 %v2709_v33, %v4381_v24  ;;  %v4523_v63 = vmul.f32 %v2671_v26, %v4494_v17  ;;  %v5528_v33 = vld [vmem:[#allocation39_spill] sm:$0xff]  ;;  %v5531_v8 = vld [vmem:[#allocation32_spill] sm:$0xff] }
 0x35a   : > { %v1522_v7 = vadd.f32 %v5523_v56, %v1497_v5  ;;  %v4532_v51 = vsel %vm1046_vm7, %v1569_v4, %v1570_v25  ;;  %v4534_v32 = vadd.f32 %v1594_v47, %v1545_v58  ;;  %v4537_v10 = vmul.f32 %v2694_v37, %v4494_v17  ;;  %v5526_v4 = vld [vmem:[#allocation31_spill] sm:$0xff]  ;;  %v5527_v58 = vld [vmem:[#allocation38_spill] sm:$0xff]  ;;  %v5532_v47 = vld [vmem:[#allocation33_spill] sm:$0xff] }
 0x35b   : > { %5522 = vst [vmem:[#allocation3_spill] sm:$0xff] %v4520_v19  ;;  %v1548_v14 = vadd.f32 %v5524_v27, %v1523_v16  ;;  %v1571_v46 = vrot.slane %v4508_v21, 7  ;;  %v4541_v41 = vmul.f32 %v2659_v13, %v4508_v21  ;;  %v1637_v53 = vrot.slane %v4508_v21, 1  ;;  %v5529_v37 = vld [vmem:[#allocation42_spill] sm:$0xff]  ;;  %v5530_v23 = vld [vmem:[#allocation35_spill] sm:$0xff]  ;;  %v4579_v27 = vpop.permute.xlu0 %1561  ;;  %v4668_v19 = vpop.permute.xlu1 %1563 }
 0x35c   : > { %5525 = vst [vmem:[#allocation20_spill] sm:$0xff] %v4537_v10  ;;  %v1547_v29 = vadd.f32 %v5526_v4, %v1522_v7  ;;  %v1335_v35 = vadd.f32 %v5527_v58, %v1294_v44  ;;  %v1336_v2 = vadd.f32 %v5528_v33, %v1295_v61  ;;  %v1596_v1 = vmul.f32 %v2650_v59, %v4532_v51  ;;  %v2651_v44 = vld [vmem:[%s5396_s6 + $0x98] sm:$0xff]  ;;  %v5533_v4 = vld [vmem:[#allocation36_spill] sm:$0xff] }
 0x35d   : > { %v5418_v26 = vrot.slane %v4438_v38, 1  ;;  %v1425_v13 = vadd.f32 %v5529_v37, %v1400_v0  ;;  %v1449_v5 = vadd.f32 %v5530_v23, %v4420_v28  ;;  %v4568_v61 = vsel %vm1046_vm7, %v1570_v25, %v1571_v46  ;;  %v2681_v28 = vld [vmem:[%s5396_s6 + $0x388] sm:$0xff]  ;;  %v5534_v25 = vld [vmem:[#allocation37_spill] sm:$0xff]  ;;  %v5536_v37 = vld [vmem:[#allocation40_spill] sm:$0xff] }
 0x35e   : > { %v1360_v16 = vadd.f32 %v5531_v8, %v1335_v35  ;;  %v1361_v56 = vadd.f32 %v5532_v47, %v1336_v2  ;;  %v1572_v59 = vrot.slane %v4543_v54, 7  ;;  %v4574_v7 = vmul.f32 %v2682_v52, %v4508_v21  ;;  %v2666_v2 = vld [vmem:[%s5396_s6 + $0x210] sm:$0xff]  ;;  %v5537_v8 = vld [vmem:[#allocation41_spill] sm:$0xff] }
 0x35f   : > { %v1604_v0 = vadd.f32 %v1596_v1, %v1547_v29  ;;  %v1450_v58 = vadd.f32 %v5533_v4, %v1425_v13  ;;  %v1474_v33 = vadd.f32 %v5534_v25, %v1449_v5  ;;  %v4584_v35 = vmul.f32 %v2705_v55, %v4508_v21  ;;  %v2673_v29 = vld [vmem:[%s5396_s6 + $0x2c8] sm:$0xff]  ;;  %v2704_v1 = vld [vmem:[%s5396_s6 + $0x5c0] sm:$0xff]  ;;  %v5553_v10 = vld [vmem:[#allocation56_spill] sm:$0xff] }
 0x360   : > { %v1621_v52 = vmul.f32 %v2658_v49, %v4438_v38  ;;  %v1401_v23 = vadd.f32 %v5536_v37, %v1360_v16  ;;  %v1402_v47 = vadd.f32 %v5537_v8, %v1361_v56  ;;  %v1597_v21 = vmul.f32 %v2651_v44, %v4568_v61  ;;  %v2661_v49 = vld [vmem:[%s5396_s6 + $0x168] sm:$0xff]  ;;  %v5539_v16 = vld [vmem:[#allocation44_spill] sm:$0xff]  ;;  %v2652_v44 = vld [vmem:[%s5396_s6 + $0xa0] sm:$0xff] }
 0x361   : > { %5535 = vst [vmem:[#allocation11_spill] sm:$0xff] %v4584_v35  ;;  %v4603_v55 = vsel %vm1112_vm8, %v5418_v26, %v1637_v53  ;;  %v5538_v13 = vld [vmem:[#allocation43_spill] sm:$0xff]  ;;  %v1499_v56 = vadd.f32 %v5539_v16, %v1474_v33  ;;  %v4611_v4 = vmul.f32 %v2681_v28, %v4438_v38  ;;  %v4619_v37 = vsel %vm1046_vm7, %v1571_v46, %v1572_v59  ;;  %v2660_v28 = vld [vmem:[%s5396_s6 + $0x160] sm:$0xff]  ;;  %v5540_v16 = vld [vmem:[#allocation45_spill] sm:$0xff] }
 0x362   : > { %v1475_v5 = vadd.f32 %v5538_v13, %v1450_v58  ;;  %v1638_v8 = vrot.slane %v4543_v54, 1  ;;  %v2674_v58 = vld [vmem:[%s5396_s6 + $0x2d0] sm:$0xff]  ;;  %v1605_v33 = vadd.f32 %v1597_v21, %v1548_v14  ;;  %v1629_v13 = vadd.f32 %v1621_v52, %v1604_v0  ;;  %v2653_v14 = vld [vmem:[%s5396_s6 + $0xa8] sm:$0xff]  ;;  %v5543_v0 = vld [vmem:[#allocation49_spill] sm:$0xff] }
 0x363   : > { %v1524_v26 = vadd.f32 %v5541_v18, %v1499_v56  ;;  %v1662_v30 = vmul.f32 %v2666_v2, %v4603_v55  ;;  %v4632_v46 = vmul.f32 %v2673_v29, %v4532_v51  ;;  %v4635_v36 = vmul.f32 %v2704_v1, %v4438_v38  ;;  %v5544_v21 = vld [vmem:[#allocation50_spill] sm:$0xff]  ;;  %v2689_v1 = vld [vmem:[%s5396_s6 + $0x448] sm:$0xff]  ;;  %v2667_v56 = vld [vmem:[%s5396_s6 + $0x218] sm:$0xff] }
 0x364   : > { %v1500_v42 = vadd.f32 %v5540_v16, %v1475_v5  ;;  %v1624_v25 = vmul.f32 %v2661_v49, %v4579_v27  ;;  %v5545_v18 = vrot.slane %v4579_v27, 7  ;;  %v1598_v29 = vmul.f32 %v2652_v44, %v4619_v37  ;;  %v2696_v49 = vld [vmem:[%s5396_s6 + $0x500] sm:$0xff] }
 0x365   : > { %5542 = vst [vmem:[#allocation15_spill] sm:$0xff] %v4635_v36  ;;  %v1549_v5 = vadd.f32 %v5544_v21, %v1524_v26  ;;  %v1639_v26 = vrot.slane %v4579_v27, 1  ;;  %v4664_v44 = vsel %vm1112_vm8, %v1637_v53, %v1638_v8  ;;  %v1670_v16 = vadd.f32 %v1662_v30, %v1629_v13  ;;  %v5547_v53 = vld [vmem:[#allocation53_spill] sm:$0xff] }
 0x366   : > { %v1525_v52 = vadd.f32 %v5543_v0, %v1500_v42  ;;  %v4647_v2 = vsel %vm1046_vm7, %v1572_v59, %v5545_v18  ;;  %v1687_v42 = vmul.f32 %v2674_v58, %v4568_v61  ;;  %v1623_v59 = vmul.f32 %v2660_v28, %v4543_v54  ;;  %v5546_v0 = vld [vmem:[#allocation52_spill] sm:$0xff]  ;;  %v2697_v58 = vld [vmem:[%s5396_s6 + $0x508] sm:$0xff]  ;;  %v2668_v28 = vld [vmem:[%s5396_s6 + $0x220] sm:$0xff] }
 0x367   : > { %v1606_v18 = vadd.f32 %v1598_v29, %v1549_v5  ;;  %v1630_v17 = vadd.f32 %v4541_v41, %v1605_v33  ;;  %v1599_v3 = vmul.f32 %v2653_v14, %v4647_v2  ;;  %v4679_v30 = vsel %vm1112_vm8, %v1638_v8, %v1639_v26  ;;  %v2684_v29 = vld [vmem:[%s5396_s6 + $0x3a0] sm:$0xff]  ;;  %v2675_v14 = vld [vmem:[%s5396_s6 + $0x2d8] sm:$0xff] }
 0x368   : > { %v1550_v21 = vadd.f32 %v5546_v0, %v1525_v52  ;;  %v1426_v13 = vadd.f32 %v5547_v53, %v1401_v23  ;;  %v5548_v52 = vld [vmem:[#allocation6_spill] sm:$0xff]  ;;  %v4684_v33 = vmul.f32 %v2689_v1, %v4603_v55  ;;  %v4687_v5 = vmul.f32 %v2696_v49, %v4532_v51  ;;  %v2683_v51 = vld [vmem:[%s5396_s6 + $0x398] sm:$0xff]  ;;  %v5552_v53 = vld [vmem:[#allocation55_spill] sm:$0xff] }
 0x369   : > { %v1427_v41 = vadd.f32 %v5548_v52, %v1402_v47  ;;  %v1631_v8 = vadd.f32 %v1623_v59, %v1606_v18  ;;  %v1663_v0 = vmul.f32 %v2667_v56, %v4664_v44  ;;  %v2676_v23 = vld [vmem:[%s5396_s6 + $0x2e0] sm:$0xff]  ;;  %v1574_v35 = vrot.slane %v4668_v19, 7 }
 0x36a   : > { %5549 = vst [vmem:[#allocation2_spill] sm:$0xff] %v4684_v33  ;;  %5550 = vst [vmem:[#allocation4_spill] sm:$0xff] %v4687_v5  ;;  %v1607_v47 = vadd.f32 %v1599_v3, %v1550_v21  ;;  %v5551_v1 = vld [vmem:[#allocation54_spill] sm:$0xff]  ;;  %v1695_v36 = vadd.f32 %v1687_v42, %v1670_v16  ;;  %v4706_v59 = vmul.f32 %v2697_v58, %v4568_v61  ;;  %v5554_v3 = vld [vmem:[#allocation7_spill] sm:$0xff]  ;;  %v1640_v16 = vrot.slane %v4668_v19, 1 }
 0x36b   : > { %v1451_v49 = vadd.f32 %v5551_v1, %v1426_v13  ;;  %v1452_v52 = vadd.f32 %v5552_v53, %v1427_v41  ;;  %v1664_v56 = vmul.f32 %v2668_v28, %v4679_v30  ;;  %v1671_v18 = vadd.f32 %v1663_v0, %v1630_v17  ;;  %v2690_v13 = vld [vmem:[%s5396_s6 + $0x450] sm:$0xff]  ;;  %v2669_v17 = vld [vmem:[%s5396_s6 + $0x228] sm:$0xff]  ;;  %v5555_v28 = vld [vmem:[#allocation57_spill] sm:$0xff] }
 0x36c   : > { %v1714_v62 = vmul.f32 %v2684_v29, %v4579_v27  ;;  %v1688_v5 = vmul.f32 %v2675_v14, %v4619_v37  ;;  %v1689_v42 = vmul.f32 %v2676_v23, %v4647_v2  ;;  %v1713_v61 = vmul.f32 %v2683_v51, %v4543_v54  ;;  %v2654_v58 = vld [vmem:[%s5396_s6 + $0xb0] sm:$0xff] }
 0x36d   : > { %v1476_v33 = vadd.f32 %v5553_v10, %v1451_v49  ;;  %v1477_v21 = vadd.f32 %v5554_v3, %v1452_v52  ;;  %v1672_v41 = vadd.f32 %v1664_v56, %v1631_v8  ;;  %v2691_v10 = vld [vmem:[%s5396_s6 + $0x458] sm:$0xff]  ;;  %v5556_v8 = vrot.slane %v4579_v27, 7  ;;  %v2670_v56 = vld [vmem:[%s5396_s6 + $0x230] sm:$0xff] }
 0x36e   : > { %v1632_v23 = vadd.f32 %v1624_v25, %v1607_v47  ;;  %v1696_v51 = vadd.f32 %v1688_v5, %v1671_v18  ;;  %v1720_v1 = vadd.f32 %v4574_v7, %v1695_v36  ;;  %v2655_v49 = vld [vmem:[%s5396_s6 + $0xb8] sm:$0xff]  ;;  %v5557_v53 = vrot.slane %v4381_v24, 7  ;;  %v2662_v36 = vld [vmem:[%s5396_s6 + $0x170] sm:$0xff]  ;;  %v2677_v7 = vld [vmem:[%s5396_s6 + $0x2e8] sm:$0xff] }
 0x36f   : > { %v1501_v29 = vadd.f32 %v5555_v28, %v1476_v33  ;;  %v1502_v14 = vadd.f32 %v4358_v50, %v1477_v21  ;;  %v4734_v0 = vsel %vm1046_vm7, %v5556_v8, %v1574_v35  ;;  %v4748_v50 = vsel %vm1112_vm8, %v1639_v26, %v1640_v16  ;;  %v2665_v8 = vld [vmem:[%s5396_s6 + $0x208] sm:$0xff] }
 0x370   : > { %v4744_v33 = vsel %vm1046_vm7, %v1574_v35, %v5557_v53  ;;  %v1737_v52 = vmul.f32 %v2690_v13, %v4664_v44  ;;  %v1665_v35 = vmul.f32 %v2669_v17, %v4748_v50  ;;  %v1697_v47 = vadd.f32 %v1689_v42, %v1672_v41  ;;  %v2698_v42 = vld [vmem:[%s5396_s6 + $0x510] sm:$0xff] }
 0x371   : > { %v1526_v25 = vadd.f32 %v4307_v15, %v1501_v29  ;;  %v1527_v5 = vadd.f32 %v4371_v31, %v1502_v14  ;;  %v1738_v26 = vmul.f32 %v2691_v10, %v4679_v30  ;;  %v1600_v18 = vmul.f32 %v2654_v58, %v4734_v0 }
 0x372   : > { %v5558_v3 = vrot.slane %v4381_v24, 1  ;;  %v1601_v13 = vmul.f32 %v2655_v49, %v4744_v33  ;;  %v1673_v41 = vadd.f32 %v1665_v35, %v1632_v23  ;;  %v1721_v17 = vadd.f32 %v1713_v61, %v1696_v51  ;;  %v2692_v23 = vld [vmem:[%s5396_s6 + $0x460] sm:$0xff] }
 0x373   : > { %v1551_v15 = vadd.f32 %v4374_v39, %v1526_v25  ;;  %v1552_v31 = vadd.f32 %v4398_v57, %v1527_v5  ;;  %v1745_v10 = vadd.f32 %v1737_v52, %v1720_v1  ;;  %v1625_v58 = vmul.f32 %v2662_v36, %v4668_v19  ;;  %v2678_v39 = vld [vmem:[%s5396_s6 + $0x2f0] sm:$0xff]  ;;  %v2685_v57 = vld [vmem:[%s5396_s6 + $0x3a8] sm:$0xff] }
 0x374   : > { %v4769_v21 = vsel %vm1112_vm8, %v1640_v16, %v5558_v3  ;;  %v1690_v24 = vmul.f32 %v2677_v7, %v4734_v0  ;;  %v2664_v16 = vld [vmem:[%s5396_s6 + $0x200] sm:$0xff]  ;;  %v1627_v14 = vadd.f32 %v4452_v9, %v4534_v32  ;;  %v1628_v1 = vadd.f32 %v4417_v22, %v4497_v43  ;;  %v2706_v3 = vld [vmem:[%s5396_s6 + $0x5d0] sm:$0xff] }
 0x375   : > { %v1608_v28 = vadd.f32 %v1600_v18, %v1551_v15  ;;  %v1609_v29 = vadd.f32 %v1601_v13, %v1552_v31  ;;  %v1666_v61 = vmul.f32 %v2670_v56, %v4769_v21  ;;  %v5559_v49 = vrot.slane %v4438_v38, 1  ;;  %v2699_v18 = vld [vmem:[%s5396_s6 + $0x518] sm:$0xff] }
 0x376   : > { %v1698_v51 = vadd.f32 %v1690_v24, %v1673_v41  ;;  %v5560_v53 = vrot.slane %v4317_v11, 1  ;;  %v5562_v32 = vrot.slane %v4360_v12, 1  ;;  %v1722_v22 = vadd.f32 %v1714_v62, %v1697_v47  ;;  %v2693_v62 = vld [vmem:[%s5396_s6 + $0x468] sm:$0xff]  ;;  %v2700_v41 = vld [vmem:[%s5396_s6 + $0x520] sm:$0xff] }
 0x377   : > { %v1633_v7 = vadd.f32 %v1625_v58, %v1608_v28  ;;  %v1634_v25 = vadd.f32 %v4503_v34, %v1609_v29  ;;  %v1762_v43 = vmul.f32 %v2698_v42, %v4619_v37  ;;  %v1691_v5 = vmul.f32 %v2678_v39, %v4744_v33  ;;  %v2688_v24 = vld [vmem:[%s5396_s6 + $0x440] sm:$0xff] }
 0x378   : > { %v4805_v52 = vsel %vm1112_vm8, %v5560_v53, %v5559_v49  ;;  %v5561_v9 = vmov %v5560_v53  ;;  %v1715_v35 = vmul.f32 %v2685_v57, %v4668_v19  ;;  %v1739_v37 = vmul.f32 %v2692_v23, %v4748_v50 }
 0x379   : > { %v4813_v36 = vsel %vm1112_vm8, %v5562_v32, %v5561_v9  ;;  %v1661_v56 = vmul.f32 %v2665_v8, %v4805_v52  ;;  %v1674_v34 = vadd.f32 %v1666_v61, %v1633_v7  ;;  %v1675_v15 = vadd.f32 %v4523_v63, %v1634_v25  ;;  %v2707_v61 = vld [vmem:[%s5396_s6 + $0x5d8] sm:$0xff]  ;;  %v2702_v9 = vld [vmem:[%s5396_s6 + $0x530] sm:$0xff]  ;;  %v5563_v25 = vld [vmem:[#allocation2_spill] sm:$0xff] }
 0x37a   : > { %v1660_v38 = vmul.f32 %v2664_v16, %v4813_v36  ;;  %v1746_v31 = vadd.f32 %v1738_v26, %v1721_v17  ;;  %v1770_v13 = vadd.f32 %v1762_v43, %v1745_v10  ;;  %v1723_v42 = vadd.f32 %v1715_v35, %v1698_v51  ;;  %v2712_v16 = vld [vmem:[%s5396_s6 + $0x680] sm:$0xff]  ;;  %v2713_v43 = vld [vmem:[%s5396_s6 + $0x688] sm:$0xff] }
 0x37b   : > { %v1669_v58 = vadd.f32 %v1661_v56, %v1628_v1  ;;  %v1699_v39 = vadd.f32 %v1691_v5, %v1674_v34  ;;  %v1747_v57 = vadd.f32 %v1739_v37, %v1722_v22  ;;  %v1700_v26 = vadd.f32 %v4514_v40, %v1675_v15  ;;  %v2708_v51 = vld [vmem:[%s5396_s6 + $0x5e0] sm:$0xff]  ;;  %v5565_v56 = vld [vmem:[#allocation4_spill] sm:$0xff] }
 0x37c   : > { %v1668_v47 = vadd.f32 %v1660_v38, %v1627_v14  ;;  %v1763_v17 = vmul.f32 %v2699_v18, %v4647_v2  ;;  %v1787_v10 = vmul.f32 %v2706_v3, %v4543_v54  ;;  %v1740_v28 = vmul.f32 %v2693_v62, %v4769_v21  ;;  %v2701_v14 = vld [vmem:[%s5396_s6 + $0x528] sm:$0xff]  ;;  %v2703_v18 = vld [vmem:[%s5396_s6 + $0x538] sm:$0xff] }
 0x37d   : > { %v1694_v29 = vadd.f32 %v4632_v46, %v1669_v58  ;;  %v1724_v2 = vadd.f32 %v4517_v60, %v1699_v39  ;;  %v1735_v54 = vmul.f32 %v2688_v24, %v4805_v52  ;;  %v1810_v8 = vmul.f32 %v2712_v16, %v4603_v55  ;;  %v2714_v46 = vld [vmem:[%s5396_s6 + $0x690] sm:$0xff]  ;;  %v5566_v3 = vld [vmem:[#allocation19_spill] sm:$0xff] }
 0x37e   : > { %v1693_v63 = vadd.f32 %v4456_v6, %v1668_v47  ;;  %v1764_v6 = vmul.f32 %v2700_v41, %v4734_v0  ;;  %v1771_v23 = vadd.f32 %v1763_v17, %v1746_v31  ;;  %v1748_v1 = vadd.f32 %v1740_v28, %v1723_v42  ;;  %v2716_v47 = vld [vmem:[%s5396_s6 + $0x6a0] sm:$0xff]  ;;  %v5567_v41 = vld [vmem:[#allocation15_spill] sm:$0xff]  ;;  %v2711_v28 = vld [vmem:[%s5396_s6 + $0x5f8] sm:$0xff] }
 0x37f   : > { %v1719_v0 = vadd.f32 %v4611_v4, %v1694_v29  ;;  %v1795_v60 = vadd.f32 %v1787_v10, %v1770_v13  ;;  %v1725_v55 = vadd.f32 %v4483_v48, %v1700_v26  ;;  %v1788_v32 = vmul.f32 %v2707_v61, %v4579_v27  ;;  %v5564_v4 = vld [vmem:[#allocation20_spill] sm:$0xff]  ;;  %v2715_v48 = vld [vmem:[%s5396_s6 + $0x698] sm:$0xff]  ;;  %v5568_v16 = vld [vmem:[#allocation11_spill] sm:$0xff] }
 0x380   : > { %v1718_v40 = vadd.f32 %v4441_v20, %v1693_v63  ;;  %v2695_v20 = vld [vmem:[%s5396_s6 + $0x478] sm:$0xff]  ;;  %v1772_v49 = vadd.f32 %v1764_v6, %v1747_v57  ;;  %v1765_v7 = vmul.f32 %v2701_v14, %v4744_v33  ;;  %v1749_v38 = vadd.f32 %v5564_v4, %v1724_v2  ;;  %v2717_v57 = vld [vmem:[%s5396_s6 + $0x6a8] sm:$0xff]  ;;  %v2718_v61 = vld [vmem:[%s5396_s6 + $0x6b0] sm:$0xff] }
 0x381   : > { %v1744_v22 = vadd.f32 %v5563_v25, %v1719_v0  ;;  %v1812_v5 = vmul.f32 %v2714_v46, %v4679_v30  ;;  %v1789_v35 = vmul.f32 %v2708_v51, %v4668_v19  ;;  %v1742_v27 = vmul.f32 %v2695_v20, %v4813_v36  ;;  %v2710_v19 = vld [vmem:[%s5396_s6 + $0x5f0] sm:$0xff]  ;;  %v5569_v63 = vld [vmem:[#allocation47_spill] sm:$0xff] }
 0x382   : > { %v1743_v53 = vadd.f32 %v1735_v54, %v1718_v40  ;;  %v1766_v62 = vmul.f32 %v2702_v9, %v5566_v3  ;;  %v1773_v37 = vadd.f32 %v1765_v7, %v1748_v1  ;;  %v1796_v30 = vadd.f32 %v1788_v32, %v1771_v23 }
 0x383   : > { %v1769_v34 = vadd.f32 %v4706_v59, %v1744_v22  ;;  %v4897_v15 = vadd.f32 %v1812_v5, %v1795_v60  ;;  %v1797_v31 = vadd.f32 %v1789_v35, %v1772_v49  ;;  %v1750_v13 = vadd.f32 %v1742_v27, %v1725_v55 }
 0x384   : > { %v1768_v33 = vadd.f32 %v5565_v56, %v1743_v53  ;;  %v1811_v58 = vmul.f32 %v2713_v43, %v4664_v44  ;;  %v1813_v59 = vmul.f32 %v2715_v48, %v4748_v50  ;;  %v1774_v24 = vadd.f32 %v1766_v62, %v1749_v38  ;;  %v5570_v50 = vld [vmem:[#allocation3_spill] sm:$0xff]  ;;  %v2719_v53 = vld [vmem:[%s5396_s6 + $0x6b8] sm:$0xff] }
 0x385   : > { %v1794_v39 = vadd.f32 %v5568_v16, %v1769_v34  ;;  %v1767_v26 = vmul.f32 %v2703_v18, %v5569_v63  ;;  %v1814_v17 = vmul.f32 %v2716_v47, %v4769_v21  ;;  %v1791_v44 = vmul.f32 %v2710_v19, %v4360_v12  ;;  %v5571_v21 = vld [vmem:[#allocation8_spill] sm:$0xff] }
 0x386   : > { %v1793_v42 = vadd.f32 %v5567_v41, %v1768_v33  ;;  %v1798_v29 = vadd.f32 %v5570_v50, %v1773_v37  ;;  %v4920_v6 = vadd.f32 %v1813_v59, %v1796_v30  ;;  %v1815_v2 = vmul.f32 %v2717_v57, %v5571_v21  ;;  %v1826_v21 = vld [vmem:[%s5397_s7] sm:$0xff] }
 0x387   : > { %v4918_v14 = vadd.f32 %v1811_v58, %v1794_v39  ;;  %v1775_v40 = vadd.f32 %v1767_v26, %v1750_v13  ;;  %v4923_v54 = vadd.f32 %v1814_v17, %v1797_v31  ;;  %v1799_v46 = vadd.f32 %v1791_v44, %v1774_v24 }
 0x388   : > { %v4908_v10 = vadd.f32 %v1810_v8, %v1793_v42  ;;  %v1859_v8 = vmul.f32 %v4897_v15, %v4897_v15  ;;  %v1792_v1 = vmul.f32 %v2711_v28, %v4317_v11  ;;  %v1816_v0 = vmul.f32 %v2718_v61, %v4813_v36 }
 0x389   : > { %v1858_v51 = vmul.f32 %v4918_v14, %v4918_v14  ;;  %v4935_v20 = vadd.f32 %v1815_v2, %v1798_v29  ;;  %v1860_v49 = vmul.f32 %v4920_v6, %v4920_v6  ;;  %v1861_v9 = vmul.f32 %v4923_v54, %v4923_v54  ;;  %v1827_v2 = vld [vmem:[%s5397_s7 + $0x8] sm:$0xff] }
 0x38a   : > { %v1842_v12 = vadd.f32 %v4918_v14, %v4908_v10  ;;  %v1857_v23 = vmul.f32 %v4908_v10, %v4908_v10  ;;  %v1800_v32 = vadd.f32 %v1792_v1, %v1775_v40  ;;  %v4945_v7 = vadd.f32 %v1816_v0, %v1799_v46  ;;  %v1831_v0 = vld [vmem:[%s5397_s7 + $0x28] sm:$0xff] }
 0x38b   : > { %v1817_v25 = vmul.f32 %v2719_v53, %v4805_v52  ;;  %v1862_v4 = vmul.f32 %v4935_v20, %v4935_v20 }
 0x38c   : > { %v1843_v60 = vadd.f32 %v1842_v12, %v4897_v15  ;;  %v1865_v55 = vadd.f32 %v1858_v51, %v1857_v23  ;;  %v1863_v48 = vmul.f32 %v4945_v7, %v4945_v7  ;;  %v1830_v12 = vld [vmem:[%s5397_s7 + $0x20] sm:$0xff] }
 0x38d   : > { %v1825_v43 = vadd.f32 %v1817_v25, %v1800_v32 }
 0x38e   : > { %v1844_v11 = vadd.f32 %v1843_v60, %v4920_v6  ;;  %v1866_v36 = vadd.f32 %v1865_v55, %v1859_v8  ;;  %v1833_v60 = vld [vmem:[%s5397_s7 + $0x38] sm:$0xff] }
 0x38f   : > { %v1864_v18 = vmul.f32 %v1825_v43, %v1825_v43 }
 0x390   : > { %v1845_v22 = vadd.f32 %v1844_v11, %v4923_v54  ;;  %v1867_v38 = vadd.f32 %v1866_v36, %v1860_v49  ;;  %v1834_v11 = vld [vmem:[%s5398_s8] sm:$0xff]  ;;  %v1835_v36 = vld [vmem:[%s5398_s8 + $0x8] sm:$0xff] }
 0x392   : > { %v1846_v5 = vadd.f32 %v1845_v22, %v4935_v20  ;;  %v1868_v35 = vadd.f32 %v1867_v38, %v1861_v9  ;;  %v1836_v38 = vld [vmem:[%s5398_s8 + $0x10] sm:$0xff] }
 0x394   : > { %v1847_v27 = vadd.f32 %v1846_v5, %v4945_v7  ;;  %v1869_v56 = vadd.f32 %v1868_v35, %v1862_v4  ;;  %v1838_v5 = vld [vmem:[%s5398_s8 + $0x20] sm:$0xff] }
 0x396   : > { %v1848_v33 = vadd.f32 %v1847_v27, %v1825_v43  ;;  %v1870_v3 = vadd.f32 %v1869_v56, %v1863_v48  ;;  %v1839_v56 = vld [vmem:[%s5398_s8 + $0x28] sm:$0xff] }
 0x398   : > { %1849 = vadd.xlane.f32.xlu0 %v1848_v33  ;;  %v1871_v52 = vadd.f32 %v1870_v3, %v1864_v18  ;;  %v1840_v33 = vld [vmem:[%s5398_s8 + $0x30] sm:$0xff]  ;;  %v1841_v18 = vld [vmem:[%s5398_s8 + $0x38] sm:$0xff] }
 0x39a   : > { %1872 = vadd.xlane.f32.xlu1 %v1871_v52 }
 0x425   : > { %v1850_v62 = vpop.xlane.xlu0 %1849 }
 0x426   : > { %v1851_v34 = vrot.slane %v1850_v62, 4 }
 0x427   : > { %v1873_v37 = vpop.xlane.xlu1 %1872 }
 0x428   : > { %v1852_v30 = vadd.f32 %v1851_v34, %v1850_v62  ;;  %v1874_v47 = vrot.slane %v1873_v37, 4 }
 0x42a   : > { %v1853_v19 = vrot.slane %v1852_v30, 2  ;;  %v1875_v31 = vadd.f32 %v1874_v47, %v1873_v37 }
 0x42c   : > { %v1854_v13 = vadd.f32 %v1853_v19, %v1852_v30  ;;  %v1876_v41 = vrot.slane %v1875_v31, 2 }
 0x42e   : > { %v1855_v42 = vrot.slane %v1854_v13, 1  ;;  %v1877_v58 = vadd.f32 %v1876_v41, %v1875_v31 }
 0x430   : > { %v1856_v59 = vadd.f32 %v1855_v42, %v1854_v13  ;;  %v1878_v24 = vrot.slane %v1877_v58, 1 }
 0x432   : > { %v1880_v16 = vmul.f32 0.00012207031, %v1856_v59  ;;  %v1879_v39 = vadd.f32 %v1878_v24, %v1877_v58 }
 0x434   : > { %v1881_v57 = vmul.f32 0.00012207031, %v1879_v39  ;;  %v1882_v63 = vmul.f32 %v1880_v16, %v1880_v16  ;;  %v1885_v44 = vsub.f32 %v4908_v10, %v1880_v16  ;;  %v1886_v50 = vsub.f32 %v4918_v14, %v1880_v16 }
 0x435   : > { %v1887_v29 = vsub.f32 %v4897_v15, %v1880_v16  ;;  %v1888_v61 = vsub.f32 %v4920_v6, %v1880_v16  ;;  %v1889_v8 = vsub.f32 %v4923_v54, %v1880_v16  ;;  %v1890_v46 = vsub.f32 %v4935_v20, %v1880_v16  ;;  %v1828_v15 = vld [vmem:[%s5397_s7 + $0x10] sm:$0xff]  ;;  %v1829_v6 = vld [vmem:[%s5397_s7 + $0x18] sm:$0xff] }
 0x436   : > { %v1883_v26 = vsub.f32 %v1881_v57, %v1882_v63  ;;  %v1891_v10 = vsub.f32 %v4945_v7, %v1880_v16  ;;  %v1892_v14 = vsub.f32 %v1825_v43, %v1880_v16  ;;  %v1832_v20 = vld [vmem:[%s5397_s7 + $0x30] sm:$0xff]  ;;  %v1837_v43 = vld [vmem:[%s5398_s8 + $0x18] sm:$0xff] }
 0x438   : > { %v1884_v17 = vmax.f32 %v1883_v26, 0.0 }
 0x43a   : > { %v1893_v28 = vadd.f32 1e-05, %v1884_v17 }
 0x43c   : > { %2928 = vrsqrt.f32 %v1893_v28 }
 0x446   : > { %v2929_v40 = vpop.eup %2928 }
 0x447   : > { %v1895_v23 = vmul.f32 %v2929_v40, %v1885_v44  ;;  %v1896_v51 = vmul.f32 %v2929_v40, %v1886_v50  ;;  %v1897_v54 = vmul.f32 %v2929_v40, %v1887_v29  ;;  %v1898_v1 = vmul.f32 %v2929_v40, %v1888_v61 }
 0x448   : > { %v1899_v49 = vmul.f32 %v2929_v40, %v1889_v8  ;;  %v1900_v55 = vmul.f32 %v2929_v40, %v1890_v46  ;;  %v1901_v53 = vmul.f32 %v2929_v40, %v1891_v10  ;;  %v1902_v9 = vmul.f32 %v2929_v40, %v1892_v14 }
 0x449   : > { %v1903_v32 = vmul.f32 %v1895_v23, %v1826_v21  ;;  %v1904_v7 = vmul.f32 %v1896_v51, %v1827_v2  ;;  %v1905_v25 = vmul.f32 %v1897_v54, %v1828_v15  ;;  %v1906_v22 = vmul.f32 %v1898_v1, %v1829_v6 }
 0x44a   : > { %v1907_v4 = vmul.f32 %v1899_v49, %v1830_v12  ;;  %v1908_v48 = vmul.f32 %v1900_v55, %v1831_v0  ;;  %v1909_v35 = vmul.f32 %v1901_v53, %v1832_v20  ;;  %v1910_v27 = vmul.f32 %v1902_v9, %v1833_v60 }
 0x44b   : > { %v1911_v3 = vadd.f32 %v1903_v32, %v1834_v11  ;;  %v1912_v52 = vadd.f32 %v1904_v7, %v1835_v36  ;;  %v1913_v62 = vadd.f32 %v1905_v25, %v1836_v38  ;;  %v5011_v34 = vadd.f32 %v1906_v22, %v1837_v43 }
 0x44c   : > { %v5013_v37 = vadd.f32 %v1907_v4, %v1838_v5  ;;  %v5015_v30 = vadd.f32 %v1908_v48, %v1839_v56  ;;  %v5017_v47 = vadd.f32 %v1909_v35, %v1840_v33  ;;  %v5019_v19 = vadd.f32 %v1910_v27, %v1841_v18 }
 0x44d   : > { %v5021_v31 = vmul.f32 0.70710677, %v1911_v3  ;;  %v5023_v13 = vmul.f32 0.70710677, %v1912_v52  ;;  %v5025_v41 = vmul.f32 0.70710677, %v1913_v62 }
 0x44e   : > { %v5028_v42 = vmul.f32 0.70710677, %v5011_v34  ;;  %v5031_v58 = vmul.f32 0.70710677, %v5013_v37  ;;  %v5034_v59 = vmul.f32 0.70710677, %v5015_v30 }
 0x44f   : > { %v5037_v24 = vmul.f32 0.70710677, %v5017_v47  ;;  %v5040_v16 = vmul.f32 0.70710677, %v5019_v19  ;;  %v5042_v39 = vmul.f32 0.5, %v1911_v3  ;;  %v5052_v12 = vmul.f32 0.5, %v1912_v52 }
 0x450   : > { %v1951_v57 = vand.u32 2147483647, %v5021_v31  ;;  %v1952_v63 = vand.u32 2147483647, %v5023_v13  ;;  %v1953_v26 = vand.u32 2147483647, %v5025_v41 }
 0x451   : > { %v1954_v17 = vand.u32 2147483647, %v5028_v42  ;;  %v1955_v28 = vand.u32 2147483647, %v5031_v58  ;;  %v1956_v44 = vand.u32 2147483647, %v5034_v59 }
 0x452   : > { %v1957_v50 = vand.u32 2147483647, %v5037_v24  ;;  %v1958_v29 = vand.u32 2147483647, %v5040_v16  ;;  %v1959_v61 = vmul.f32 0.3275911, %v1951_v57 }
 0x453   : > { %v1960_v40 = vmul.f32 0.3275911, %v1952_v63  ;;  %v1961_v21 = vmul.f32 0.3275911, %v1953_v26  ;;  %v1962_v2 = vmul.f32 0.3275911, %v1954_v17 }
 0x454   : > { %v1963_v8 = vmul.f32 0.3275911, %v1955_v28  ;;  %v1964_v46 = vmul.f32 0.3275911, %v1956_v44  ;;  %v1965_v10 = vmul.f32 0.3275911, %v1957_v50 }
 0x455   : > { %v1966_v14 = vmul.f32 0.3275911, %v1958_v29  ;;  %v1967_v15 = vadd.f32 1.0, %v1959_v61  ;;  %v1968_v6 = vadd.f32 1.0, %v1960_v40  ;;  %v1969_v23 = vadd.f32 1.0, %v1961_v21 }
 0x456   : > { %v1970_v51 = vadd.f32 1.0, %v1962_v2  ;;  %v1971_v54 = vadd.f32 1.0, %v1963_v8  ;;  %v1972_v1 = vadd.f32 1.0, %v1964_v46  ;;  %v1973_v0 = vadd.f32 1.0, %v1965_v10 }
 0x457   : > { %2930 = vrcp.f32 %v1967_v15  ;;  %v2055_v20 = vsub.f32 0.0, %v1951_v57  ;;  %v2056_v60 = vsub.f32 0.0, %v1952_v63  ;;  %v2057_v49 = vsub.f32 0.0, %v1953_v26 }
 0x458   : > { %2932 = vrcp.f32 %v1968_v6  ;;  %v2058_v55 = vsub.f32 0.0, %v1954_v17  ;;  %v1974_v53 = vadd.f32 1.0, %v1966_v14  ;;  %v2059_v9 = vsub.f32 0.0, %v1955_v28 }
 0x459   : > { %2934 = vrcp.f32 %v1969_v23  ;;  %v2060_v32 = vsub.f32 0.0, %v1956_v44  ;;  %v2061_v7 = vsub.f32 0.0, %v1957_v50  ;;  %v2063_v11 = vmul.f32 %v2055_v20, %v1951_v57 }
 0x45a   : > { %2936 = vrcp.f32 %v1970_v51  ;;  %v2064_v36 = vmul.f32 %v2056_v60, %v1952_v63  ;;  %v2062_v25 = vsub.f32 0.0, %v1958_v29  ;;  %v2065_v22 = vmul.f32 %v2057_v49, %v1953_v26 }
 0x45b   : > { %2938 = vrcp.f32 %v1971_v54  ;;  %v2066_v4 = vmul.f32 %v2058_v55, %v1954_v17  ;;  %v5054_v38 = vmul.f32 0.5, %v1913_v62  ;;  %vm1935_vm11 = vcmp.ge.f32.partialorder %v5021_v31, 0.0 }
 0x45c   : > { %2940 = vrcp.f32 %v1972_v1  ;;  %v2067_v43 = vmul.f32 %v2059_v9, %v1955_v28  ;;  %v2068_v5 = vmul.f32 %v2060_v32, %v1956_v44  ;;  %v2071_v48 = vmul.f32 1.442695, %v2063_v11 }
 0x45d   : > { %2942 = vrcp.f32 %v1973_v0  ;;  %v2073_v35 = vmul.f32 1.442695, %v2064_v36  ;;  %vm1936_vm12 = vcmp.ge.f32.partialorder %v5023_v13, 0.0  ;;  %v2069_v27 = vmul.f32 %v2061_v7, %v1957_v50 }
 0x45e   : > { %2944 = vrcp.f32 %v1974_v53  ;;  %v2075_v56 = vmul.f32 1.442695, %v2065_v22  ;;  %vm1937_vm13 = vcmp.ge.f32.partialorder %v5025_v41, 0.0  ;;  %vm1938_vm14 = vcmp.ge.f32.partialorder %v5028_v42, 0.0 }
 0x45f   : > { %v2070_v33 = vmul.f32 %v2062_v25, %v1958_v29  ;;  %v2077_v18 = vmul.f32 1.442695, %v2066_v4  ;;  %vm1939_vm15 = vcmp.ge.f32.partialorder %v5031_v58, 0.0  ;;  %vm1940_vm1 = vcmp.ge.f32.partialorder %v5034_v59, 0.0 }
 0x460   : > { %2946 = vpow2.f32 %v2071_v48  ;;  %v2079_v3 = vmul.f32 1.442695, %v2067_v43  ;;  %v5572_v62 = vmov -1.0   ;;  %v2081_v41 = vmul.f32 1.442695, %v2068_v5 }
 0x461   : > { %v5062_v52 = vpop.eup %2930  ;;  %v5067_v13 = vsel %vm1935_vm11, 1.0, %v5572_v62  ;;  %v5070_v57 = vsel %vm1936_vm12, 1.0, %v5572_v62  ;;  %2948 = vpow2.f32 %v2073_v35  ;;  %v5075_v26 = vsel %vm1937_vm13, 1.0, %v5572_v62 }
 0x462   : > { %v5072_v63 = vpop.eup %2932  ;;  %v1983_v17 = vmul.f32 1.0614054, %v5062_v52  ;;  %2950 = vpow2.f32 %v2075_v56  ;;  %v2083_v28 = vmul.f32 1.442695, %v2069_v27  ;;  %v5083_v31 = vsel %vm1938_vm14, 1.0, %v5572_v62 }
 0x463   : > { %v5078_v44 = vpop.eup %2934  ;;  %v1984_v50 = vmul.f32 1.0614054, %v5072_v63  ;;  %2952 = vpow2.f32 %v2077_v18  ;;  %v2085_v29 = vmul.f32 1.442695, %v2070_v33  ;;  %v5091_v40 = vsel %vm1939_vm15, 1.0, %v5572_v62 }
 0x464   : > { %v5086_v61 = vpop.eup %2936  ;;  %v1985_v21 = vmul.f32 1.0614054, %v5078_v44  ;;  %v1991_v2 = vadd.f32 -1.4531521, %v1983_v17  ;;  %2954 = vpow2.f32 %v2079_v3  ;;  %v5099_v42 = vsel %vm1940_vm1, 1.0, %v5572_v62 }
 0x465   : > { %v5094_v8 = vpop.eup %2938  ;;  %v1986_v46 = vmul.f32 1.0614054, %v5086_v61  ;;  %v1992_v10 = vadd.f32 -1.4531521, %v1984_v50  ;;  %2956 = vpow2.f32 %v2081_v41  ;;  %vm1941_vm2 = vcmp.ge.f32.partialorder %v5037_v24, 0.0 }
 0x466   : > { %v5102_v14 = vpop.eup %2940  ;;  %v1987_v58 = vmul.f32 1.0614054, %v5094_v8  ;;  %v1993_v15 = vadd.f32 -1.4531521, %v1985_v21  ;;  %v1999_v6 = vmul.f32 %v5062_v52, %v1991_v2  ;;  %2958 = vpow2.f32 %v2083_v28 }
 0x467   : > { %v5106_v23 = vpop.eup %2942  ;;  %v1988_v51 = vmul.f32 1.0614054, %v5102_v14  ;;  %v1994_v54 = vadd.f32 -1.4531521, %v1986_v46  ;;  %v2000_v59 = vmul.f32 %v5072_v63, %v1992_v10  ;;  %2960 = vpow2.f32 %v2085_v29 }
 0x468   : > { %v5110_v1 = vpop.eup %2944  ;;  %v1989_v0 = vmul.f32 1.0614054, %v5106_v23  ;;  %v1995_v20 = vadd.f32 -1.4531521, %v1987_v58  ;;  %v2001_v60 = vmul.f32 %v5078_v44, %v1993_v15  ;;  %v2007_v49 = vadd.f32 1.4214138, %v1999_v6 }
 0x469   : > { %v1990_v55 = vmul.f32 1.0614054, %v5110_v1  ;;  %v1996_v53 = vadd.f32 -1.4531521, %v1988_v51  ;;  %v2002_v9 = vmul.f32 %v5086_v61, %v1994_v54  ;;  %v2008_v32 = vadd.f32 1.4214138, %v2000_v59 }
 0x46a   : > { %v2947_v7 = vpop.eup %2946  ;;  %v1997_v11 = vadd.f32 -1.4531521, %v1989_v0  ;;  %v2003_v36 = vmul.f32 %v5094_v8, %v1995_v20  ;;  %v2009_v25 = vadd.f32 1.4214138, %v2001_v60  ;;  %v2015_v22 = vmul.f32 %v5062_v52, %v2007_v49 }
 0x46b   : > { %v2949_v4 = vpop.eup %2948  ;;  %v1998_v43 = vadd.f32 -1.4531521, %v1990_v55  ;;  %v2004_v5 = vmul.f32 %v5102_v14, %v1996_v53  ;;  %v2010_v48 = vadd.f32 1.4214138, %v2002_v9  ;;  %v2016_v35 = vmul.f32 %v5072_v63, %v2008_v32 }
 0x46c   : > { %v2951_v27 = vpop.eup %2950  ;;  %v2005_v56 = vmul.f32 %v5106_v23, %v1997_v11  ;;  %v2011_v33 = vadd.f32 1.4214138, %v2003_v36  ;;  %v2017_v18 = vmul.f32 %v5078_v44, %v2009_v25  ;;  %v2023_v3 = vadd.f32 -0.28449672, %v2015_v22 }
 0x46d   : > { %v2953_v41 = vpop.eup %2952  ;;  %v2006_v17 = vmul.f32 %v5110_v1, %v1998_v43  ;;  %v2012_v28 = vadd.f32 1.4214138, %v2004_v5  ;;  %v2018_v50 = vmul.f32 %v5086_v61, %v2010_v48  ;;  %v2024_v29 = vadd.f32 -0.28449672, %v2016_v35 }
 0x46e   : > { %v2955_v21 = vpop.eup %2954  ;;  %v2013_v2 = vadd.f32 1.4214138, %v2005_v56  ;;  %v2019_v46 = vmul.f32 %v5094_v8, %v2011_v33  ;;  %v2025_v10 = vadd.f32 -0.28449672, %v2017_v18  ;;  %v2031_v58 = vmul.f32 %v5062_v52, %v2023_v3 }
 0x46f   : > { %v2957_v15 = vpop.eup %2956  ;;  %v2014_v6 = vadd.f32 1.4214138, %v2006_v17  ;;  %v2020_v51 = vmul.f32 %v5102_v14, %v2012_v28  ;;  %v2026_v54 = vadd.f32 -0.28449672, %v2018_v50  ;;  %v2032_v59 = vmul.f32 %v5072_v63, %v2024_v29 }
 0x470   : > { %v2959_v0 = vpop.eup %2958  ;;  %v2021_v20 = vmul.f32 %v5106_v23, %v2013_v2  ;;  %v2027_v60 = vadd.f32 -0.28449672, %v2019_v46  ;;  %v2033_v49 = vmul.f32 %v5078_v44, %v2025_v10  ;;  %v2039_v55 = vadd.f32 0.2548296, %v2031_v58 }
 0x471   : > { %v2961_v53 = vpop.eup %2960  ;;  %v2022_v9 = vmul.f32 %v5110_v1, %v2014_v6  ;;  %v2028_v32 = vadd.f32 -0.28449672, %v2020_v51  ;;  %v2034_v11 = vmul.f32 %v5086_v61, %v2026_v54  ;;  %v2040_v36 = vadd.f32 0.2548296, %v2032_v59 }
 0x472   : > { %v2029_v25 = vadd.f32 -0.28449672, %v2021_v20  ;;  %v2035_v22 = vmul.f32 %v5094_v8, %v2027_v60  ;;  %v2041_v43 = vadd.f32 0.2548296, %v2033_v49  ;;  %v2047_v5 = vmul.f32 %v5062_v52, %v2039_v55 }
 0x473   : > { %v2030_v48 = vadd.f32 -0.28449672, %v2022_v9  ;;  %v2036_v35 = vmul.f32 %v5102_v14, %v2028_v32  ;;  %v2042_v56 = vadd.f32 0.2548296, %v2034_v11  ;;  %v2048_v33 = vmul.f32 %v5072_v63, %v2040_v36 }
 0x474   : > { %v2037_v18 = vmul.f32 %v5106_v23, %v2029_v25  ;;  %v2043_v3 = vadd.f32 0.2548296, %v2035_v22  ;;  %v2049_v17 = vmul.f32 %v5078_v44, %v2041_v43  ;;  %v2087_v28 = vmul.f32 %v2947_v7, %v2047_v5 }
 0x475   : > { %vm1942_vm3 = vcmp.ge.f32.partialorder %v5040_v16, 0.0  ;;  %v2038_v50 = vmul.f32 %v5110_v1, %v2030_v48  ;;  %v2044_v29 = vadd.f32 0.2548296, %v2036_v35  ;;  %v2050_v52 = vmul.f32 %v5086_v61, %v2042_v56 }
 0x476   : > { %v2088_v2 = vmul.f32 %v2949_v4, %v2048_v33  ;;  %v2045_v46 = vadd.f32 0.2548296, %v2037_v18  ;;  %v2051_v10 = vmul.f32 %v5094_v8, %v2043_v3  ;;  %v2089_v58 = vmul.f32 %v2951_v27, %v2049_v17 }
 0x477   : > { %v2095_v6 = vsub.f32 1.0, %v2087_v28  ;;  %v2046_v63 = vadd.f32 0.2548296, %v2038_v50  ;;  %v2052_v51 = vmul.f32 %v5102_v14, %v2044_v29  ;;  %v2090_v54 = vmul.f32 %v2953_v41, %v2050_v52 }
 0x478   : > { %v2096_v59 = vsub.f32 1.0, %v2088_v2  ;;  %v2053_v44 = vmul.f32 %v5106_v23, %v2045_v46  ;;  %v2091_v7 = vmul.f32 %v2955_v21, %v2051_v10  ;;  %v2097_v20 = vsub.f32 1.0, %v2089_v58 }
 0x479   : > { %v2103_v60 = vmul.f32 %v2095_v6, %v5067_v13  ;;  %v2054_v49 = vmul.f32 %v5110_v1, %v2046_v63  ;;  %v2092_v61 = vmul.f32 %v2957_v15, %v2052_v51  ;;  %v2098_v4 = vsub.f32 1.0, %v2090_v54  ;;  %v2194_v54 = vld [vmem:[%s5401_s11] sm:$0xff] }
 0x47a   : > { %v2104_v55 = vmul.f32 %v2096_v59, %v5070_v57  ;;  %v2093_v8 = vmul.f32 %v2959_v0, %v2053_v44  ;;  %v2099_v27 = vsub.f32 1.0, %v2091_v7  ;;  %v2105_v9 = vmul.f32 %v2097_v20, %v5075_v26  ;;  %v2195_v59 = vld [vmem:[%s5401_s11 + $0x8] sm:$0xff]  ;;  %v2196_v7 = vld [vmem:[%s5401_s11 + $0x10] sm:$0xff]  ;;  %v2197_v20 = vld [vmem:[%s5401_s11 + $0x18] sm:$0xff] }
 0x47b   : > { %v2111_v32 = vadd.f32 1.0, %v2103_v60  ;;  %v2094_v14 = vmul.f32 %v2961_v53, %v2054_v49  ;;  %v2100_v41 = vsub.f32 1.0, %v2092_v61  ;;  %v2106_v11 = vmul.f32 %v2098_v4, %v5083_v31  ;;  %v2198_v49 = vld [vmem:[%s5401_s11 + $0x20] sm:$0xff]  ;;  %v2199_v61 = vld [vmem:[%s5401_s11 + $0x28] sm:$0xff]  ;;  %v2200_v4 = vld [vmem:[%s5401_s11 + $0x30] sm:$0xff] }
 0x47c   : > { %v2112_v23 = vadd.f32 1.0, %v2104_v55  ;;  %v2101_v21 = vsub.f32 1.0, %v2093_v8  ;;  %v2107_v36 = vmul.f32 %v2099_v27, %v5091_v40  ;;  %v2113_v13 = vadd.f32 1.0, %v2105_v9  ;;  %v2201_v8 = vld [vmem:[%s5401_s11 + $0x38] sm:$0xff]  ;;  %v2202_v9 = vld [vmem:[%s5401_s11 + $0x40] sm:$0xff] }
 0x47d   : > { %v5152_v1 = vmul.f32 %v2111_v32, %v5042_v39  ;;  %v2102_v15 = vsub.f32 1.0, %v2094_v14  ;;  %v2108_v57 = vmul.f32 %v2100_v41, %v5099_v42  ;;  %v2114_v0 = vadd.f32 1.0, %v2106_v11  ;;  %v2203_v32 = vld [vmem:[%s5401_s11 + $0x48] sm:$0xff]  ;;  %v2204_v41 = vld [vmem:[%s5401_s11 + $0x50] sm:$0xff]  ;;  %v2205_v11 = vld [vmem:[%s5401_s11 + $0x58] sm:$0xff] }
 0x47e   : > { %v5156_v25 = vmul.f32 %v2112_v23, %v5052_v12  ;;  %v1922_v26 = vmul.f32 0.5, %v5011_v34  ;;  %v1949_v31 = vsel %vm1941_vm2, 1.0, %v5572_v62  ;;  %v2115_v22 = vadd.f32 1.0, %v2107_v36  ;;  %v2207_v36 = vld [vmem:[%s5401_s11 + $0x68] sm:$0xff] }
 0x47f   : > { %v2109_v53 = vmul.f32 %v2101_v21, %v1949_v31  ;;  %v5163_v40 = vmul.f32 %v2113_v13, %v5054_v38  ;;  %v1923_v42 = vmul.f32 0.5, %v5013_v37  ;;  %v1950_v12 = vsel %vm1942_vm3, 1.0, %v5572_v62  ;;  %v2206_v21 = vld [vmem:[%s5401_s11 + $0x60] sm:$0xff] }
 0x480   : > { %v2127_v39 = vadd.f32 %v5156_v25, %v5152_v1  ;;  %v2110_v43 = vmul.f32 %v2102_v15, %v1950_v12  ;;  %v2116_v34 = vadd.f32 1.0, %v2108_v57  ;;  %v5171_v5 = vmul.f32 %v2114_v0, %v1922_v26  ;;  %v2208_v15 = vld [vmem:[%s5401_s11 + $0x70] sm:$0xff]  ;;  %v2209_v57 = vld [vmem:[%s5401_s11 + $0x78] sm:$0xff] }
 0x481   : > { %v1924_v48 = vmul.f32 0.5, %v5015_v30  ;;  %v2117_v35 = vadd.f32 1.0, %v2109_v53  ;;  %v5175_v38 = vmul.f32 %v2115_v22, %v1923_v42  ;;  %v1925_v33 = vmul.f32 0.5, %v5017_v47 }
 0x482   : > { %v2128_v24 = vadd.f32 %v2127_v39, %v5163_v40  ;;  %v2118_v37 = vadd.f32 1.0, %v2110_v43  ;;  %v1926_v3 = vmul.f32 0.5, %v5019_v19  ;;  %v2141_v19 = vld [vmem:[%s5399_s9] sm:$0x1]  ;;  %v2833_v44 = vpack.c.bf16 %v2195_v59, %v2194_v54 }
 0x483   : > { %v5179_v18 = vmul.f32 %v2116_v34, %v1924_v48  ;;  %v5183_v17 = vmul.f32 %v2117_v35, %v1925_v33  ;;  %v2837_v60 = vpack.c.bf16 %v2197_v20, %v2196_v7  ;;  %v2841_v55 = vpack.c.bf16 %v2199_v61, %v2198_v49 }
 0x484   : > { %v2129_v56 = vadd.f32 %v2128_v24, %v5171_v5  ;;  %v5186_v50 = vmul.f32 %v2118_v37, %v1926_v3  ;;  %2834 = vmatprep.subr.bf16.mxu0 %v2833_v44  ;;  %2865 = vmatprep.subr.bf16.mxu1 %v2833_v44  ;;  %v2845_v27 = vpack.c.bf16 %v2201_v8, %v2200_v4  ;;  %v2184_v59 = vsub.s32 0, %v3311_v45 }
 0x485   : > { %2836 = vmatpush3.bf16.msra.mxu0 %v2833_v44  ;;  %2873 = vmatpush3.bf16.msra.mxu1 %v2833_v44  ;;  %v2849_v14 = vpack.c.bf16 %v2203_v32, %v2202_v9  ;;  %v2853_v23 = vpack.c.bf16 %v2205_v11, %v2204_v41  ;;  %v2857_v13 = vpack.c.bf16 %v2207_v36, %v2206_v21 }
 0x486   : > { %v2130_v16 = vadd.f32 %v2129_v56, %v5175_v38  ;;  %2838 = vmatprep.subr.bf16.mxu0 %v2837_v60  ;;  %2866 = vmatprep.subr.bf16.mxu1 %v2837_v60  ;;  %v2861_v0 = vpack.c.bf16 %v2209_v57, %v2208_v15 }
 0x488   : > { %v2131_v28 = vadd.f32 %v2130_v16, %v5179_v18 }
 0x489   : > { %2840 = vmatpush3.bf16.msra.mxu0 %v2837_v60  ;;  %2874 = vmatpush3.bf16.msra.mxu1 %v2837_v60 }
 0x48a   : > { %v2132_v30 = vadd.f32 %v2131_v28, %v5183_v17  ;;  %2842 = vmatprep.subr.bf16.mxu0 %v2841_v55  ;;  %2867 = vmatprep.subr.bf16.mxu1 %v2841_v55 }
 0x48c   : > { %v2133_v29 = vadd.f32 %v2132_v30, %v5186_v50 }
 0x48d   : > { %2844 = vmatpush3.bf16.msra.mxu0 %v2841_v55  ;;  %2875 = vmatpush3.bf16.msra.mxu1 %v2841_v55 }
 0x48e   : > { %v2134_v52 = vrot.slane %v2133_v29, 4  ;;  %2846 = vmatprep.subr.bf16.mxu0 %v2845_v27  ;;  %2868 = vmatprep.subr.bf16.mxu1 %v2845_v27 }
 0x490   : > { %v2135_v2 = vadd.f32 %v2134_v52, %v2133_v29 }
 0x491   : > { %2848 = vmatpush3.bf16.msra.mxu0 %v2845_v27  ;;  %2876 = vmatpush3.bf16.msra.mxu1 %v2845_v27 }
 0x492   : > { %v2136_v47 = vrot.slane %v2135_v2, 2  ;;  %2850 = vmatprep.subr.bf16.mxu0 %v2849_v14  ;;  %2869 = vmatprep.subr.bf16.mxu1 %v2849_v14 }
 0x494   : > { %v2137_v46 = vadd.f32 %v2136_v47, %v2135_v2 }
 0x495   : > { %2852 = vmatpush3.bf16.msra.mxu0 %v2849_v14  ;;  %2877 = vmatpush3.bf16.msra.mxu1 %v2849_v14 }
 0x496   : > { %v2138_v10 = vrot.slane %v2137_v46, 1  ;;  %2854 = vmatprep.subr.bf16.mxu0 %v2853_v23  ;;  %2870 = vmatprep.subr.bf16.mxu1 %v2853_v23 }
 0x498   : > { %v2139_v58 = vadd.f32 %v2138_v10, %v2137_v46 }
 0x499   : > { %2856 = vmatpush3.bf16.msra.mxu0 %v2853_v23  ;;  %2878 = vmatpush3.bf16.msra.mxu1 %v2853_v23 }
 0x49a   : > { %v2140_v6 = vmul.f32 0.001953125, %v2139_v58  ;;  %2858 = vmatprep.subr.bf16.mxu0 %v2857_v13  ;;  %2871 = vmatprep.subr.bf16.mxu1 %v2857_v13  ;;  %v2173_v58 = vld [vmem:[%s5400_s10] sm:$0x1] }
 0x49c   : > { %v2142_v63 = vmul.f32 %v2141_v19, %v2140_v6 }
 0x49d   : > { %2860 = vmatpush3.bf16.msra.mxu0 %v2857_v13  ;;  %2879 = vmatpush3.bf16.msra.mxu1 %v2857_v13 }
 0x49e   : > { %v2144_v51 = vsel %vm2143_vm4, %v2142_v63, 0.0  ;;  %2862 = vmatprep.subr.bf16.mxu0 %v2861_v0  ;;  %2872 = vmatprep.subr.bf16.mxu1 %v2861_v0 }
 0x49f   : > { %2145 = vadd.xlane.f32.xlu0 %v2144_v51 }
 0x4a1   : > { %2864 = vmatpush3.bf16.msra.mxu0 %v2861_v0  ;;  %2880 = vmatpush3.bf16.msra.mxu1 %v2861_v0 }
 0x52c   : > { %v2146_v26 = vpop.xlane.xlu0 %2145 }
 0x52d   : > { %v2148_v31 = vmul.f32 0.70710677, %v2146_v26  ;;  %v2147_v46 = vmul.f32 0.5, %v2146_v26 }
 0x52f   : > { %v2151_v53 = vand.u32 2147483647, %v2148_v31  ;;  %vm2149_vm5 = vcmp.ge.f32.partialorder %v2148_v31, 0.0 }
 0x530   : > { %v2150_v2 = vsel %vm2149_vm5, 1.0, %v5572_v62 }
 0x531   : > { %v2152_v22 = vmul.f32 0.3275911, %v2151_v53  ;;  %v2164_v42 = vsub.f32 0.0, %v2151_v53 }
 0x533   : > { %v2153_v39 = vadd.f32 1.0, %v2152_v22  ;;  %v2165_v43 = vmul.f32 %v2164_v42, %v2151_v53 }
 0x535   : > { %2962 = vrcp.f32 %v2153_v39  ;;  %v2166_v48 = vmul.f32 1.442695, %v2165_v43 }
 0x537   : > { %2964 = vpow2.f32 %v2166_v48 }
 0x53f   : > { %v2963_v12 = vpop.eup %2962 }
 0x540   : > { %v2155_v34 = vmul.f32 1.0614054, %v2963_v12 }
 0x541   : > { %v2965_v30 = vpop.eup %2964 }
 0x542   : > { %v2156_v24 = vadd.f32 -1.4531521, %v2155_v34 }
 0x544   : > { %v2157_v35 = vmul.f32 %v2963_v12, %v2156_v24 }
 0x546   : > { %v2158_v56 = vadd.f32 1.4214138, %v2157_v35 }
 0x548   : > { %v2159_v33 = vmul.f32 %v2963_v12, %v2158_v56 }
 0x54a   : > { %v2160_v37 = vadd.f32 -0.28449672, %v2159_v33 }
 0x54c   : > { %v2161_v16 = vmul.f32 %v2963_v12, %v2160_v37 }
 0x54e   : > { %v2162_v3 = vadd.f32 0.2548296, %v2161_v16 }
 0x550   : > { %v2163_v28 = vmul.f32 %v2963_v12, %v2162_v3 }
 0x552   : > { %v2168_v29 = vmul.f32 %v2965_v30, %v2163_v28 }
 0x554   : > { %v2169_v52 = vsub.f32 1.0, %v2168_v29 }
 0x556   : > { %v2170_v47 = vmul.f32 %v2169_v52, %v2150_v2 }
 0x558   : > { %v2171_v10 = vadd.f32 1.0, %v2170_v47 }
 0x55a   : > { %v2172_v19 = vmul.f32 %v2171_v10, %v2147_v46 }
 0x55c   : > { %v2174_v6 = vmul.f32 %v2173_v58, %v2172_v19 }
 0x55e   : > { %v2720_v63 = vmul.f32 -1.442695, %v2174_v6 }
 0x560   : > { %2966 = vpow2.f32 %v2720_v63 }
 0x56a   : > { %v2967_v51 = vpop.eup %2966 }
 0x56b   : > { %v2179_v54 = vadd.f32 1.0, %v2967_v51 }
 0x56d   : > { %2968 = vrcp.f32 %v2179_v54 }
 0x577   : > { %v2969_v44 = vpop.eup %2968 }
 0x578   : > { %v2185_v7 = vrot.slane %v2969_v44, %v2184_v59 }
 0x57a   : > { %v2186_v62 = vmul.f32 %v2185_v7, %v5152_v1  ;;  %v2188_v20 = vmul.f32 %v2185_v7, %v5163_v40  ;;  %v2187_v60 = vmul.f32 %v2185_v7, %v5156_v25  ;;  %v2189_v49 = vmul.f32 %v2185_v7, %v5171_v5 }
 0x57b   : > { %v2190_v61 = vmul.f32 %v2185_v7, %v5175_v38  ;;  %v2191_v4 = vmul.f32 %v2185_v7, %v5179_v18  ;;  %v2192_v45 = vmul.f32 %v2185_v7, %v5183_v17  ;;  %v2193_v1 = vmul.f32 %v2185_v7, %v5186_v50 }
 0x57c   : > { %2813 = vmatprep.mubr.f32.mxu0 %v2186_v62  ;;  %2816 = vmatprep.mubr.f32.mxu1 %v2188_v20 }
 0x57d   : > { %2814 = vmatmul.mubr.f32.vlgmr.msra.gmra.mrb[8].mxu0 %v2187_v60  ;;  %2817 = vmatmul.mubr.f32.vlgmr.msra.gmra.mrb[0].mxu1 %v2189_v49 }
 0x57e   : > { %2819 = vmatprep.mubr.f32.mxu1 %v2190_v61 }
 0x581   : > { %2820 = vmatmul.mubr.f32.gmra.mrb[2].mxu1 %v2191_v4 }
 0x582   : > { %2822 = vmatprep.mubr.f32.mxu1 %v2192_v45 }
 0x585   : > { %2823 = vmatmul.mubr.f32.gmra.mrb[4].mxu1 %v2193_v1 }
 0x650   : > { %v5254_v40 = vpop.f32.mrb[8].mxu0  ;;  %v5256_v25 = vpop.f32.mrb[0].mxu1 }
 0x651   : > { %v2332_v5 = vsel %vm492_vm0, %v5254_v40, 0.0  ;;  %v2355_v38 = vmul.f32 %v5254_v40, %v5254_v40  ;;  %v5262_v55 = vpop.f32.mrb[9].mxu0  ;;  %v5264_v18 = vpop.f32.mrb[1].mxu1  ;;  %v2357_v32 = vmul.f32 %v5256_v25, %v5256_v25  ;;  %v2336_v13 = vsel %vm492_vm0, %v5256_v25, 0.0 }
 0x652   : > { %v2331_v17 = vsel %vm492_vm0, %v5262_v55, 0.0  ;;  %v2354_v50 = vmul.f32 %v5262_v55, %v5262_v55  ;;  %v2356_v8 = vmul.f32 %v5264_v18, %v5264_v18  ;;  %v2334_v41 = vsel %vm492_vm0, %v5264_v18, 0.0 }
 0x653   : > { %v2363_v27 = vsel %vm492_vm0, %v2355_v38, 0.0  ;;  %v2333_v9 = vadd.f32 %v2332_v5, %v2331_v17  ;;  %v2367_v31 = vsel %vm492_vm0, %v2357_v32, 0.0  ;;  %v2315_v17 = vld [vmem:[%s5402_s12] sm:$0xff]  ;;  %v2316_v32 = vld [vmem:[%s5402_s12 + $0x8] sm:$0xff] }
 0x654   : > { %v2362_v14 = vsel %vm492_vm0, %v2354_v50, 0.0  ;;  %v5278_v11 = vpop.f32.mrb[2].mxu1  ;;  %v2365_v15 = vsel %vm492_vm0, %v2356_v8, 0.0 }
 0x655   : > { %v2364_v23 = vadd.f32 %v2363_v27, %v2362_v14  ;;  %v2335_v21 = vadd.f32 %v2334_v41, %v2333_v9  ;;  %v5280_v36 = vpop.f32.mrb[3].mxu1  ;;  %v2359_v53 = vmul.f32 %v5278_v11, %v5278_v11  ;;  %v2340_v34 = vsel %vm492_vm0, %v5278_v11, 0.0  ;;  %v2317_v14 = vld [vmem:[%s5402_s12 + $0x10] sm:$0xff]  ;;  %v2318_v41 = vld [vmem:[%s5402_s12 + $0x18] sm:$0xff] }
 0x656   : > { %v2358_v57 = vmul.f32 %v5280_v36, %v5280_v36  ;;  %v2338_v22 = vsel %vm492_vm0, %v5280_v36, 0.0 }
 0x657   : > { %v2366_v0 = vadd.f32 %v2365_v15, %v2364_v23  ;;  %v2337_v26 = vadd.f32 %v2336_v13, %v2335_v21  ;;  %v2371_v33 = vsel %vm492_vm0, %v2359_v53, 0.0  ;;  %v2319_v21 = vld [vmem:[%s5402_s12 + $0x20] sm:$0xff]  ;;  %v2320_v13 = vld [vmem:[%s5402_s12 + $0x28] sm:$0xff]  ;;  %v2321_v15 = vld [vmem:[%s5402_s12 + $0x30] sm:$0xff] }
 0x658   : > { %v5292_v39 = vpop.f32.mrb[4].mxu1  ;;  %v2369_v24 = vsel %vm492_vm0, %v2358_v57, 0.0  ;;  %v2324_v57 = vld [vmem:[%s5403_s13 + $0x8] sm:$0xff] }
 0x659   : > { %v2339_v42 = vadd.f32 %v2338_v22, %v2337_v26  ;;  %v2368_v12 = vadd.f32 %v2367_v31, %v2366_v0  ;;  %v5294_v43 = vpop.f32.mrb[5].mxu1  ;;  %v2361_v37 = vmul.f32 %v5292_v39, %v5292_v39  ;;  %v2344_v29 = vsel %vm492_vm0, %v5292_v39, 0.0  ;;  %v2325_v22 = vld [vmem:[%s5403_s13 + $0x10] sm:$0xff] }
 0x65a   : > { %v2360_v48 = vmul.f32 %v5294_v43, %v5294_v43  ;;  %v2342_v16 = vsel %vm492_vm0, %v5294_v43, 0.0 }
 0x65b   : > { %v2370_v35 = vadd.f32 %v2369_v24, %v2368_v12  ;;  %v2341_v56 = vadd.f32 %v2340_v34, %v2339_v42  ;;  %v2375_v47 = vsel %vm492_vm0, %v2361_v37, 0.0  ;;  %v2327_v42 = vld [vmem:[%s5403_s13 + $0x20] sm:$0xff] }
 0x65c   : > { %v2373_v30 = vsel %vm492_vm0, %v2360_v48, 0.0  ;;  %v2328_v48 = vld [vmem:[%s5403_s13 + $0x28] sm:$0xff] }
 0x65d   : > { %v2343_v3 = vadd.f32 %v2342_v16, %v2341_v56  ;;  %v2372_v28 = vadd.f32 %v2371_v33, %v2370_v35  ;;  %v2329_v35 = vld [vmem:[%s5403_s13 + $0x30] sm:$0xff]  ;;  %v2330_v56 = vld [vmem:[%s5403_s13 + $0x38] sm:$0xff] }
 0x65f   : > { %v2345_v52 = vadd.f32 %v2344_v29, %v2343_v3  ;;  %v2374_v2 = vadd.f32 %v2373_v30, %v2372_v28 }
 0x661   : > { %2346 = vadd.xlane.f32.xlu0 %v2345_v52  ;;  %v2376_v46 = vadd.f32 %v2375_v47, %v2374_v2 }
 0x665   : > { %2377 = vadd.xlane.f32.xlu0 %v2376_v46 }
 0x6ee   : > { %v2347_v10 = vpop.xlane.xlu0 %2346 }
 0x6ef   : > { %v2348_v58 = vrot.slane %v2347_v10, 4 }
 0x6f1   : > { %v2349_v19 = vadd.f32 %v2348_v58, %v2347_v10 }
 0x6f2   : > { %v2378_v6 = vpop.xlane.xlu0 %2377 }
 0x6f3   : > { %v2350_v63 = vrot.slane %v2349_v19, 2  ;;  %v2379_v51 = vrot.slane %v2378_v6, 4 }
 0x6f5   : > { %v2351_v54 = vadd.f32 %v2350_v63, %v2349_v19  ;;  %v2380_v59 = vadd.f32 %v2379_v51, %v2378_v6  ;;  %v2972_v51 = vld [vmem:[%s3082_s18] sm:$0xff] }
 0x6f7   : > { %v2352_v44 = vrot.slane %v2351_v54, 1  ;;  %v2381_v7 = vrot.slane %v2380_v59, 2 }
 0x6f9   : > { %v2353_v62 = vadd.f32 %v2352_v44, %v2351_v54  ;;  %v2382_v20 = vadd.f32 %v2381_v7, %v2380_v59  ;;  %v2973_v59 = vld [vmem:[%s3082_s18 + $0x8] sm:$0xff]  ;;  %v2974_v7 = vld [vmem:[%s3082_s18 + $0x10] sm:$0xff] }
 0x6fb   : > { %v2383_v60 = vrot.slane %v2382_v20, 1  ;;  %v2385_v49 = vmul.f32 0.00048828125, %v2353_v62 }
 0x6fd   : > { %v2384_v61 = vadd.f32 %v2383_v60, %v2382_v20  ;;  %v2387_v4 = vmul.f32 %v2385_v49, %v2385_v49  ;;  %v2390_v50 = vsub.f32 %v5262_v55, %v2385_v49  ;;  %v2391_v8 = vsub.f32 %v5254_v40, %v2385_v49  ;;  %v2975_v20 = vld [vmem:[%s3082_s18 + $0x18] sm:$0xff] }
 0x6fe   : > { %v2392_v27 = vsub.f32 %v5264_v18, %v2385_v49  ;;  %v2393_v9 = vsub.f32 %v5256_v25, %v2385_v49  ;;  %v2394_v55 = vsub.f32 %v5280_v36, %v2385_v49  ;;  %v2395_v40 = vsub.f32 %v5278_v11, %v2385_v49  ;;  %v2322_v11 = vld [vmem:[%s5402_s12 + $0x38] sm:$0xff]  ;;  %v2323_v36 = vld [vmem:[%s5403_s13] sm:$0xff] }
 0x6ff   : > { %v2386_v45 = vmul.f32 0.00048828125, %v2384_v61  ;;  %v2396_v18 = vsub.f32 %v5294_v43, %v2385_v49  ;;  %v2397_v25 = vsub.f32 %v5292_v39, %v2385_v49  ;;  %v2326_v39 = vld [vmem:[%s5403_s13 + $0x18] sm:$0xff]  ;;  %v2976_v49 = vld [vmem:[%s3082_s18 + $0x20] sm:$0xff] }
 0x701   : > { %v2388_v1 = vsub.f32 %v2386_v45, %v2387_v4  ;;  %v2977_v4 = vld [vmem:[%s3082_s18 + $0x28] sm:$0xff] }
 0x703   : > { %v2389_v5 = vmax.f32 %v2388_v1, 0.0  ;;  %v2978_v1 = vld [vmem:[%s3082_s18 + $0x30] sm:$0xff] }
 0x705   : > { %v2398_v38 = vadd.f32 1e-05, %v2389_v5 }
 0x707   : > { %2970 = vrsqrt.f32 %v2398_v38  ;;  %v2979_v38 = vld [vmem:[%s3082_s18 + $0x38] sm:$0xff] }
 0x711   : > { %v2971_v23 = vpop.eup %2970 }
 0x712   : > { %v2400_v0 = vmul.f32 %v2971_v23, %v2390_v50  ;;  %v2401_v26 = vmul.f32 %v2971_v23, %v2391_v8  ;;  %v2402_v31 = vmul.f32 %v2971_v23, %v2392_v27  ;;  %v2403_v53 = vmul.f32 %v2971_v23, %v2393_v9 }
 0x713   : > { %v2404_v12 = vmul.f32 %v2971_v23, %v2394_v55  ;;  %v2405_v43 = vmul.f32 %v2971_v23, %v2395_v40  ;;  %v2406_v34 = vmul.f32 %v2971_v23, %v2396_v18  ;;  %v2407_v24 = vmul.f32 %v2971_v23, %v2397_v25 }
 0x714   : > { %v2408_v33 = vmul.f32 %v2400_v0, %v2315_v17  ;;  %v2409_v37 = vmul.f32 %v2401_v26, %v2316_v32  ;;  %v2410_v16 = vmul.f32 %v2402_v31, %v2317_v14  ;;  %v2411_v3 = vmul.f32 %v2403_v53, %v2318_v41 }
 0x715   : > { %v2412_v28 = vmul.f32 %v2404_v12, %v2319_v21  ;;  %v2413_v30 = vmul.f32 %v2405_v43, %v2320_v13  ;;  %v2414_v29 = vmul.f32 %v2406_v34, %v2321_v15  ;;  %v2415_v52 = vmul.f32 %v2407_v24, %v2322_v11 }
 0x716   : > { %v2416_v2 = vadd.f32 %v2408_v33, %v2323_v36  ;;  %v2417_v47 = vadd.f32 %v2409_v37, %v2324_v57  ;;  %v2418_v46 = vadd.f32 %v2410_v16, %v2325_v22  ;;  %v2419_v10 = vadd.f32 %v2411_v3, %v2326_v39 }
 0x717   : > { %v2420_v58 = vadd.f32 %v2412_v28, %v2327_v42  ;;  %v2421_v19 = vadd.f32 %v2413_v30, %v2328_v48  ;;  %v2422_v6 = vadd.f32 %v2414_v29, %v2329_v35  ;;  %v2423_v63 = vadd.f32 %v2415_v52, %v2330_v56 }
 0x718   : > { %v2424_v54 = vadd.f32 %v2972_v51, %v2416_v2  ;;  %v2425_v44 = vadd.f32 %v2973_v59, %v2417_v47  ;;  %v2426_v62 = vadd.f32 %v2974_v7, %v2418_v46  ;;  %v2427_v60 = vadd.f32 %v2975_v20, %v2419_v10 }
 0x719   : > { %v2428_v61 = vadd.f32 %v2976_v49, %v2420_v58  ;;  %v2429_v45 = vadd.f32 %v2977_v4, %v2421_v19  ;;  %v2430_v5 = vadd.f32 %v2978_v1, %v2422_v6  ;;  %v2431_v17 = vadd.f32 %v2979_v38, %v2423_v63 }
 0x71a   : > { %2432 = vst.msk [vmem:[%s467_s27] sm:$0xff] %vm492_vm0, %v2424_v54  ;;  %2433 = vst.msk [vmem:[%s467_s27 + $0x8] sm:$0xff] %vm492_vm0, %v2425_v44 }
 0x71b   : > { %2434 = vst.msk [vmem:[%s467_s27 + $0x10] sm:$0xff] %vm492_vm0, %v2426_v62  ;;  %2435 = vst.msk [vmem:[%s467_s27 + $0x18] sm:$0xff] %vm492_vm0, %v2427_v60 }
 0x71c   : > { %2436 = vst.msk [vmem:[%s467_s27 + $0x20] sm:$0xff] %vm492_vm0, %v2428_v61  ;;  %2437 = vst.msk [vmem:[%s467_s27 + $0x28] sm:$0xff] %vm492_vm0, %v2429_v45 }
 0x71d   : > { %2438 = vst.msk [vmem:[%s467_s27 + $0x30] sm:$0xff] %vm492_vm0, %v2430_v5  ;;  %2439 = vst.msk [vmem:[%s467_s27 + $0x38] sm:$0xff] %vm492_vm0, %v2431_v17 }
 0x71e PF: > { %s24_s29 = sadd.s32 1, %s2986_s29  }
 0x71f   : > { %p21_p4 = scmp.ge.s32.totalorder %s24_s29, 4  }
 0x721   :  { %23 = sbr.rel (!%p21_p4) target bundleno = 1 (0x1), region = 132 }

</bundles_post_ra>
